<compile_context>
chip_gen: v6e
topology: v6e:2x2x1
jax: 0.10.0
libtpu: 0.0.40
codegen_flags: <defaults>
</compile_context>

<pallas_src>
import jax
import jax.numpy as jnp
from jax.experimental import pallas as pl
from jax.experimental.pallas import tpu as pltpu

HIDDEN = 512          # self.hidden_size / self.emb_size / fusion_size (no intention)
CONV_IN = 2048        # camera_features 1x1 conv input channels
BN_EPS = 1e-5


# ----------------------------------------------------------------------------
# Kernel 1: camera_features head, G images per grid step.
#   x_ref : (G, HW, 2048)   lane-dense activation slab (f32)
#   w_ref : (2048, 512)     1x1 conv weight^T with BN scale folded in (bf16)
#   b_ref : (1, 512)        folded conv bias + BN shift (f32)
#   o_ref : (1, G, 512)     pooled ego features for this group of images
# ----------------------------------------------------------------------------
def camera_head_kernel(x_ref, w_ref, b_ref, o_ref):
    G, HW, Cin = x_ref.shape
    H = w_ref.shape[1]
    x = jnp.maximum(x_ref[...].reshape(G * HW, Cin), 0.0)            # ReLU (f32)
    x = x.astype(jnp.bfloat16)                                        # MXU LHS
    y = jnp.dot(x, w_ref[...], preferred_element_type=jnp.float32)   # conv+BN scale
    y = y + b_ref[...]                                                # folded bias
    y = jnp.maximum(y, 0.0)                                           # ReLU
    o_ref[0] = jnp.mean(y.reshape(G, HW, H), axis=1)                  # GAP -> (G, 512)


# ----------------------------------------------------------------------------
# Kernel 2: LSTMCell recurrence (input projection hoisted, fully unrolled)
#           fused with message_passing + vel_classifier.  Single invocation.
#   feat_ref : (T, R, 512)   fused per-step inputs, R = B * N1_pad rows (f32)
#   wih_ref  : (512, 2048)   W_ih^T (bf16)
#   whh_ref  : (512, 2048)   W_hh^T (bf16)
#   b_ref    : (1, 2048)     b_ih + b_hh (f32)
#   mask_ref : (B, N1, 1)    1.0 = valid box row, 0.0 = padded/absent box
#   w1_ref   : (512, 512)    fc_emb_1 weight^T (bf16, no bias)
#   w2e_ref  : (1, 512)      fc_emb_2 weight, ego half
#   w2o_ref  : (1, 512)      fc_emb_2 weight, per-box half
#   b2_ref   : (1, 1)        fc_emb_2 bias
#   w3a_ref  : (512, 128)    vel_classifier fc1 weight^T, ego half
#   w3b_ref  : (512, 128)    vel_classifier fc1 weight^T, fusion half
#   b3_ref   : (1, 128)
#   w4_ref   : (1, 128)      vel_classifier fc2 weight
#   b4_ref   : (1, 1)
#   o_ref    : (B, 1)        sigmoid risk score
# ----------------------------------------------------------------------------
def lstm_head_kernel(feat_ref, wih_ref, whh_ref, b_ref, mask_ref,
                     w1_ref, w2e_ref, w2o_ref, b2_ref,
                     w3a_ref, w3b_ref, b3_ref, w4_ref, b4_ref, o_ref):
    T, R, H = feat_ref.shape
    B, N1, _ = mask_ref.shape

    # ---- hoisted LSTM input projection: one big MXU pass for all T steps ----
    # TODO(synk): nn.Dropout(p=0.5) on the LSTM input is identity at inference.
    x_all = feat_ref[...].reshape(T * R, H).astype(jnp.bfloat16)
    xp = (jnp.dot(x_all, wih_ref[...], preferred_element_type=jnp.float32)
          + b_ref[...])                                              # (T*R, 4H)

    # ---- recurrence (T is small & static -> full unroll, gates in f32) ----
    h = jnp.zeros((R, H), jnp.float32)
    c = jnp.zeros((R, H), jnp.float32)
    for t in range(T):
        gates = xp[t * R:(t + 1) * R] + jnp.dot(
            h.astype(jnp.bfloat16), whh_ref[...],
            preferred_element_type=jnp.float32)                      # (R, 4H)
        i = jax.nn.sigmoid(gates[:, 0:H])
        f = jax.nn.sigmoid(gates[:, H:2 * H])
        g = jnp.tanh(gates[:, 2 * H:3 * H])
        o = jax.nn.sigmoid(gates[:, 3 * H:4 * H])
        c = f * c + i * g
        h = o * jnp.tanh(c)

    # ---- message passing: fc_emb_1 across all B*N1 rows in one dot ----
    emb = jnp.dot(h.astype(jnp.bfloat16), w1_ref[...],
                  preferred_element_type=jnp.float32)                # (R, H)
    emb3 = emb.reshape(B, N1, H)
    hx3 = h.reshape(B, N1, H)

    # ego rows sit at flat indices b * N1 (sublane aligned since N1 % 8 == 0)
    ego_emb = jnp.concatenate([emb[b * N1:b * N1 + 1, :] for b in range(B)], 0)
    ori_ego = jnp.concatenate([h[b * N1:b * N1 + 1, :] for b in range(B)], 0)

    obj_score = jnp.sum(emb3 * w2o_ref[...], axis=-1, keepdims=True)     # (B,N1,1)
    ego_score = jnp.sum(ego_emb * w2e_ref[...], axis=-1, keepdims=True)  # (B,1)
    score = obj_score + ego_score.reshape(B, 1, 1) + b2_ref[...]
    score = jnp.where(mask_ref[...] > 0, score, -jnp.inf)   # ego row always valid
    m = jnp.max(score, axis=1, keepdims=True)
    p = jnp.exp(score - m)
    attn = p / jnp.sum(p, axis=1, keepdims=True)                          # softmax
    fusion = jnp.sum(hx3 * attn, axis=1)                                  # (B, H)

    # ---- vel_classifier ----
    # TODO(synk): nn.Dropout before vel_classifier is identity at inference.
    h1 = (jnp.dot(ori_ego, w3a_ref[...], preferred_element_type=jnp.float32)
          + jnp.dot(fusion, w3b_ref[...], preferred_element_type=jnp.float32)
          + b3_ref[...])
    h1 = jnp.maximum(h1, 0.0)                                             # (B, 128)
    logit = jnp.sum(h1 * w4_ref[...], axis=-1, keepdims=True) + b4_ref[...]
    o_ref[...] = jax.nn.sigmoid(logit)


# ----------------------------------------------------------------------------
# Wrapper: the GCN.forward after the external CNN backbones.
# ----------------------------------------------------------------------------
def gcn_forward(params, ego_features, obj_features, trackers):
    B, T, Cin, Hf, Wf = ego_features.shape
    NB = obj_features.shape[2]
    N1 = NB + 1
    N1_pad = ((N1 + 7) // 8) * 8           # sublane-align box rows (mask=0 pads)
    H = HIDDEN
    HW = Hf * Wf
    R = B * N1_pad
    BT = B * T

    # ---------------- camera_features head ----------------
    # Fold conv bias + BatchNorm(eval) into the conv weight; cast weight to bf16.
    bn_scale = params["bn_gamma"] / jnp.sqrt(params["bn_var"] + BN_EPS)
    bn_shift = params["bn_beta"] - params["bn_mean"] * bn_scale
    wc = params["conv_w"].reshape(H, Cin).T * bn_scale[None, :]           # (Cin, H)
    bc = (params["conv_b"] * bn_scale + bn_shift).reshape(1, H)           # (1, H)
    wc_bf16 = wc.astype(jnp.bfloat16)

    # TODO(synk): ideally the backbone emits NHWC directly; this transpose is the
    # only wrapper-side data movement left before the kernels.
    x = ego_features.reshape(BT, Cin, HW).transpose(0, 2, 1)              # (BT,HW,Cin)

    # >=2 parallel grid steps so v7x megacore gets both TensorCores busy.
    G = BT // 2 if BT % 2 == 0 else BT
    NG = BT // G

    ego_pooled = pl.pallas_call(
        camera_head_kernel,
        out_shape=jax.ShapeDtypeStruct((NG, G, H), jnp.float32),
        grid_spec=pltpu.PrefetchScalarGridSpec(
            num_scalar_prefetch=0,
            grid=(NG,),
            in_specs=[
                pl.BlockSpec((G, HW, Cin), lambda i: (i, 0, 0)),
                pl.BlockSpec((Cin, H), lambda i: (0, 0)),
                pl.BlockSpec((1, H), lambda i: (0, 0)),
            ],
            out_specs=pl.BlockSpec((1, G, H), lambda i: (i, 0, 0)),
        ),
        compiler_params=pltpu.CompilerParams(
            dimension_semantics=("parallel",),
            vmem_limit_bytes=32 * 1024 * 1024),
    )(x, wc_bf16, bc)
    ego_pooled = ego_pooled.reshape(B, T, 1, H)

    # ---------------- per-step fused inputs (pad boxes to sublane multiple) ----
    pad_boxes = N1_pad - N1
    obj_padded = jnp.pad(obj_features, ((0, 0), (0, 0), (0, pad_boxes), (0, 0)))
    feat_seq = jnp.concatenate([ego_pooled, obj_padded], axis=2)      # (B,T,N1p,H)
    feat_seq = feat_seq.transpose(1, 0, 2, 3).reshape(T, R, H)        # (T, R, H)

    # Tracker validity mask (ego box always valid; padded rows masked out).
    occ = trackers[:, -1, :, 2] + trackers[:, -1, :, 3]               # (B, NB)
    mask = jnp.concatenate(
        [jnp.ones((B, 1), jnp.float32),
         (occ != 0).astype(jnp.float32),
         jnp.zeros((B, pad_boxes), jnp.float32)], axis=1).reshape(B, N1_pad, 1)

    # ---------------- LSTM + message passing + vel classifier (one call) ----
    wih_bf16 = params["lstm_w_ih"].T.astype(jnp.bfloat16)             # (512, 2048)
    whh_bf16 = params["lstm_w_hh"].T.astype(jnp.bfloat16)             # (512, 2048)
    b_lstm = (params["lstm_b_ih"] + params["lstm_b_hh"]).reshape(1, 4 * H)

    w1_bf16 = params["fc_emb_1_w"].T.astype(jnp.bfloat16)             # (512, 512)
    w2 = params["fc_emb_2_w"].reshape(2 * H)
    w2e = w2[:H].reshape(1, H)
    w2o = w2[H:].reshape(1, H)
    b2 = params["fc_emb_2_b"].reshape(1, 1)
    w3 = params["vel_fc1_w"]                                          # (128, 1024)
    w3a_t = w3[:, :H].T                                               # (512, 128)
    w3b_t = w3[:, H:].T                                               # (512, 128)
    b3 = params["vel_fc1_b"].reshape(1, 128)
    w4 = params["vel_fc2_w"].reshape(1, 128)
    b4 = params["vel_fc2_b"].reshape(1, 1)

    vel = pl.pallas_call(
        lstm_head_kernel,
        out_shape=jax.ShapeDtypeStruct((B, 1), jnp.float32),
        in_specs=[pl.BlockSpec(memory_space=pltpu.MemorySpace.VMEM)] * 14,
        out_specs=pl.BlockSpec(memory_space=pltpu.MemorySpace.VMEM),
        compiler_params=pltpu.CompilerParams(
            vmem_limit_bytes=32 * 1024 * 1024),
    )(feat_seq, wih_bf16, whh_bf16, b_lstm, mask,
      w1_bf16, w2e, w2o, b2, w3a_t, w3b_t, b3, w4, b4)
    return vel.reshape(-1)


# ----------------------------------------------------------------------------
# Pure-JAX reference of the same forward (for correctness checking).
# ----------------------------------------------------------------------------
def gcn_forward_ref(params, ego_features, obj_features, trackers):
    B, T, Cin, Hf, Wf = ego_features.shape
    NB = obj_features.shape[2]
    N1 = NB + 1
    H = HIDDEN

    x = jnp.maximum(ego_features.reshape(B * T, Cin, Hf * Wf), 0.0)
    wc = params["conv_w"].reshape(H, Cin)
    y = jnp.einsum("oc,bcp->bop", wc, x) + params["conv_b"][None, :, None]
    scale = params["bn_gamma"] / jnp.sqrt(params["bn_var"] + BN_EPS)
    shift = params["bn_beta"] - params["bn_mean"] * scale
    y = jnp.maximum(y * scale[None, :, None] + shift[None, :, None], 0.0)
    ego_pooled = jnp.mean(y, axis=-1).reshape(B, T, 1, H)

    feat_seq = jnp.concatenate([ego_pooled, obj_features], axis=2)
    feat_seq = feat_seq.transpose(1, 0, 2, 3).reshape(T, B * N1, H)

    hx = jnp.zeros((B * N1, H), jnp.float32)
    cx = jnp.zeros((B * N1, H), jnp.float32)
    for t in range(T):
        gates = (feat_seq[t] @ params["lstm_w_ih"].T + hx @ params["lstm_w_hh"].T
                 + params["lstm_b_ih"] + params["lstm_b_hh"])
        i, f, g, o = jnp.split(gates, 4, axis=1)
        cx = jax.nn.sigmoid(f) * cx + jax.nn.sigmoid(i) * jnp.tanh(g)
        hx = jax.nn.sigmoid(o) * jnp.tanh(cx)

    occ = trackers[:, -1, :, 2] + trackers[:, -1, :, 3]
    mask = jnp.concatenate([jnp.ones((B, 1), bool), occ != 0], axis=1)
    emb = (hx @ params["fc_emb_1_w"].T).reshape(B, N1, H)
    ego = jnp.broadcast_to(emb[:, 0:1, :], (B, N1, H))
    cat = jnp.concatenate([ego, emb], axis=2).reshape(B * N1, 2 * H)
    score = (cat @ params["fc_emb_2_w"].T + params["fc_emb_2_b"]).reshape(B, N1, 1)
    score = jnp.where(mask[:, :, None], score, -jnp.inf)
    attn = jax.nn.softmax(score, axis=1)
    hx3 = hx.reshape(B, N1, H)
    ori_ego = hx3[:, 0, :]
    fusion = jnp.sum(hx3 * attn, axis=1)
    upd = jnp.concatenate([ori_ego, fusion], axis=1)
    h1 = jnp.maximum(upd @ params["vel_fc1_w"].T + params["vel_fc1_b"], 0.0)
    vel = jax.nn.sigmoid(h1 @ params["vel_fc2_w"].T + params["vel_fc2_b"])
    return vel.reshape(-1)


if __name__ == "__main__":
    # Small shapes consistent with the module: batch=2, time_steps=5,
    # backbone feature map (2048, 4, 4), NUM_BOX=5, hidden=512.
    B, T, NB = 2, 5, 5
    Hf = Wf = 4

    key = jax.random.PRNGKey(0)
    ks = jax.random.split(key, 20)

    def nrm(k, shape, scale):
        return scale * jax.random.normal(k, shape, dtype=jnp.float32)

    params = {
        "conv_w":     nrm(ks[0], (HIDDEN, CONV_IN, 1, 1), 0.02),
        "conv_b":     nrm(ks[1], (HIDDEN,), 0.01),
        "bn_gamma":   1.0 + nrm(ks[2], (HIDDEN,), 0.1),
        "bn_beta":    nrm(ks[3], (HIDDEN,), 0.01),
        "bn_mean":    nrm(ks[4], (HIDDEN,), 0.01),
        "bn_var":     1.0 + jnp.abs(nrm(ks[5], (HIDDEN,), 0.1)),
        "lstm_w_ih":  nrm(ks[6], (4 * HIDDEN, HIDDEN), 0.02),
        "lstm_w_hh":  nrm(ks[7], (4 * HIDDEN, HIDDEN), 0.02),
        "lstm_b_ih":  nrm(ks[8], (4 * HIDDEN,), 0.01),
        "lstm_b_hh":  nrm(ks[9], (4 * HIDDEN,), 0.01),
        "fc_emb_1_w": nrm(ks[10], (HIDDEN, HIDDEN), 0.02),
        "fc_emb_2_w": nrm(ks[11], (1, 2 * HIDDEN), 0.02),
        "fc_emb_2_b": nrm(ks[12], (1,), 0.01),
        "vel_fc1_w":  nrm(ks[13], (128, 2 * HIDDEN), 0.02),
        "vel_fc1_b":  nrm(ks[14], (128,), 0.01),
        "vel_fc2_w":  nrm(ks[15], (1, 128), 0.02),
        "vel_fc2_b":  nrm(ks[16], (1,), 0.01),
    }

    # TODO(synk): pdresnet50 / Riskbench_backbone are external pretrained CNNs;
    # their outputs are modeled as inputs here.
    ego_features = nrm(ks[17], (B, T, CONV_IN, Hf, Wf), 1.0)
    obj_features = nrm(ks[18], (B, T, NB, HIDDEN), 0.5)
    trackers = nrm(ks[19], (B, T, NB, 4), 1.0)
    # Zero width/height of the last two boxes so the attention mask is exercised.
    trackers = trackers.at[:, :, NB - 2:, 2:4].set(0.0)

    vel = gcn_forward(params, ego_features, obj_features, trackers)
    vel = jax.block_until_ready(vel)

    with jax.default_matmul_precision("highest"):
        vel_ref = jax.block_until_ready(
            gcn_forward_ref(params, ego_features, obj_features, trackers))

    assert vel.shape == (B,), (vel.shape, (B,))
    assert bool(jnp.all(jnp.isfinite(vel)))
    assert bool(jnp.allclose(vel, vel_ref, rtol=1e-2, atol=1e-2)), (vel, vel_ref)

    print("KERNEL_OK")
</pallas_src>

<mosaic_0001>
module attributes {stable_mosaic.version = 11 : i64} {
  func.func @camera_head_kernel(%arg0: i32, %arg1: memref<5x16x2048xf32, #tpu.memory_space<vmem>>, %arg2: memref<2048x512xbf16, #tpu.memory_space<vmem>>, %arg3: memref<1x512xf32, #tpu.memory_space<vmem>>, %arg4: memref<1x5x512xf32, #tpu.memory_space<vmem>>) attributes {dimension_semantics = [#tpu.dimension_semantics<parallel>], iteration_bounds = array<i64: 2>, scalar_prefetch = 0 : i64, scratch_operands = 0 : i64, tpu.core_type = #tpu.core_type<tc>, window_params = [{transform_indices = @transform_0, window_bounds = array<i64: 5, 16, 2048>}, {pipeline_mode = #tpu.pipeline_mode<synchronous>, transform_indices = @transform_1, window_bounds = array<i64: 2048, 512>}, {pipeline_mode = #tpu.pipeline_mode<synchronous>, transform_indices = @transform_2, window_bounds = array<i64: 1, 512>}, {transform_indices = @transform_3, window_bounds = array<i64: 1, 5, 512>}]} {
    %c0 = arith.constant 0 : index
    %c0_0 = arith.constant 0 : index
    %c0_1 = arith.constant 0 : index
    %0 = vector.load %arg1[%c0, %c0_0, %c0_1] : memref<5x16x2048xf32, #tpu.memory_space<vmem>>, vector<5x16x2048xf32>
    %1 = vector.shape_cast %0 : vector<5x16x2048xf32> to vector<80x2048xf32>
    %cst = arith.constant 0.000000e+00 : f32
    %2 = vector.broadcast %cst : f32 to vector<80x2048xf32>
    %3 = arith.maximumf %1, %2 : vector<80x2048xf32>
    %4 = arith.truncf %3 : vector<80x2048xf32> to vector<80x2048xbf16>
    %c0_2 = arith.constant 0 : index
    %c0_3 = arith.constant 0 : index
    %5 = vector.load %arg2[%c0_2, %c0_3] : memref<2048x512xbf16, #tpu.memory_space<vmem>>, vector<2048x512xbf16>
    %cst_4 = arith.constant dense<0.000000e+00> : vector<80x512xf32>
    %6 = tpu.matmul %4, %5, %cst_4 {dimension_numbers = #tpu.dot_dimension_numbers<[1], [0], [0], [1], [0, 0, 1, 1], [], []>} : vector<80x2048xbf16>, vector<2048x512xbf16>, vector<80x512xf32> -> vector<80x512xf32>
    %c0_5 = arith.constant 0 : index
    %c0_6 = arith.constant 0 : index
    %7 = vector.load %arg3[%c0_5, %c0_6] : memref<1x512xf32, #tpu.memory_space<vmem>>, vector<1x512xf32>
    %8 = vector.broadcast %7 : vector<1x512xf32> to vector<80x512xf32>
    %9 = arith.addf %6, %8 : vector<80x512xf32>
    %cst_7 = arith.constant 0.000000e+00 : f32
    %10 = vector.broadcast %cst_7 : f32 to vector<80x512xf32>
    %11 = arith.maximumf %9, %10 : vector<80x512xf32>
    %12 = vector.shape_cast %11 : vector<80x512xf32> to vector<5x16x512xf32>
    %cst_8 = arith.constant dense<0.000000e+00> : vector<5x512xf32>
    %13 = vector.multi_reduction <add>, %12, %cst_8 [1] : vector<5x16x512xf32> to vector<5x512xf32>
    %cst_9 = arith.constant 1.600000e+01 : f32
    %14 = vector.broadcast %cst_9 : f32 to vector<5x512xf32>
    %15 = arith.divf %13, %14 : vector<5x512xf32>
    %c0_10 = arith.constant 0 : index
    %c0_11 = arith.constant 0 : index
    %c0_12 = arith.constant 0 : index
    %16 = vector.load %arg4[%c0_10, %c0_11, %c0_12] : memref<1x5x512xf32, #tpu.memory_space<vmem>>, vector<1x5x512xf32>
    %17 = vector.shape_cast %16 : vector<1x5x512xf32> to vector<5x512xf32>
    %18 = vector.shape_cast %15 : vector<5x512xf32> to vector<1x5x512xf32>
    tpu.vector_store %arg4[%c0_10, %c0_11, %c0_12], %18 {strides = array<i32>} : memref<1x5x512xf32, #tpu.memory_space<vmem>>, vector<1x5x512xf32>,
    return
  }
  func.func @transform_0(%arg0: i32) -> (i32, i32, i32) {
    %c0_i32 = arith.constant 0 : i32
    %c0_i32_0 = arith.constant 0 : i32
    %c0_i32_1 = arith.constant 0 : i32
    return %arg0, %c0_i32, %c0_i32_0 : i32, i32, i32
  }
  func.func @transform_1(%arg0: i32) -> (i32, i32) {
    %c0_i32 = arith.constant 0 : i32
    %c0_i32_0 = arith.constant 0 : i32
    %c0_i32_1 = arith.constant 0 : i32
    return %c0_i32, %c0_i32_0 : i32, i32
  }
  func.func @transform_2(%arg0: i32) -> (i32, i32) {
    %c0_i32 = arith.constant 0 : i32
    %c0_i32_0 = arith.constant 0 : i32
    %c0_i32_1 = arith.constant 0 : i32
    return %c0_i32, %c0_i32_0 : i32, i32
  }
  func.func @transform_3(%arg0: i32) -> (i32, i32, i32) {
    %c0_i32 = arith.constant 0 : i32
    %c0_i32_0 = arith.constant 0 : i32
    %c0_i32_1 = arith.constant 0 : i32
    return %arg0, %c0_i32, %c0_i32_0 : i32, i32, i32
  }
}

</mosaic_0001>

<bundles_post_ra>
// kernel: tpu_custom_call.1
= control target key start
LH: loop header
LB: loop body
LE: loop exit
PB: predicated region body
PF: predicated region fallthrough
CT: control target
= control target key end

     0   :  { %8 = vsyncpa [#allocation3], 0  ;;  %s8060_s0 = inlined_call_operand.hbm [shape: f32[10,16,2048], index: 0, kind: input, shape index: {}]   ;;  %s8061_s1 = inlined_call_operand.hbm [shape: bf16[2048,512], index: 1, kind: input, shape index: {}]   ;;  %s8062_s2 = inlined_call_operand.hbm [shape: f32[1,512], index: 2, kind: input, shape index: {}]   ;;  %s8063_s3 = inlined_call_operand.vmem [shape: f32[2,5,512], index: 3, kind: output, shape index: {}]  }
   0x1   :  { %10 = vsyncpa [#allocation3 + $0x1], 0 }
   0x2   :  { %11 = vsyncpa [#allocation5], 0  ;;  %s6889_s12 = smov 0   ;;  %s6891_s13 = smov 0  }
   0x3   :  { %s6893_s14 = smov 0   ;;  %s6895_s15 = smov 0  }
   0x4 LB: > { %s6908_s16 = sadd.s32 4294967295, %s6860_s15   ;;  %p37_p0 = scmp.ne.s32.totalorder %s6852_s13, %s6848_s12  ;;  %s6860_s15 = sphi %s6895_s15, %s8306_s15   ;;  %s6856_s14 = sphi %s6893_s14, %s8305_s14   ;;  %s6852_s13 = sphi %s6891_s13, %s8304_s13   ;;  %s6848_s12 = sphi %s6889_s12, %s8303_s12  }
   0x5   : > { %p8064_p1 = scmp.eq.s32.totalorder %s6908_s16, 0  ;;  %p5378_p2 = scmp.ge.s32.totalorder %s6860_s15, 1 }
   0x6   : > { %p116_p3 = scmp.lt.s32.totalorder %s6860_s15, 3  ;;  %s6862_s19 = smov [#allocation4]  }
   0x7   : > { %p6916_p4 = por %p8064_p1, %p37_p0  ;;  %s128_s20 = sshll.u32 %s6862_s19, 4  ;;  %s129_s20 = int_to_ptr.vmem [resolvable:$true] %s128_s20 }
   0x8   : > { %p6920_p5 = pnand %p5378_p2, %p116_p3  ;;  %s6863_s22 = smov [#allocation6]  }
   0x9   : > { %s8125_s17 = scalar_select %p6916_p4, 1, 0 }
   0xa   : > { %s8126_s18 = scalar_select %p6920_p5, 1, 0 }
   0xb   : > { %p5919_p6 = pneg %p6920_p5  ;;  %s142_s23 = sshll.u32 %s6863_s22, 4  ;;  %s143_s23 = int_to_ptr.vmem [resolvable:$true] %s142_s23 }
   0xc   : > { %s6753_s24 = scalar_lea.vmem %s129_s20, 65536  ;;  %p6761_p12 = scmp.lt.s32.totalorder %s129_s20, %s129_s20 }
   0xd   : > { %p6928_p7 = pnand %p5919_p6, %p8064_p1  ;;  %p6754_p9 = scmp.ne.s32.totalorder %s129_s20, %s6753_s24 }
   0xe   : > { %p6762_p13 = scmp.lt.s32.totalorder %s6753_s24, %s6753_s24 }
   0xf   : > { %p6744_p8 = pneg %p6928_p7 }
  0x10   : > { %p6763_p0 = por %p6762_p13, %p6761_p12 }
  0x11   : > { %p6756_p10 = pnand %p6754_p9, %p6744_p8 }
  0x13   : > { %p6757_p11 = pneg %p6756_p10 }
  0x15   : > { %p6764_p2 = pnand %p6763_p0, %p6757_p11 }
  0x17   : > { %6767 = shalt.err (!%p6764_p2)
}
  0x18   : > { %s6864_s25 = smov 256   ;;  %s6865_s26 = smov 16  }
  0x19   : > { %5922 = dma.hbm_to_vmem [thread:$0]  (!%p6928_p7), %s8061_s1, 65536, %s129_s20, [#allocation5], %s6864_s25, %s6864_s25, %s6865_s26  }
  0x1a   : > { %s6779_s29 = scalar_lea.vmem %s143_s23, 64  ;;  %p6787_p10 = scmp.lt.s32.totalorder %s143_s23, %s143_s23 }
  0x1b   : > { %p6780_p3 = scmp.ne.s32.totalorder %s143_s23, %s6779_s29  ;;  %p6788_p1 = scmp.lt.s32.totalorder %s6779_s29, %s6779_s29 }
  0x1d   : > { %p6782_p6 = pnand %p6780_p3, %p6744_p8  ;;  %p6789_p12 = por %p6788_p1, %p6787_p10 }
  0x1f   : > { %p6783_p9 = pneg %p6782_p6 }
  0x21   : > { %p6790_p11 = pnand %p6789_p12, %p6783_p9 }
  0x23   : > { %6793 = shalt.err (!%p6790_p11)
}
  0x24   : > { %5925 = dma.hbm_to_vmem [thread:$0]  (!%p6928_p7), %s8062_s2, 64, %s143_s23, [#allocation5]  }
  0x25   : > { %s6951_s5 = sadd.s32 1, %s6860_s15   ;;  %s24_s6 = sadd.s32 1, %s6856_s14 }
  0x26   : > { %s21_s7 = ssub.s32 %s6860_s15, %s6951_s5  ;;  %p31_p1 = scmp.ne.s32.totalorder %s6856_s14, %s6852_s13 }
  0x27   : > { %p22_p8 = scmp.eq.s32.totalorder %s21_s7, 0  ;;  %p32_p13 = scmp.eq.s32.totalorder %s6860_s15, 0 }
  0x28   : > { %p5932_p0 = scmp.lt.s32.totalorder %s6860_s15, 2  ;;  %s153_s8 = sand.u32 1, %s6856_s14  }
  0x29   : > { %s6962_s9 = scalar_select %p22_p8, %s6856_s14, %s24_s6  }
  0x2a   : > { %p33_p2 = por %p32_p13, %p31_p1  ;;  %s5907_s10 = smul.u32 1280, %s153_s8 }
  0x2b   : > { %s5906_s11 = smul.u32 20480, %s6860_s15  ;;  %s6976_s24 = scalar_lea.sflag [#allocation3], %s153_s8 }
  0x2c   : > { %p6965_p3 = pnand %p5932_p0, %p33_p2  ;;  %s157_s22 = scalar_lea.vmem [#allocation2], %s5907_s10 }
  0x2d   : > { %s6972_s21 = scalar_lea.hbm %s8060_s0, %s5906_s11  ;;  %s165_s23 = sshll.u32 %s157_s22, 4  ;;  %s6974_s23 = int_to_ptr.vmem [resolvable:$true] %s165_s23 }
  0x2e   : > { %s6794_s15 = scalar_lea.hbm %s6972_s21, 20480  ;;  %p6796_p6 = pneg %p6965_p3 }
  0x2f   : > { %p6795_p7 = scmp.ne.s32.totalorder %s6972_s21, %s6794_s15  ;;  %s6799_s27 = scalar_lea.hbm %s8060_s0, 40960 }
  0x30   : > { %p6800_p12 = scmp.lt.s32.totalorder %s6972_s21, %s8060_s0  ;;  %p6801_p11 = scmp.lt.s32.totalorder %s6799_s27, %s6794_s15 }
  0x31   : > { %p6797_p9 = pnand %p6796_p6, %p6795_p7 }
  0x32   : > { %p6802_p1 = por %p6801_p11, %p6800_p12 }
  0x33   : > { %p6798_p10 = pneg %p6797_p9 }
  0x35   : > { %p6803_p8 = pnand %p6802_p1, %p6798_p10 }
  0x37   : > { %6806 = shalt.err (!%p6803_p8)
}
  0x38   : > { %s6807_s30 = scalar_lea.vmem %s6974_s23, 20480  ;;  %s6866_s4 = smov [#allocation2]  }
  0x39   : > { %p6808_p13 = scmp.ne.s32.totalorder %s6974_s23, %s6807_s30  ;;  %s6812_s6 = sshll.u32 %s6866_s4, 4  ;;  %s6813_s6 = int_to_ptr.vmem [resolvable:$false] %s6812_s6 }
  0x3a   : > { %s6814_s7 = scalar_lea.vmem %s6813_s6, 40960  ;;  %p6815_p7 = scmp.lt.s32.totalorder %s6974_s23, %s6813_s6 }
  0x3b   : > { %p6810_p0 = pnand %p6808_p13, %p6796_p6  ;;  %p6816_p9 = scmp.lt.s32.totalorder %s6814_s7, %s6807_s30 }
  0x3d   : > { %p6811_p2 = pneg %p6810_p0  ;;  %p6817_p4 = por %p6816_p9, %p6815_p7 }
  0x3f   : > { %p6818_p5 = pnand %p6817_p4, %p6811_p2 }
  0x41   : > { %6821 = shalt.err (!%p6818_p5)
}
  0x42   : > { %s6867_s8 = smov 2048   ;;  %s6868_s10 = smov 128  }
  0x43   : > { %5929 = dma.hbm_to_vmem [thread:$0]  (!%p6965_p3), %s6972_s21, 20480, %s6974_s23, %s6976_s24, %s6867_s8, %s6867_s8, %s6868_s10  }
  0x44   : > { %p8129_p6 = scmp.ne.s32.totalorder %s8126_s18, 0 }
  0x46   : > { %177 = sbr.rel (%p8129_p6) target bundleno = 851 (0x353), region = 32 }
  0x4b   : > { %s179_s11 = sand.u32 1, %s6852_s13   ;;  %p8130_p4 = scmp.ne.s32.totalorder %s8125_s17, 0 }
  0x4c   : > { %s5908_s19 = smul.u32 1280, %s179_s11  ;;  %s180_s20 = scalar_lea.sflag [#allocation3], %s179_s11 }
  0x4e   : > { %s7000_s22 = scalar_lea.vmem [#allocation2], %s5908_s19 }
  0x4f   : > { %6839 = dma.done.wait (%p8130_p4), %s180_s20, 20480  }
  0x50   : > { %6841 = vsyncadd (%p8130_p4), %s180_s20, 4294946816  ;;  %p8131_p5 = scmp.eq.s32.totalorder %s6908_s16, 0 }
  0x52   : > { %6843 = dma.done.wait (%p8131_p5), [#allocation5], 65600   ;;  %p8132_p3 = pmov %p8131_p5 }
  0x53   : > { %v5973_v0 = vld [vmem:[#allocation4 + $0xe4] ss:$16 sps:$4 sm:$0xff]   ;;  %v5977_v2 = vld [vmem:[#allocation4 + $0xe0] ss:$16 sps:$4 sm:$0xff]   ;;  %v221_v48 = vld [vmem:[%s7000_s22 + $0x8] sm:$0xff]  ;;  %vm5263_vm0 = vcmask 1041409  }
  0x54   : > { %6845 = vsyncadd (%p8132_p3), [#allocation5], 4294901696  ;;  %v5975_v1 = vld [vmem:[#allocation4 + $0x2e4] ss:$16 sps:$4 sm:$0xff]   ;;  %3714 = vmatprep.subr.bf16.mxu0 %v5973_v0  ;;  %v5978_v3 = vld [vmem:[#allocation4 + $0x2e0] ss:$16 sps:$4 sm:$0xff]  }
  0x55   : > { %3797 = vmatprep.subr.bf16.mxu1 %v5975_v1  ;;  %v5979_v4 = vld [vmem:[#allocation4 + $0xc4] ss:$16 sps:$4 sm:$0xff]   ;;  %3715 = vmatpush1.bf16.msra.mxu0 %v5977_v2  ;;  %v5983_v6 = vld [vmem:[#allocation4 + $0xc0] ss:$16 sps:$4 sm:$0xff]   ;;  %v237_v49 = vld [vmem:[%s7000_s22 + $0x88] sm:$0xff]  ;;  %v381_v50 = vmax.f32 %v221_v48, 0.0 }
  0x56   : > { %3798 = vmatpush1.bf16.msra.mxu1 %v5978_v3  ;;  %v5981_v5 = vld [vmem:[#allocation4 + $0x2c4] ss:$16 sps:$4 sm:$0xff]   ;;  %3716 = vmatprep.subr.bf16.mxu0 %v5979_v4  ;;  %v5984_v7 = vld [vmem:[#allocation4 + $0x2c0] ss:$16 sps:$4 sm:$0xff]   ;;  %v223_v51 = vld [vmem:[%s7000_s22 + $0x18] sm:$0xff]  ;;  %v397_v54 = vmax.f32 %v237_v49, 0.0 }
  0x57   : > { %3799 = vmatprep.subr.bf16.mxu1 %v5981_v5  ;;  %v5985_v8 = vld [vmem:[#allocation4 + $0xa4] ss:$16 sps:$4 sm:$0xff]   ;;  %v5989_v10 = vld [vmem:[#allocation4 + $0xa0] ss:$16 sps:$4 sm:$0xff]   ;;  %v239_v52 = vld [vmem:[%s7000_s22 + $0x98] sm:$0xff]  ;;  %v383_v55 = vmax.f32 %v223_v51, 0.0 }
  0x58   : > { %v5987_v9 = vld [vmem:[#allocation4 + $0x2a4] ss:$16 sps:$4 sm:$0xff]   ;;  %v5990_v11 = vld [vmem:[#allocation4 + $0x2a0] ss:$16 sps:$4 sm:$0xff]   ;;  %v399_v56 = vmax.f32 %v239_v52, 0.0  ;;  %v7014_v58 = vpack.c.bf16 %v397_v54, %v381_v50  ;;  %v285_v54 = vld [vmem:[%s7000_s22 + $0x208] sm:$0xff] }
  0x59   : > { %3717 = vmatpush1.bf16.msra.mxu0 %v5983_v6  ;;  %v5991_v12 = vld [vmem:[#allocation4 + $0x84] ss:$16 sps:$4 sm:$0xff]   ;;  %v5995_v14 = vld [vmem:[#allocation4 + $0x80] ss:$16 sps:$4 sm:$0xff]   ;;  %vm5265_vm1 = vcmask 1042434   ;;  %p215_p10 = scmp.lt.s32.totalorder %s6908_s16, 1 }
  0x5a   : > { %3800 = vmatpush1.bf16.msra.mxu1 %v5984_v7  ;;  %3718 = vmatprep.subr.bf16.mxu0 %v5985_v8  ;;  %v5993_v13 = vld [vmem:[#allocation4 + $0x284] ss:$16 sps:$4 sm:$0xff]   ;;  %v5996_v15 = vld [vmem:[#allocation4 + $0x280] ss:$16 sps:$4 sm:$0xff]   ;;  %v7016_v59 = vpack.c.bf16 %v399_v56, %v383_v55  ;;  %v301_v55 = vld [vmem:[%s7000_s22 + $0x288] sm:$0xff]  ;;  %vm5267_vm2 = vcmask 1043459  }
  0x5b   : > { %3801 = vmatprep.subr.bf16.mxu1 %v5987_v9  ;;  %v5997_v16 = vld [vmem:[#allocation4 + $0x64] ss:$16 sps:$4 sm:$0xff]   ;;  %v6001_v18 = vld [vmem:[#allocation4 + $0x60] ss:$16 sps:$4 sm:$0xff]   ;;  %3746 = vmatprep.mubr.bf16.mxu0 %v7014_v58  ;;  %s8308_s16 = smov (!%p215_p10, %s6908_s16), 1  ;;  %vm5269_vm3 = vcmask 1044484  }
  0x5c   : > { %v5999_v17 = vld [vmem:[#allocation4 + $0x264] ss:$16 sps:$4 sm:$0xff]   ;;  %v6002_v19 = vld [vmem:[#allocation4 + $0x260] ss:$16 sps:$4 sm:$0xff]   ;;  %3829 = vmatprep.mubr.bf16.mxu1 %v7016_v59  ;;  %s5905_s17 = sshll.u32 %s8308_s16, 5 }
  0x5d   : > { %3719 = vmatpush1.bf16.msra.mxu0 %v5989_v10  ;;  %v6003_v20 = vld [vmem:[#allocation4 + $0x44] ss:$16 sps:$4 sm:$0xff]   ;;  %v6007_v22 = vld [vmem:[#allocation4 + $0x40] ss:$16 sps:$4 sm:$0xff]   ;;  %s7805_s21 = scalar_lea.vmem %s8063_s3, %s5905_s17 }
  0x5e   : > { %3802 = vmatpush1.bf16.msra.mxu1 %v5990_v11  ;;  %3720 = vmatprep.subr.bf16.mxu0 %v5991_v12  ;;  %v6005_v21 = vld [vmem:[#allocation4 + $0x244] ss:$16 sps:$4 sm:$0xff]   ;;  %v6008_v23 = vld [vmem:[#allocation4 + $0x240] ss:$16 sps:$4 sm:$0xff]  }
  0x5f   : > { %3803 = vmatprep.subr.bf16.mxu1 %v5993_v13  ;;  %v6009_v24 = vld [vmem:[#allocation4 + $0x24] ss:$16 sps:$4 sm:$0xff]   ;;  %v6013_v26 = vld [vmem:[#allocation4 + $0x20] ss:$16 sps:$4 sm:$0xff]  }
  0x60   : > { %v6011_v25 = vld [vmem:[#allocation4 + $0x224] ss:$16 sps:$4 sm:$0xff]   ;;  %v6014_v27 = vld [vmem:[#allocation4 + $0x220] ss:$16 sps:$4 sm:$0xff]  }
  0x61   : > { %3721 = vmatpush1.bf16.msra.mxu0 %v5995_v14  ;;  %v6015_v28 = vld [vmem:[#allocation4 + $0x4] ss:$16 sps:$4 sm:$0xff]   ;;  %v6019_v30 = vld [vmem:[#allocation4] ss:$16 sps:$4 sm:$0xff]  }
  0x62   : > { %3804 = vmatpush1.bf16.msra.mxu1 %v5996_v15  ;;  %3722 = vmatprep.subr.bf16.mxu0 %v5997_v16  ;;  %v6017_v29 = vld [vmem:[#allocation4 + $0x204] ss:$16 sps:$4 sm:$0xff]   ;;  %v6020_v31 = vld [vmem:[#allocation4 + $0x200] ss:$16 sps:$4 sm:$0xff]  }
  0x63   : > { %3805 = vmatprep.subr.bf16.mxu1 %v5999_v17  ;;  %v6021_v32 = vld [vmem:[#allocation4 + $0x1e4] ss:$16 sps:$4 sm:$0xff]   ;;  %v6025_v34 = vld [vmem:[#allocation4 + $0x1e0] ss:$16 sps:$4 sm:$0xff]  }
  0x64   : > { %v6023_v33 = vld [vmem:[#allocation4 + $0x3e4] ss:$16 sps:$4 sm:$0xff]   ;;  %v6026_v35 = vld [vmem:[#allocation4 + $0x3e0] ss:$16 sps:$4 sm:$0xff]  }
  0x65   : > { %3723 = vmatpush1.bf16.msra.mxu0 %v6001_v18  ;;  %v6027_v36 = vld [vmem:[#allocation4 + $0x1c4] ss:$16 sps:$4 sm:$0xff]   ;;  %v6031_v38 = vld [vmem:[#allocation4 + $0x1c0] ss:$16 sps:$4 sm:$0xff]  }
  0x66   : > { %3806 = vmatpush1.bf16.msra.mxu1 %v6002_v19  ;;  %3724 = vmatprep.subr.bf16.mxu0 %v6003_v20  ;;  %v6029_v37 = vld [vmem:[#allocation4 + $0x3c4] ss:$16 sps:$4 sm:$0xff]   ;;  %v6032_v39 = vld [vmem:[#allocation4 + $0x3c0] ss:$16 sps:$4 sm:$0xff]  }
  0x67   : > { %3807 = vmatprep.subr.bf16.mxu1 %v6005_v21  ;;  %v6033_v40 = vld [vmem:[#allocation4 + $0x1a4] ss:$16 sps:$4 sm:$0xff]   ;;  %v6037_v42 = vld [vmem:[#allocation4 + $0x1a0] ss:$16 sps:$4 sm:$0xff]  }
  0x68   : > { %v6035_v41 = vld [vmem:[#allocation4 + $0x3a4] ss:$16 sps:$4 sm:$0xff]   ;;  %v6038_v43 = vld [vmem:[#allocation4 + $0x3a0] ss:$16 sps:$4 sm:$0xff]  }
  0x69   : > { %3725 = vmatpush1.bf16.msra.mxu0 %v6007_v22  ;;  %v6039_v44 = vld [vmem:[#allocation4 + $0x184] ss:$16 sps:$4 sm:$0xff]   ;;  %v6043_v46 = vld [vmem:[#allocation4 + $0x180] ss:$16 sps:$4 sm:$0xff]  }
  0x6a   : > { %3808 = vmatpush1.bf16.msra.mxu1 %v6008_v23  ;;  %3726 = vmatprep.subr.bf16.mxu0 %v6009_v24  ;;  %v6041_v45 = vld [vmem:[#allocation4 + $0x384] ss:$16 sps:$4 sm:$0xff]   ;;  %v6044_v47 = vld [vmem:[#allocation4 + $0x380] ss:$16 sps:$4 sm:$0xff]  }
  0x6b   : > { %3809 = vmatprep.subr.bf16.mxu1 %v6011_v25  ;;  %v6045_v53 = vld [vmem:[#allocation4 + $0x164] ss:$16 sps:$4 sm:$0xff]   ;;  %v6049_v60 = vld [vmem:[#allocation4 + $0x160] ss:$16 sps:$4 sm:$0xff]  }
  0x6c   : > { %v6047_v57 = vld [vmem:[#allocation4 + $0x364] ss:$16 sps:$4 sm:$0xff]   ;;  %v6050_v61 = vld [vmem:[#allocation4 + $0x360] ss:$16 sps:$4 sm:$0xff]  }
  0x6d   : > { %3727 = vmatpush1.bf16.msra.mxu0 %v6013_v26  ;;  %v6051_v62 = vld [vmem:[#allocation4 + $0x144] ss:$16 sps:$4 sm:$0xff]   ;;  %v6055_v0 = vld [vmem:[#allocation4 + $0x140] ss:$16 sps:$4 sm:$0xff]   ;;  %v253_v26 = vld [vmem:[%s7000_s22 + $0x108] sm:$0xff] }
  0x6e   : > { %3810 = vmatpush1.bf16.msra.mxu1 %v6014_v27  ;;  %3728 = vmatprep.subr.bf16.mxu0 %v6015_v28  ;;  %v6053_v63 = vld [vmem:[#allocation4 + $0x344] ss:$16 sps:$4 sm:$0xff]   ;;  %v6056_v1 = vld [vmem:[#allocation4 + $0x340] ss:$16 sps:$4 sm:$0xff]   ;;  %v269_v27 = vld [vmem:[%s7000_s22 + $0x188] sm:$0xff] }
  0x6f   : > { %3811 = vmatprep.subr.bf16.mxu1 %v6017_v29  ;;  %v6057_v2 = vld [vmem:[#allocation4 + $0x124] ss:$16 sps:$4 sm:$0xff]   ;;  %v6061_v4 = vld [vmem:[#allocation4 + $0x120] ss:$16 sps:$4 sm:$0xff]   ;;  %v413_v29 = vmax.f32 %v253_v26, 0.0 }
  0x70   : > { %v6059_v3 = vld [vmem:[#allocation4 + $0x324] ss:$16 sps:$4 sm:$0xff]   ;;  %v6062_v5 = vld [vmem:[#allocation4 + $0x320] ss:$16 sps:$4 sm:$0xff]  }
  0x71   : > { %3729 = vmatpush1.bf16.msra.mxu0 %v6019_v30  ;;  %v220_v6 = vld [vmem:[%s7000_s22] sm:$0xff]  ;;  %v222_v9 = vld [vmem:[%s7000_s22 + $0x10] sm:$0xff]  ;;  %v429_v30 = vmax.f32 %v269_v27, 0.0 }
  0x72   : > { %3812 = vmatpush1.bf16.msra.mxu1 %v6020_v31  ;;  %3730 = vmatprep.subr.bf16.mxu0 %v6021_v32  ;;  %v6063_v7 = vld [vmem:[#allocation4 + $0x104] ss:$16 sps:$4 sm:$0xff]   ;;  %v6067_v12 = vld [vmem:[#allocation4 + $0x100] ss:$16 sps:$4 sm:$0xff]   ;;  %v380_v14 = vmax.f32 %v220_v6, 0.0  ;;  %v382_v16 = vmax.f32 %v222_v9, 0.0 }
  0x73   : > { %3813 = vmatprep.subr.bf16.mxu1 %v6023_v33  ;;  %v236_v8 = vld [vmem:[%s7000_s22 + $0x80] sm:$0xff]  ;;  %v238_v10 = vld [vmem:[%s7000_s22 + $0x90] sm:$0xff]  ;;  %v255_v32 = vld [vmem:[%s7000_s22 + $0x118] sm:$0xff] }
  0x74   : > { %v6065_v11 = vld [vmem:[#allocation4 + $0x304] ss:$16 sps:$4 sm:$0xff]   ;;  %v6068_v13 = vld [vmem:[#allocation4 + $0x300] ss:$16 sps:$4 sm:$0xff]   ;;  %v396_v15 = vmax.f32 %v236_v8, 0.0  ;;  %v398_v17 = vmax.f32 %v238_v10, 0.0 }
  0x75   : > { %3731 = vmatpush2.bf16.msra.mxu0 %v6025_v34  ;;  %v6071_v18 = vld [vmem:[#allocation4 + $0x4e4] ss:$16 sps:$4 sm:$0xff]   ;;  %v6069_v20 = vld [vmem:[#allocation4 + $0x4e0] ss:$16 sps:$4 sm:$0xff]   ;;  %v271_v33 = vld [vmem:[%s7000_s22 + $0x198] sm:$0xff] }
  0x76   : > { %3814 = vmatpush2.bf16.msra.mxu1 %v6026_v35  ;;  %3732 = vmatprep.subr.bf16.mxu0 %v6027_v36  ;;  %v6074_v19 = vld [vmem:[#allocation4 + $0x6e4] ss:$16 sps:$4 sm:$0xff]   ;;  %v6072_v21 = vld [vmem:[#allocation4 + $0x6e0] ss:$16 sps:$4 sm:$0xff]   ;;  %v7024_v22 = vpack.c.bf16 %v396_v15, %v380_v14  ;;  %v7026_v23 = vpack.c.bf16 %v398_v17, %v382_v16  ;;  %v415_v35 = vmax.f32 %v255_v32, 0.0  ;;  %v431_v36 = vmax.f32 %v271_v33, 0.0 }
  0x77   : > { %3815 = vmatprep.subr.bf16.mxu1 %v6029_v37  ;;  %v6077_v24 = vld [vmem:[#allocation4 + $0x4c4] ss:$16 sps:$4 sm:$0xff]   ;;  %v6075_v34 = vld [vmem:[#allocation4 + $0x4c0] ss:$16 sps:$4 sm:$0xff]  }
  0x78   : > { %v6080_v25 = vld [vmem:[#allocation4 + $0x6c4] ss:$16 sps:$4 sm:$0xff]   ;;  %v6078_v37 = vld [vmem:[#allocation4 + $0x6c0] ss:$16 sps:$4 sm:$0xff]  }
  0x79   : > { %3733 = vmatpush2.bf16.msra.mxu0 %v6031_v38  ;;  %v252_v28 = vld [vmem:[%s7000_s22 + $0x100] sm:$0xff]  ;;  %v7036_v38 = vpack.c.bf16 %v429_v30, %v413_v29  ;;  %v286_v10 = vld [vmem:[%s7000_s22 + $0x210] sm:$0xff]  ;;  %v335_v29 = vld [vmem:[%s7000_s22 + $0x398] sm:$0xff] }
  0x7a   : > { %3816 = vmatpush2.bf16.msra.mxu1 %v6032_v39  ;;  %3734 = vmatprep.subr.bf16.mxu0 %v6033_v40  ;;  %v268_v31 = vld [vmem:[%s7000_s22 + $0x180] sm:$0xff]  ;;  %v412_v39 = vmax.f32 %v252_v28, 0.0  ;;  %v319_v28 = vld [vmem:[%s7000_s22 + $0x318] sm:$0xff]  ;;  %v495_v32 = vmax.f32 %v335_v29, 0.0  ;;  %v241_v29 = vld [vmem:[%s7000_s22 + $0xa8] sm:$0xff] }
  0x7b   : > { %3817 = vmatprep.subr.bf16.mxu1 %v6035_v41  ;;  %v428_v40 = vmax.f32 %v268_v31, 0.0  ;;  %v6083_v41 = vld [vmem:[#allocation4 + $0x4a4] ss:$16 sps:$4 sm:$0xff]   ;;  %v6084_v48 = vld [vmem:[#allocation4 + $0x6a0] ss:$16 sps:$4 sm:$0xff]   ;;  %v479_v31 = vmax.f32 %v319_v28, 0.0 }
  0x7c   : > { %v6089_v50 = vld [vmem:[#allocation4 + $0x484] ss:$16 sps:$4 sm:$0xff]   ;;  %v6096_v14 = vld [vmem:[#allocation4 + $0x660] ss:$16 sps:$4 sm:$0xff]   ;;  %v225_v28 = vld [vmem:[%s7000_s22 + $0x28] sm:$0xff] }
  0x7d   : > { %3735 = vmatpush2.bf16.msra.mxu0 %v6037_v42  ;;  %v6086_v42 = vld [vmem:[#allocation4 + $0x6a4] ss:$16 sps:$4 sm:$0xff]   ;;  %v7044_v52 = vpack.c.bf16 %v428_v40, %v412_v39  ;;  %v6099_v30 = vld [vmem:[#allocation4 + $0x440] ss:$16 sps:$4 sm:$0xff]   ;;  %v7078_v40 = vpack.c.bf16 %v495_v32, %v479_v31  ;;  %v227_v31 = vld [vmem:[%s7000_s22 + $0x38] sm:$0xff] }
  0x7e   : > { %3818 = vmatpush2.bf16.msra.mxu1 %v6038_v43  ;;  %3736 = vmatprep.subr.bf16.mxu0 %v6039_v44  ;;  %v7038_v43 = vpack.c.bf16 %v431_v36, %v415_v35  ;;  %v254_v44 = vld [vmem:[%s7000_s22 + $0x110] sm:$0xff]  ;;  %v284_v56 = vld [vmem:[%s7000_s22 + $0x200] sm:$0xff]  ;;  %v243_v32 = vld [vmem:[%s7000_s22 + $0xb8] sm:$0xff] }
  0x7f   : > { %3819 = vmatprep.subr.bf16.mxu1 %v6041_v45  ;;  %v270_v45 = vld [vmem:[%s7000_s22 + $0x190] sm:$0xff]  ;;  %v332_v27 = vld [vmem:[%s7000_s22 + $0x380] sm:$0xff] }
  0x80   : > { %v430_v49 = vmax.f32 %v270_v45, 0.0  ;;  %v6092_v51 = vld [vmem:[#allocation4 + $0x684] ss:$16 sps:$4 sm:$0xff]   ;;  %v6102_v33 = vld [vmem:[#allocation4 + $0x640] ss:$16 sps:$4 sm:$0xff]   ;;  %v492_v36 = vmax.f32 %v332_v27, 0.0 }
  0x81   : > { %3737 = vmatpush2.bf16.msra.mxu0 %v6043_v46  ;;  %v414_v46 = vmax.f32 %v254_v44, 0.0  ;;  %v6098_v8 = vld [vmem:[#allocation4 + $0x664] ss:$16 sps:$4 sm:$0xff]   ;;  %v6105_v45 = vld [vmem:[#allocation4 + $0x420] ss:$16 sps:$4 sm:$0xff]  }
  0x82   : > { %3820 = vmatpush2.bf16.msra.mxu1 %v6044_v47  ;;  %3738 = vmatprep.subr.bf16.mxu0 %v6045_v53  ;;  %v6081_v47 = vld [vmem:[#allocation4 + $0x4a0] ss:$16 sps:$4 sm:$0xff]   ;;  %v6101_v16 = vld [vmem:[#allocation4 + $0x444] ss:$16 sps:$4 sm:$0xff]  }
  0x83   : > { %3821 = vmatprep.subr.bf16.mxu1 %v6047_v57  ;;  %v7046_v53 = vpack.c.bf16 %v430_v49, %v414_v46  ;;  %v445_v57 = vmax.f32 %v285_v54, 0.0  ;;  %v6104_v17 = vld [vmem:[#allocation4 + $0x644] ss:$16 sps:$4 sm:$0xff]   ;;  %v6108_v46 = vld [vmem:[#allocation4 + $0x620] ss:$16 sps:$4 sm:$0xff]   ;;  %v349_v54 = vld [vmem:[%s7000_s22 + $0x408] sm:$0xff] }
  0x84   : > { %v6110_v39 = vld [vmem:[#allocation4 + $0x624] ss:$16 sps:$4 sm:$0xff]   ;;  %v6126_v27 = vld [vmem:[#allocation4 + $0x7c0] ss:$16 sps:$4 sm:$0xff]  }
  0x85   : > { %3739 = vmatpush2.bf16.msra.mxu0 %v6049_v60  ;;  %v461_v60 = vmax.f32 %v301_v55, 0.0  ;;  %v6116_v49 = vld [vmem:[#allocation4 + $0x604] ss:$16 sps:$4 sm:$0xff]   ;;  %v365_v55 = vld [vmem:[%s7000_s22 + $0x488] sm:$0xff] }
  0x86   : > { %3822 = vmatpush2.bf16.msra.mxu1 %v6050_v61  ;;  %3740 = vmatprep.subr.bf16.mxu0 %v6051_v62  ;;  %v300_v61 = vld [vmem:[%s7000_s22 + $0x280] sm:$0xff]  ;;  %v287_v62 = vld [vmem:[%s7000_s22 + $0x218] sm:$0xff] }
  0x87   : > { %3823 = vmatprep.subr.bf16.mxu1 %v6053_v63  ;;  %v303_v63 = vld [vmem:[%s7000_s22 + $0x298] sm:$0xff]  ;;  %v460_v6 = vmax.f32 %v300_v61, 0.0  ;;  %v364_v61 = vld [vmem:[%s7000_s22 + $0x480] sm:$0xff] }
  0x89   : > { %3741 = vmatpush2.bf16.msra.mxu0 %v6055_v0  ;;  %v6087_v0 = vld [vmem:[#allocation4 + $0x480] ss:$16 sps:$4 sm:$0xff]  }
  0x8a   : > { %3824 = vmatpush2.bf16.msra.mxu1 %v6056_v1  ;;  %3742 = vmatprep.subr.bf16.mxu0 %v6057_v2  ;;  %v447_v1 = vmax.f32 %v287_v62, 0.0  ;;  %v463_v2 = vmax.f32 %v303_v63, 0.0  ;;  %v351_v62 = vld [vmem:[%s7000_s22 + $0x418] sm:$0xff] }
  0x8b   : > { %3825 = vmatprep.subr.bf16.mxu1 %v6059_v3  ;;  %v6090_v3 = vld [vmem:[#allocation4 + $0x680] ss:$16 sps:$4 sm:$0xff]   ;;  %v367_v63 = vld [vmem:[%s7000_s22 + $0x498] sm:$0xff] }
  0x8c   : > { %v7058_v9 = vpack.c.bf16 %v463_v2, %v447_v1  ;;  %v511_v1 = vmax.f32 %v351_v62, 0.0  ;;  %v527_v2 = vmax.f32 %v367_v63, 0.0  ;;  %v6147_v62 = vld [vmem:[#allocation4 + $0x540] ss:$16 sps:$4 sm:$0xff]  }
  0x8d   : > { %3743 = vmatpush2.bf16.msra.mxu0 %v6061_v4  ;;  %v7056_v4 = vpack.c.bf16 %v461_v60, %v445_v57  ;;  %v509_v57 = vmax.f32 %v349_v54, 0.0  ;;  %v525_v60 = vmax.f32 %v365_v55, 0.0  ;;  %v6143_v54 = vld [vmem:[#allocation4 + $0x564] ss:$16 sps:$4 sm:$0xff]   ;;  %v6150_v63 = vld [vmem:[#allocation4 + $0x740] ss:$16 sps:$4 sm:$0xff]  }
  0x8e   : > { %3826 = vmatpush2.bf16.msra.mxu1 %v6062_v5  ;;  %3744 = vmatprep.subr.bf16.mxu0 %v6063_v7  ;;  %v444_v5 = vmax.f32 %v284_v56, 0.0  ;;  %v6095_v7 = vld [vmem:[#allocation4 + $0x464] ss:$16 sps:$4 sm:$0xff]  }
  0x8f   : > { %3827 = vmatprep.subr.bf16.mxu1 %v6065_v11  ;;  %v302_v11 = vld [vmem:[%s7000_s22 + $0x290] sm:$0xff]  ;;  %v348_v56 = vld [vmem:[%s7000_s22 + $0x400] sm:$0xff] }
  0x90   : > { %v462_v15 = vmax.f32 %v302_v11, 0.0  ;;  %v7098_v11 = vpack.c.bf16 %v527_v2, %v511_v1  ;;  %v6146_v55 = vld [vmem:[#allocation4 + $0x764] ss:$16 sps:$4 sm:$0xff]   ;;  %v6153_v2 = vld [vmem:[#allocation4 + $0x520] ss:$16 sps:$4 sm:$0xff]  }
  0x91   : > { %3745 = vmatpush2.bf16.msra.mxu0 %v6067_v12  ;;  %v446_v12 = vmax.f32 %v286_v10, 0.0  ;;  %v6122_v10 = vld [vmem:[#allocation4 + $0x7e4] ss:$16 sps:$4 sm:$0xff]  }
  0x92   : > { %3828 = vmatpush2.bf16.msra.mxu1 %v6068_v13  ;;  %3880 = vmatprep.subr.bf16.mxu0 %v6071_v18  ;;  %v6093_v13 = vld [vmem:[#allocation4 + $0x460] ss:$16 sps:$4 sm:$0xff]   ;;  %v7064_v18 = vpack.c.bf16 %v460_v6, %v444_v5  ;;  %v7096_v5 = vpack.c.bf16 %v525_v60, %v509_v57  ;;  %v508_v6 = vmax.f32 %v348_v56, 0.0  ;;  %v6149_v60 = vld [vmem:[#allocation4 + $0x544] ss:$16 sps:$4 sm:$0xff]  }
  0x93   : > { %3963 = vmatprep.subr.bf16.mxu1 %v6074_v19  ;;  %v7066_v19 = vpack.c.bf16 %v462_v15, %v446_v12  ;;  %v350_v12 = vld [vmem:[%s7000_s22 + $0x410] sm:$0xff] }
  0x94   : > { %3747 = vmatmul.mubr.bf16.vlgmr.msra.gmra.mxu0 %v7024_v22  ;;  %v6141_v56 = vld [vmem:[#allocation4 + $0x560] ss:$16 sps:$4 sm:$0xff]   ;;  %v6158_v1 = vld [vmem:[#allocation4 + $0x724] ss:$16 sps:$4 sm:$0xff]  }
  0x95   : > { %3830 = vmatmul.mubr.bf16.vlgmr.msra.gmra.mxu1 %v7026_v23  ;;  %3881 = vmatpush1.bf16.msra.mxu0 %v6069_v20  ;;  %v317_v20 = vld [vmem:[%s7000_s22 + $0x308] sm:$0xff]  ;;  %v6144_v57 = vld [vmem:[#allocation4 + $0x760] ss:$16 sps:$4 sm:$0xff]  }
  0x96   : > { %3964 = vmatpush1.bf16.msra.mxu1 %v6072_v21  ;;  %3882 = vmatprep.subr.bf16.mxu0 %v6077_v24  ;;  %v333_v21 = vld [vmem:[%s7000_s22 + $0x388] sm:$0xff]  ;;  %v316_v24 = vld [vmem:[%s7000_s22 + $0x300] sm:$0xff] }
  0x97   : > { %3965 = vmatprep.subr.bf16.mxu1 %v6080_v25  ;;  %3756 = vmatprep.mubr.bf16.mxu0 %v7036_v38  ;;  %v477_v25 = vmax.f32 %v317_v20, 0.0  ;;  %v493_v26 = vmax.f32 %v333_v21, 0.0  ;;  %v476_v35 = vmax.f32 %v316_v24, 0.0  ;;  %v6125_v21 = vld [vmem:[#allocation4 + $0x5c4] ss:$16 sps:$4 sm:$0xff]  }
  0x98   : > { %3839 = vmatprep.mubr.bf16.mxu1 %v7038_v43 }
  0x99   : > { %3883 = vmatpush1.bf16.msra.mxu0 %v6075_v34  ;;  %v7076_v34 = vpack.c.bf16 %v493_v26, %v477_v25  ;;  %v6128_v25 = vld [vmem:[#allocation4 + $0x7c4] ss:$16 sps:$4 sm:$0xff]   ;;  %v6123_v26 = vld [vmem:[#allocation4 + $0x5c0] ss:$16 sps:$4 sm:$0xff]  }
  0x9a   : > { %3966 = vmatpush1.bf16.msra.mxu1 %v6078_v37  ;;  %3884 = vmatprep.subr.bf16.mxu0 %v6083_v41  ;;  %v6107_v37 = vld [vmem:[#allocation4 + $0x424] ss:$16 sps:$4 sm:$0xff]  }
  0x9b   : > { %3967 = vmatprep.subr.bf16.mxu1 %v6086_v42  ;;  %v318_v41 = vld [vmem:[%s7000_s22 + $0x310] sm:$0xff] }
  0x9c   : > { %3757 = vmatmul.mubr.bf16.gmra.mxu0 %v7044_v52  ;;  %v334_v42 = vld [vmem:[%s7000_s22 + $0x390] sm:$0xff]  ;;  %v478_v44 = vmax.f32 %v318_v41, 0.0 }
  0x9d   : > { %3840 = vmatmul.mubr.bf16.gmra.mxu1 %v7046_v53  ;;  %3885 = vmatpush1.bf16.msra.mxu0 %v6081_v47  ;;  %v494_v47 = vmax.f32 %v334_v42, 0.0 }
  0x9e   : > { %3968 = vmatpush1.bf16.msra.mxu1 %v6084_v48  ;;  %3886 = vmatprep.subr.bf16.mxu0 %v6089_v50  ;;  %v6113_v48 = vld [vmem:[#allocation4 + $0x404] ss:$16 sps:$4 sm:$0xff]   ;;  %v7084_v50 = vpack.c.bf16 %v492_v36, %v476_v35  ;;  %v401_v35 = vmax.f32 %v241_v29, 0.0  ;;  %v387_v36 = vmax.f32 %v227_v31, 0.0  ;;  %v275_v29 = vld [vmem:[%s7000_s22 + $0x1b8] sm:$0xff] }
  0x9f   : > { %3969 = vmatprep.subr.bf16.mxu1 %v6092_v51  ;;  %3766 = vmatprep.mubr.bf16.mxu0 %v7056_v4  ;;  %v7086_v51 = vpack.c.bf16 %v494_v47, %v478_v44  ;;  %v6129_v44 = vld [vmem:[#allocation4 + $0x5a0] ss:$16 sps:$4 sm:$0xff]   ;;  %v6140_v47 = vld [vmem:[#allocation4 + $0x784] ss:$16 sps:$4 sm:$0xff]  }
  0xa0   : > { %3849 = vmatprep.mubr.bf16.mxu1 %v7058_v9  ;;  %v6170_v31 = vld [vmem:[#allocation4 + $0xae4] ss:$16 sps:$4 sm:$0xff]  }
  0xa1   : > { %3887 = vmatpush1.bf16.msra.mxu0 %v6087_v0  ;;  %v6111_v0 = vld [vmem:[#allocation4 + $0x400] ss:$16 sps:$4 sm:$0xff]  }
  0xa2   : > { %3970 = vmatpush1.bf16.msra.mxu1 %v6090_v3  ;;  %3888 = vmatprep.subr.bf16.mxu0 %v6095_v7  ;;  %v6114_v3 = vld [vmem:[#allocation4 + $0x600] ss:$16 sps:$4 sm:$0xff]   ;;  %v524_v7 = vmax.f32 %v364_v61, 0.0  ;;  %v6152_v61 = vld [vmem:[#allocation4 + $0x744] ss:$16 sps:$4 sm:$0xff]  }
  0xa3   : > { %3971 = vmatprep.subr.bf16.mxu1 %v6098_v8  ;;  %v6119_v8 = vld [vmem:[#allocation4 + $0x5e4] ss:$16 sps:$4 sm:$0xff]  }
  0xa4   : > { %3767 = vmatmul.mubr.bf16.gmra.mxu0 %v7064_v18  ;;  %v7104_v20 = vpack.c.bf16 %v524_v7, %v508_v6  ;;  %v224_v6 = vld [vmem:[%s7000_s22 + $0x20] sm:$0xff] }
  0xa5   : > { %3850 = vmatmul.mubr.bf16.gmra.mxu1 %v7066_v19  ;;  %3889 = vmatpush1.bf16.msra.mxu0 %v6093_v13  ;;  %v366_v13 = vld [vmem:[%s7000_s22 + $0x490] sm:$0xff]  ;;  %v240_v7 = vld [vmem:[%s7000_s22 + $0xa0] sm:$0xff] }
  0xa6   : > { %3972 = vmatpush1.bf16.msra.mxu1 %v6096_v14  ;;  %3890 = vmatprep.subr.bf16.mxu0 %v6101_v16  ;;  %v510_v14 = vmax.f32 %v350_v12, 0.0  ;;  %v526_v15 = vmax.f32 %v366_v13, 0.0  ;;  %v6117_v16 = vld [vmem:[#allocation4 + $0x5e0] ss:$16 sps:$4 sm:$0xff]   ;;  %v6161_v12 = vld [vmem:[#allocation4 + $0x504] ss:$16 sps:$4 sm:$0xff]  }
  0xa7   : > { %3973 = vmatprep.subr.bf16.mxu1 %v6104_v17  ;;  %3776 = vmatprep.mubr.bf16.mxu0 %v7076_v34  ;;  %v6120_v17 = vld [vmem:[#allocation4 + $0x7e0] ss:$16 sps:$4 sm:$0xff]   ;;  %v6164_v13 = vld [vmem:[#allocation4 + $0x704] ss:$16 sps:$4 sm:$0xff]  }
  0xa8   : > { %3859 = vmatprep.mubr.bf16.mxu1 %v7078_v40  ;;  %v7106_v24 = vpack.c.bf16 %v526_v15, %v510_v14  ;;  %v6159_v14 = vld [vmem:[#allocation4 + $0x500] ss:$16 sps:$4 sm:$0xff]  }
  0xa9   : > { %3891 = vmatpush1.bf16.msra.mxu0 %v6099_v30  ;;  %v385_v30 = vmax.f32 %v225_v28, 0.0  ;;  %v6162_v15 = vld [vmem:[#allocation4 + $0x700] ss:$16 sps:$4 sm:$0xff]   ;;  %v259_v28 = vld [vmem:[%s7000_s22 + $0x138] sm:$0xff] }
  0xaa   : > { %3974 = vmatpush1.bf16.msra.mxu1 %v6102_v33  ;;  %3892 = vmatprep.subr.bf16.mxu0 %v6107_v37  ;;  %v6131_v33 = vld [vmem:[#allocation4 + $0x5a4] ss:$16 sps:$4 sm:$0xff]   ;;  %v403_v37 = vmax.f32 %v243_v32, 0.0  ;;  %v6165_v32 = vld [vmem:[#allocation4 + $0x8e0] ss:$16 sps:$4 sm:$0xff]  }
  0xab   : > { %3975 = vmatprep.subr.bf16.mxu1 %v6110_v39  ;;  %v6134_v39 = vld [vmem:[#allocation4 + $0x7a4] ss:$16 sps:$4 sm:$0xff]   ;;  %v7114_v41 = vpack.c.bf16 %v401_v35, %v385_v30 }
  0xac   : > { %3777 = vmatmul.mubr.bf16.gmra.mxu0 %v7084_v50  ;;  %v7116_v42 = vpack.c.bf16 %v403_v37, %v387_v36  ;;  %v6167_v30 = vld [vmem:[#allocation4 + $0x8e4] ss:$16 sps:$4 sm:$0xff]  }
  0xad   : > { %3860 = vmatmul.mubr.bf16.gmra.mxu1 %v7086_v51  ;;  %3893 = vmatpush1.bf16.msra.mxu0 %v6105_v45  ;;  %v6132_v45 = vld [vmem:[#allocation4 + $0x7a0] ss:$16 sps:$4 sm:$0xff]  }
  0xae   : > { %3976 = vmatpush1.bf16.msra.mxu1 %v6108_v46  ;;  %3894 = vmatprep.subr.bf16.mxu0 %v6113_v48  ;;  %v6137_v46 = vld [vmem:[#allocation4 + $0x584] ss:$16 sps:$4 sm:$0xff]   ;;  %v6135_v48 = vld [vmem:[#allocation4 + $0x580] ss:$16 sps:$4 sm:$0xff]  }
  0xaf   : > { %3977 = vmatprep.subr.bf16.mxu1 %v6116_v49  ;;  %3786 = vmatprep.mubr.bf16.mxu0 %v7096_v5  ;;  %v6138_v49 = vld [vmem:[#allocation4 + $0x780] ss:$16 sps:$4 sm:$0xff]  }
  0xb0   : > { %3869 = vmatprep.mubr.bf16.mxu1 %v7098_v11  ;;  %v256_v37 = vld [vmem:[%s7000_s22 + $0x120] sm:$0xff] }
  0xb1   : > { %3895 = vmatpush1.bf16.msra.mxu0 %v6111_v0  ;;  %v6155_v0 = vld [vmem:[#allocation4 + $0x524] ss:$16 sps:$4 sm:$0xff]  }
  0xb2   : > { %3978 = vmatpush1.bf16.msra.mxu1 %v6114_v3  ;;  %3896 = vmatprep.subr.bf16.mxu0 %v6119_v8  ;;  %v6156_v3 = vld [vmem:[#allocation4 + $0x720] ss:$16 sps:$4 sm:$0xff]  }
  0xb3   : > { %3979 = vmatprep.subr.bf16.mxu1 %v6122_v10  ;;  %v226_v8 = vld [vmem:[%s7000_s22 + $0x30] sm:$0xff] }
  0xb4   : > { %3787 = vmatmul.mubr.bf16.gmra.mxu0 %v7104_v20  ;;  %v242_v10 = vld [vmem:[%s7000_s22 + $0xb0] sm:$0xff] }
  0xb5   : > { %3870 = vmatmul.mubr.bf16.gmra.mxu1 %v7106_v24  ;;  %3897 = vmatpush2.bf16.msra.mxu0 %v6117_v16  ;;  %v384_v16 = vmax.f32 %v224_v6, 0.0  ;;  %v291_v6 = vld [vmem:[%s7000_s22 + $0x238] sm:$0xff] }
  0xb6   : > { %3980 = vmatpush2.bf16.msra.mxu1 %v6120_v17  ;;  %3898 = vmatprep.subr.bf16.mxu0 %v6125_v21  ;;  %v257_v17 = vld [vmem:[%s7000_s22 + $0x128] sm:$0xff]  ;;  %v400_v21 = vmax.f32 %v240_v7, 0.0  ;;  %v307_v7 = vld [vmem:[%s7000_s22 + $0x2b8] sm:$0xff] }
  0xb7   : > { %3981 = vmatprep.subr.bf16.mxu1 %v6128_v25  ;;  %3912 = vmatprep.mubr.bf16.mxu0 %v7114_v41  ;;  %v386_v25 = vmax.f32 %v226_v8, 0.0  ;;  %v417_v35 = vmax.f32 %v257_v17, 0.0  ;;  %v6179_v8 = vld [vmem:[#allocation4 + $0x8a4] ss:$16 sps:$4 sm:$0xff]   ;;  %v451_v17 = vmax.f32 %v291_v6, 0.0 }
  0xb8   : > { %3995 = vmatprep.mubr.bf16.mxu1 %v7116_v42 }
  0xb9   : > { %3899 = vmatpush2.bf16.msra.mxu0 %v6123_v26  ;;  %v402_v26 = vmax.f32 %v242_v10, 0.0  ;;  %v6182_v10 = vld [vmem:[#allocation4 + $0xaa4] ss:$16 sps:$4 sm:$0xff]  }
  0xba   : > { %3982 = vmatpush2.bf16.msra.mxu1 %v6126_v27  ;;  %3900 = vmatprep.subr.bf16.mxu0 %v6131_v33  ;;  %v273_v27 = vld [vmem:[%s7000_s22 + $0x1a8] sm:$0xff]  ;;  %v6168_v33 = vld [vmem:[#allocation4 + $0xae0] ss:$16 sps:$4 sm:$0xff]  }
  0xbb   : > { %3983 = vmatprep.subr.bf16.mxu1 %v6134_v39  ;;  %v433_v36 = vmax.f32 %v273_v27, 0.0  ;;  %v419_v39 = vmax.f32 %v259_v28, 0.0  ;;  %v304_v27 = vld [vmem:[%s7000_s22 + $0x2a0] sm:$0xff]  ;;  %v290_v28 = vld [vmem:[%s7000_s22 + $0x230] sm:$0xff] }
  0xbd   : > { %3901 = vmatpush2.bf16.msra.mxu0 %v6129_v44  ;;  %v435_v44 = vmax.f32 %v275_v29, 0.0  ;;  %v306_v29 = vld [vmem:[%s7000_s22 + $0x2b0] sm:$0xff] }
  0xbe   : > { %3984 = vmatpush2.bf16.msra.mxu1 %v6132_v45  ;;  %3902 = vmatprep.subr.bf16.mxu0 %v6137_v46  ;;  %v7129_v45 = vpack.c.bf16 %v400_v21, %v384_v16  ;;  %v7131_v46 = vpack.c.bf16 %v402_v26, %v386_v25  ;;  %v288_v16 = vld [vmem:[%s7000_s22 + $0x220] sm:$0xff]  ;;  %v467_v21 = vmax.f32 %v307_v7, 0.0 }
  0xbf   : > { %3985 = vmatprep.subr.bf16.mxu1 %v6140_v47  ;;  %v272_v47 = vld [vmem:[%s7000_s22 + $0x1a0] sm:$0xff] }
  0xc1   : > { %3903 = vmatpush2.bf16.msra.mxu0 %v6135_v48  ;;  %v258_v48 = vld [vmem:[%s7000_s22 + $0x130] sm:$0xff] }
  0xc2   : > { %3986 = vmatpush2.bf16.msra.mxu1 %v6138_v49  ;;  %3904 = vmatprep.subr.bf16.mxu0 %v6143_v54  ;;  %v274_v49 = vld [vmem:[%s7000_s22 + $0x1b0] sm:$0xff] }
  0xc3   : > { %3987 = vmatprep.subr.bf16.mxu1 %v6146_v55  ;;  %v6173_v54 = vld [vmem:[#allocation4 + $0x8c4] ss:$16 sps:$4 sm:$0xff]  }
  0xc4   : > { %v6176_v55 = vld [vmem:[#allocation4 + $0xac4] ss:$16 sps:$4 sm:$0xff]  }
  0xc5   : > { %3905 = vmatpush2.bf16.msra.mxu0 %v6141_v56  ;;  %v6171_v56 = vld [vmem:[#allocation4 + $0x8c0] ss:$16 sps:$4 sm:$0xff]  }
  0xc6   : > { %3988 = vmatpush2.bf16.msra.mxu1 %v6144_v57  ;;  %3906 = vmatprep.subr.bf16.mxu0 %v6149_v60  ;;  %v6174_v57 = vld [vmem:[#allocation4 + $0xac0] ss:$16 sps:$4 sm:$0xff]   ;;  %v7136_v60 = vpack.c.bf16 %v433_v36, %v417_v35  ;;  %v448_v36 = vmax.f32 %v288_v16, 0.0 }
  0xc7   : > { %3989 = vmatprep.subr.bf16.mxu1 %v6152_v61  ;;  %v416_v61 = vmax.f32 %v256_v37, 0.0  ;;  %v7158_v37 = vpack.c.bf16 %v467_v21, %v451_v17  ;;  %v6195_v16 = vld [vmem:[#allocation4 + $0x840] ss:$16 sps:$4 sm:$0xff]  }
  0xc8   : > { %8133 = vst [vmem:[#allocation9_spill] sm:$0xff] %v7136_v60  ;;  %v6198_v17 = vld [vmem:[#allocation4 + $0xa40] ss:$16 sps:$4 sm:$0xff]  }
  0xc9   : > { %3907 = vmatpush2.bf16.msra.mxu0 %v6147_v62  ;;  %v7138_v62 = vpack.c.bf16 %v435_v44, %v419_v39  ;;  %8138 = vst [vmem:[#allocation14_spill] sm:$0xff] %v7158_v37  ;;  %v321_v39 = vld [vmem:[%s7000_s22 + $0x328] sm:$0xff] }
  0xca   : > { %3990 = vmatpush2.bf16.msra.mxu1 %v6150_v63  ;;  %3908 = vmatprep.subr.bf16.mxu0 %v6155_v0  ;;  %v289_v63 = vld [vmem:[%s7000_s22 + $0x228] sm:$0xff]  ;;  %v432_v0 = vmax.f32 %v272_v47, 0.0  ;;  %v464_v47 = vmax.f32 %v304_v27, 0.0 }
  0xcb   : > { %3991 = vmatprep.subr.bf16.mxu1 %v6158_v1  ;;  %8134 = vst [vmem:[#allocation10_spill] sm:$0xff] %v7138_v62  ;;  %v418_v1 = vmax.f32 %v258_v48, 0.0  ;;  %v337_v44 = vld [vmem:[%s7000_s22 + $0x3a8] sm:$0xff]  ;;  %v450_v48 = vmax.f32 %v290_v28, 0.0 }
  0xcc   : > { %v7149_v25 = vpack.c.bf16 %v432_v0, %v416_v61  ;;  %v6189_v61 = vld [vmem:[#allocation4 + $0x860] ss:$16 sps:$4 sm:$0xff]   ;;  %v481_v0 = vmax.f32 %v321_v39, 0.0  ;;  %v7169_v7 = vpack.c.bf16 %v464_v47, %v448_v36  ;;  %v355_v36 = vld [vmem:[%s7000_s22 + $0x438] sm:$0xff]  ;;  %v6206_v47 = vld [vmem:[#allocation4 + $0xa24] ss:$16 sps:$4 sm:$0xff]  }
  0xcd   : > { %3909 = vmatpush2.bf16.msra.mxu0 %v6153_v2  ;;  %v434_v2 = vmax.f32 %v274_v49, 0.0  ;;  %v466_v49 = vmax.f32 %v306_v29, 0.0  ;;  %v353_v29 = vld [vmem:[%s7000_s22 + $0x428] sm:$0xff]  ;;  %v371_v39 = vld [vmem:[%s7000_s22 + $0x4b8] sm:$0xff] }
  0xce   : > { %3992 = vmatpush2.bf16.msra.mxu1 %v6156_v3  ;;  %3910 = vmatprep.subr.bf16.mxu0 %v6161_v12  ;;  %v305_v3 = vld [vmem:[%s7000_s22 + $0x2a8] sm:$0xff]  ;;  %v6177_v12 = vld [vmem:[#allocation4 + $0x8a0] ss:$16 sps:$4 sm:$0xff]   ;;  %8135 = vst [vmem:[#allocation11_spill] sm:$0xff] %v7149_v25  ;;  %8139 = vst [vmem:[#allocation15_spill] sm:$0xff] %v7169_v7 }
  0xcf   : > { %3993 = vmatprep.subr.bf16.mxu1 %v6164_v13  ;;  %v6180_v13 = vld [vmem:[#allocation4 + $0xaa0] ss:$16 sps:$4 sm:$0xff]   ;;  %v7151_v26 = vpack.c.bf16 %v434_v2, %v418_v1  ;;  %v497_v1 = vmax.f32 %v337_v44, 0.0  ;;  %v6203_v44 = vld [vmem:[#allocation4 + $0x824] ss:$16 sps:$4 sm:$0xff]  }
  0xd0   : > { %v320_v2 = vld [vmem:[%s7000_s22 + $0x320] sm:$0xff] }
  0xd1   : > { %3911 = vmatpush2.bf16.msra.mxu0 %v6159_v14  ;;  %v449_v14 = vmax.f32 %v289_v63, 0.0  ;;  %8136 = vst [vmem:[#allocation12_spill] sm:$0xff] %v7151_v26  ;;  %v6192_v63 = vld [vmem:[#allocation4 + $0xa60] ss:$16 sps:$4 sm:$0xff]   ;;  %v7176_v21 = vpack.c.bf16 %v497_v1, %v481_v0  ;;  %v480_v27 = vmax.f32 %v320_v2, 0.0 }
  0xd2   : > { %3994 = vmatpush2.bf16.msra.mxu1 %v6162_v15  ;;  %4046 = vmatprep.subr.bf16.mxu0 %v6167_v30  ;;  %v465_v15 = vmax.f32 %v305_v3, 0.0  ;;  %v6185_v30 = vld [vmem:[#allocation4 + $0x884] ss:$16 sps:$4 sm:$0xff]  }
  0xd3   : > { %4129 = vmatprep.subr.bf16.mxu1 %v6170_v31  ;;  %v6188_v31 = vld [vmem:[#allocation4 + $0xa84] ss:$16 sps:$4 sm:$0xff]   ;;  %8141 = vst [vmem:[#allocation17_spill] sm:$0xff] %v7176_v21 }
  0xd4   : > { %3913 = vmatmul.mubr.bf16.vlgmr.msra.gmra.mxu0 %v7129_v45  ;;  %v7156_v35 = vpack.c.bf16 %v465_v15, %v449_v14  ;;  %v338_v14 = vld [vmem:[%s7000_s22 + $0x3b0] sm:$0xff]  ;;  %v368_v2 = vld [vmem:[%s7000_s22 + $0x4a0] sm:$0xff] }
  0xd5   : > { %3996 = vmatmul.mubr.bf16.vlgmr.msra.gmra.mxu1 %v7131_v46  ;;  %4047 = vmatpush1.bf16.msra.mxu0 %v6165_v32  ;;  %v6183_v32 = vld [vmem:[#allocation4 + $0x880] ss:$16 sps:$4 sm:$0xff]   ;;  %v6200_v15 = vld [vmem:[#allocation4 + $0xa44] ss:$16 sps:$4 sm:$0xff]  }
  0xd6   : > { %4130 = vmatpush1.bf16.msra.mxu1 %v6168_v33  ;;  %4048 = vmatprep.subr.bf16.mxu0 %v6173_v54  ;;  %v6186_v33 = vld [vmem:[#allocation4 + $0xa80] ss:$16 sps:$4 sm:$0xff]   ;;  %8137 = vst [vmem:[#allocation13_spill] sm:$0xff] %v7156_v35  ;;  %v323_v54 = vld [vmem:[%s7000_s22 + $0x338] sm:$0xff]  ;;  %v6209_v1 = vld [vmem:[#allocation4 + $0x804] ss:$16 sps:$4 sm:$0xff]  }
  0xd7   : > { %4131 = vmatprep.subr.bf16.mxu1 %v6176_v55  ;;  %3922 = vmatprep.mubr.bf16.mxu0 %v7136_v60  ;;  %v339_v55 = vld [vmem:[%s7000_s22 + $0x3b8] sm:$0xff]  ;;  %v483_v3 = vmax.f32 %v323_v54, 0.0  ;;  %v513_v54 = vmax.f32 %v353_v29, 0.0 }
  0xd8   : > { %4005 = vmatprep.mubr.bf16.mxu1 %v7138_v62  ;;  %v499_v6 = vmax.f32 %v339_v55, 0.0  ;;  %v378_v62 = vld [vmem:[%s7000_s22 + $0x4f0] sm:$0xff] }
  0xd9   : > { %4049 = vmatpush1.bf16.msra.mxu0 %v6171_v56  ;;  %v6191_v56 = vld [vmem:[#allocation4 + $0x864] ss:$16 sps:$4 sm:$0xff]  }
  0xda   : > { %4132 = vmatpush1.bf16.msra.mxu1 %v6174_v57  ;;  %4050 = vmatprep.subr.bf16.mxu0 %v6179_v8  ;;  %v6194_v57 = vld [vmem:[#allocation4 + $0xa64] ss:$16 sps:$4 sm:$0xff]   ;;  %v7171_v8 = vpack.c.bf16 %v466_v49, %v450_v48  ;;  %v7178_v28 = vpack.c.bf16 %v499_v6, %v483_v3  ;;  %v6201_v48 = vld [vmem:[#allocation4 + $0x820] ss:$16 sps:$4 sm:$0xff]  }
  0xdb   : > { %4133 = vmatprep.subr.bf16.mxu1 %v6182_v10  ;;  %v6197_v10 = vld [vmem:[#allocation4 + $0x844] ss:$16 sps:$4 sm:$0xff]   ;;  %v6204_v49 = vld [vmem:[#allocation4 + $0xa20] ss:$16 sps:$4 sm:$0xff]  }
  0xdc   : > { %3923 = vmatmul.mubr.bf16.gmra.mxu0 %v7149_v25  ;;  %8140 = vst [vmem:[#allocation16_spill] sm:$0xff] %v7171_v8  ;;  %8142 = vst [vmem:[#allocation18_spill] sm:$0xff] %v7178_v28  ;;  %v354_v3 = vld [vmem:[%s7000_s22 + $0x430] sm:$0xff] }
  0xdd   : > { %4006 = vmatmul.mubr.bf16.gmra.mxu1 %v7151_v26  ;;  %4051 = vmatpush1.bf16.msra.mxu0 %v6177_v12  ;;  %v336_v12 = vld [vmem:[%s7000_s22 + $0x3a0] sm:$0xff]  ;;  %v370_v6 = vld [vmem:[%s7000_s22 + $0x4b0] sm:$0xff]  ;;  %v514_v29 = vmax.f32 %v354_v3, 0.0 }
  0xde   : > { %4134 = vmatpush1.bf16.msra.mxu1 %v6180_v13  ;;  %4052 = vmatprep.subr.bf16.mxu0 %v6185_v30  ;;  %v322_v13 = vld [vmem:[%s7000_s22 + $0x330] sm:$0xff]  ;;  %v369_v30 = vld [vmem:[%s7000_s22 + $0x4a8] sm:$0xff] }
  0xdf   : > { %4135 = vmatprep.subr.bf16.mxu1 %v6188_v31  ;;  %3932 = vmatprep.mubr.bf16.mxu0 %v7156_v35  ;;  %v496_v31 = vmax.f32 %v336_v12, 0.0  ;;  %v529_v55 = vmax.f32 %v369_v30, 0.0  ;;  %v245_v30 = vld [vmem:[%s7000_s22 + $0xc8] sm:$0xff] }
  0xe0   : > { %4015 = vmatprep.mubr.bf16.mxu1 %v7158_v37 }
  0xe1   : > { %4053 = vmatpush1.bf16.msra.mxu0 %v6183_v32  ;;  %v482_v32 = vmax.f32 %v322_v13, 0.0  ;;  %v7196_v12 = vpack.c.bf16 %v529_v55, %v513_v54 }
  0xe2   : > { %4136 = vmatpush1.bf16.msra.mxu1 %v6186_v33  ;;  %4054 = vmatprep.subr.bf16.mxu0 %v6191_v56  ;;  %v498_v33 = vmax.f32 %v338_v14, 0.0  ;;  %v352_v56 = vld [vmem:[%s7000_s22 + $0x420] sm:$0xff] }
  0xe3   : > { %4137 = vmatprep.subr.bf16.mxu1 %v6194_v57  ;;  %v515_v57 = vmax.f32 %v355_v36, 0.0  ;;  %8145 = vst [vmem:[#allocation21_spill] sm:$0xff] %v7196_v12  ;;  %v512_v13 = vmax.f32 %v352_v56, 0.0  ;;  %v6215_v36 = vld [vmem:[#allocation4 + $0x9e4] ss:$16 sps:$4 sm:$0xff]  }
  0xe4   : > { %3933 = vmatmul.mubr.bf16.gmra.mxu0 %v7169_v7  ;;  %v7191_v0 = vpack.c.bf16 %v498_v33, %v482_v32  ;;  %v6207_v32 = vld [vmem:[#allocation4 + $0x800] ss:$16 sps:$4 sm:$0xff]  }
  0xe5   : > { %4016 = vmatmul.mubr.bf16.gmra.mxu1 %v7171_v8  ;;  %4055 = vmatpush1.bf16.msra.mxu0 %v6189_v61  ;;  %v531_v61 = vmax.f32 %v371_v39, 0.0  ;;  %v6210_v33 = vld [vmem:[#allocation4 + $0xa00] ss:$16 sps:$4 sm:$0xff]   ;;  %v6218_v39 = vld [vmem:[#allocation4 + $0xbe4] ss:$16 sps:$4 sm:$0xff]  }
  0xe6   : > { %4138 = vmatpush1.bf16.msra.mxu1 %v6192_v63  ;;  %4056 = vmatprep.subr.bf16.mxu0 %v6197_v10  ;;  %v7189_v63 = vpack.c.bf16 %v496_v31, %v480_v27  ;;  %8144 = vst [vmem:[#allocation20_spill] sm:$0xff] %v7191_v0  ;;  %v6212_v10 = vld [vmem:[#allocation4 + $0xa04] ss:$16 sps:$4 sm:$0xff]   ;;  %v528_v27 = vmax.f32 %v368_v2, 0.0  ;;  %v247_v31 = vld [vmem:[%s7000_s22 + $0xd8] sm:$0xff] }
  0xe7   : > { %4139 = vmatprep.subr.bf16.mxu1 %v6200_v15  ;;  %3942 = vmatprep.mubr.bf16.mxu0 %v7176_v21  ;;  %v7198_v14 = vpack.c.bf16 %v531_v61, %v515_v57  ;;  %v229_v15 = vld [vmem:[%s7000_s22 + $0x48] sm:$0xff]  ;;  %v407_v55 = vmax.f32 %v247_v31, 0.0  ;;  %v6213_v57 = vld [vmem:[#allocation4 + $0x9e0] ss:$16 sps:$4 sm:$0xff]  }
  0xe8   : > { %4025 = vmatprep.mubr.bf16.mxu1 %v7178_v28  ;;  %8143 = vst [vmem:[#allocation19_spill] sm:$0xff] %v7189_v63  ;;  %v7208_v56 = vpack.c.bf16 %v528_v27, %v512_v13  ;;  %v6216_v61 = vld [vmem:[#allocation4 + $0xbe0] ss:$16 sps:$4 sm:$0xff]   ;;  %v6227_v13 = vld [vmem:[#allocation4 + $0x9a4] ss:$16 sps:$4 sm:$0xff]   ;;  %v315_v28 = vld [vmem:[%s7000_s22 + $0x2f8] sm:$0xff] }
  0xe9   : > { %4057 = vmatpush1.bf16.msra.mxu0 %v6195_v16  ;;  %8146 = vst [vmem:[#allocation22_spill] sm:$0xff] %v7198_v14  ;;  %v530_v16 = vmax.f32 %v370_v6, 0.0  ;;  %v6219_v6 = vld [vmem:[#allocation4 + $0x9c0] ss:$16 sps:$4 sm:$0xff]  }
  0xea   : > { %4140 = vmatpush1.bf16.msra.mxu1 %v6198_v17  ;;  %4058 = vmatprep.subr.bf16.mxu0 %v6203_v44  ;;  %v231_v17 = vld [vmem:[%s7000_s22 + $0x58] sm:$0xff]  ;;  %v389_v44 = vmax.f32 %v229_v15, 0.0  ;;  %8147 = vst [vmem:[#allocation23_spill] sm:$0xff] %v7208_v56  ;;  %v6230_v15 = vld [vmem:[#allocation4 + $0xba4] ss:$16 sps:$4 sm:$0xff]  }
  0xeb   : > { %4141 = vmatprep.subr.bf16.mxu1 %v6206_v47  ;;  %v405_v47 = vmax.f32 %v245_v30, 0.0  ;;  %v391_v54 = vmax.f32 %v231_v17, 0.0  ;;  %v6225_v27 = vld [vmem:[#allocation4 + $0x9a0] ss:$16 sps:$4 sm:$0xff]   ;;  %v6236_v30 = vld [vmem:[#allocation4 + $0xb84] ss:$16 sps:$4 sm:$0xff]  }
  0xec   : > { %3943 = vmatmul.mubr.bf16.gmra.mxu0 %v7189_v63  ;;  %v6231_v17 = vld [vmem:[#allocation4 + $0x980] ss:$16 sps:$4 sm:$0xff]   ;;  %v299_v63 = vld [vmem:[%s7000_s22 + $0x278] sm:$0xff] }
  0xed   : > { %4026 = vmatmul.mubr.bf16.gmra.mxu1 %v7191_v0  ;;  %4059 = vmatpush1.bf16.msra.mxu0 %v6201_v48  ;;  %v7210_v48 = vpack.c.bf16 %v530_v16, %v514_v29  ;;  %v7212_v2 = vpack.c.bf16 %v405_v47, %v389_v44  ;;  %v7214_v3 = vpack.c.bf16 %v407_v55, %v391_v54  ;;  %v6228_v29 = vld [vmem:[#allocation4 + $0xba0] ss:$16 sps:$4 sm:$0xff]   ;;  %v6233_v16 = vld [vmem:[#allocation4 + $0x984] ss:$16 sps:$4 sm:$0xff]  }
  0xee   : > { %4142 = vmatpush1.bf16.msra.mxu1 %v6204_v49  ;;  %4060 = vmatprep.subr.bf16.mxu0 %v6209_v1  ;;  %v6221_v49 = vld [vmem:[#allocation4 + $0x9c4] ss:$16 sps:$4 sm:$0xff]   ;;  %v6234_v31 = vld [vmem:[#allocation4 + $0xb80] ss:$16 sps:$4 sm:$0xff]  }
  0xef   : > { %4143 = vmatprep.subr.bf16.mxu1 %v6212_v10  ;;  %3952 = vmatprep.mubr.bf16.mxu0 %v7196_v12  ;;  %8148 = vst [vmem:[#allocation24_spill] sm:$0xff] %v7210_v48  ;;  %v6224_v1 = vld [vmem:[#allocation4 + $0xbc4] ss:$16 sps:$4 sm:$0xff]   ;;  %8149 = vst [vmem:[#allocation25_spill] sm:$0xff] %v7212_v2  ;;  %v6222_v10 = vld [vmem:[#allocation4 + $0xbc0] ss:$16 sps:$4 sm:$0xff]  }
  0xf0   : > { %4035 = vmatprep.mubr.bf16.mxu1 %v7198_v14  ;;  %8150 = vst [vmem:[#allocation26_spill] sm:$0xff] %v7214_v3  ;;  %v6245_v44 = vld [vmem:[#allocation4 + $0x944] ss:$16 sps:$4 sm:$0xff]   ;;  %v6243_v54 = vld [vmem:[#allocation4 + $0x940] ss:$16 sps:$4 sm:$0xff]  }
  0xf1   : > { %4061 = vmatpush1.bf16.msra.mxu0 %v6207_v32  ;;  %v6239_v32 = vld [vmem:[#allocation4 + $0x964] ss:$16 sps:$4 sm:$0xff]   ;;  %v6246_v55 = vld [vmem:[#allocation4 + $0xb40] ss:$16 sps:$4 sm:$0xff]  }
  0xf2   : > { %4144 = vmatpush1.bf16.msra.mxu1 %v6210_v33  ;;  %4062 = vmatprep.subr.bf16.mxu0 %v6215_v36  ;;  %v6242_v33 = vld [vmem:[#allocation4 + $0xb64] ss:$16 sps:$4 sm:$0xff]   ;;  %v6237_v36 = vld [vmem:[#allocation4 + $0x960] ss:$16 sps:$4 sm:$0xff]  }
  0xf3   : > { %4145 = vmatprep.subr.bf16.mxu1 %v6218_v39  ;;  %v6240_v39 = vld [vmem:[#allocation4 + $0xb60] ss:$16 sps:$4 sm:$0xff]   ;;  %v6248_v47 = vld [vmem:[#allocation4 + $0xb44] ss:$16 sps:$4 sm:$0xff]  }
  0xf4   : > { %3953 = vmatmul.mubr.bf16.gmra.mxu0 %v7208_v56  ;;  %v278_v56 = vld [vmem:[%s7000_s22 + $0x1d0] sm:$0xff] }
  0xf5   : > { %4036 = vmatmul.mubr.bf16.gmra.mxu1 %v7210_v48  ;;  %4063 = vmatpush2.bf16.msra.mxu0 %v6213_v57  ;;  %v6251_v57 = vld [vmem:[#allocation4 + $0x924] ss:$16 sps:$4 sm:$0xff]  }
  0xf6   : > { %4146 = vmatpush2.bf16.msra.mxu1 %v6216_v61  ;;  %4064 = vmatprep.subr.bf16.mxu0 %v6221_v49  ;;  %v6254_v61 = vld [vmem:[#allocation4 + $0xb24] ss:$16 sps:$4 sm:$0xff]   ;;  %v6249_v49 = vld [vmem:[#allocation4 + $0x920] ss:$16 sps:$4 sm:$0xff]  }
  0xf7   : > { %4147 = vmatprep.subr.bf16.mxu1 %v6224_v1  ;;  %4078 = vmatprep.mubr.bf16.mxu0 %v7212_v2  ;;  %v6252_v1 = vld [vmem:[#allocation4 + $0xb20] ss:$16 sps:$4 sm:$0xff]   ;;  %v6275_v14 = vld [vmem:[#allocation4 + $0xca4] ss:$16 sps:$4 sm:$0xff]  }
  0xf8   : > { %4161 = vmatprep.mubr.bf16.mxu1 %v7214_v3  ;;  %v266_v12 = vld [vmem:[%s7000_s22 + $0x170] sm:$0xff] }
  0xf9   : > { %4065 = vmatpush2.bf16.msra.mxu0 %v6219_v6  ;;  %v228_v6 = vld [vmem:[%s7000_s22 + $0x40] sm:$0xff]  ;;  %v282_v0 = vld [vmem:[%s7000_s22 + $0x1f0] sm:$0xff] }
  0xfa   : > { %4148 = vmatpush2.bf16.msra.mxu1 %v6222_v10  ;;  %4066 = vmatprep.subr.bf16.mxu0 %v6227_v13  ;;  %v244_v10 = vld [vmem:[%s7000_s22 + $0xc0] sm:$0xff]  ;;  %v230_v13 = vld [vmem:[%s7000_s22 + $0x50] sm:$0xff] }
  0xfb   : > { %4149 = vmatprep.subr.bf16.mxu1 %v6230_v15  ;;  %v246_v15 = vld [vmem:[%s7000_s22 + $0xd0] sm:$0xff] }
  0xfd   : > { %4067 = vmatpush2.bf16.msra.mxu0 %v6225_v27  ;;  %v6257_v27 = vld [vmem:[#allocation4 + $0x904] ss:$16 sps:$4 sm:$0xff]  }
  0xfe   : > { %4150 = vmatpush2.bf16.msra.mxu1 %v6228_v29  ;;  %4068 = vmatprep.subr.bf16.mxu0 %v6233_v16  ;;  %v6260_v29 = vld [vmem:[#allocation4 + $0xb04] ss:$16 sps:$4 sm:$0xff]   ;;  %v6255_v16 = vld [vmem:[#allocation4 + $0x900] ss:$16 sps:$4 sm:$0xff]  }
  0xff   : > { %4151 = vmatprep.subr.bf16.mxu1 %v6236_v30  ;;  %v6258_v30 = vld [vmem:[#allocation4 + $0xb00] ss:$16 sps:$4 sm:$0xff]  }
 0x101   : > { %4069 = vmatpush2.bf16.msra.mxu0 %v6231_v17  ;;  %v388_v17 = vmax.f32 %v228_v6, 0.0 }
 0x102   : > { %4152 = vmatpush2.bf16.msra.mxu1 %v6234_v31  ;;  %4070 = vmatprep.subr.bf16.mxu0 %v6239_v32  ;;  %v261_v31 = vld [vmem:[%s7000_s22 + $0x148] sm:$0xff]  ;;  %v404_v32 = vmax.f32 %v244_v10, 0.0  ;;  %v260_v10 = vld [vmem:[%s7000_s22 + $0x140] sm:$0xff] }
 0x103   : > { %4153 = vmatprep.subr.bf16.mxu1 %v6242_v33  ;;  %v390_v33 = vmax.f32 %v230_v13, 0.0  ;;  %v421_v6 = vmax.f32 %v261_v31, 0.0  ;;  %v6267_v31 = vld [vmem:[#allocation4 + $0xcc0] ss:$16 sps:$4 sm:$0xff]  }
 0x105   : > { %4071 = vmatpush2.bf16.msra.mxu0 %v6237_v36  ;;  %v406_v36 = vmax.f32 %v246_v15, 0.0  ;;  %v7229_v15 = vpack.c.bf16 %v404_v32, %v388_v17  ;;  %v420_v17 = vmax.f32 %v260_v10, 0.0 }
 0x106   : > { %4154 = vmatpush2.bf16.msra.mxu1 %v6240_v39  ;;  %4072 = vmatprep.subr.bf16.mxu0 %v6245_v44  ;;  %v277_v39 = vld [vmem:[%s7000_s22 + $0x1c8] sm:$0xff]  ;;  %v263_v44 = vld [vmem:[%s7000_s22 + $0x158] sm:$0xff] }
 0x107   : > { %4155 = vmatprep.subr.bf16.mxu1 %v6248_v47  ;;  %v279_v47 = vld [vmem:[%s7000_s22 + $0x1d8] sm:$0xff]  ;;  %v437_v3 = vmax.f32 %v277_v39, 0.0  ;;  %v423_v2 = vmax.f32 %v263_v44, 0.0  ;;  %8151 = vst [vmem:[#allocation27_spill] sm:$0xff] %v7229_v15  ;;  %v7231_v48 = vpack.c.bf16 %v406_v36, %v390_v33  ;;  %v6270_v39 = vld [vmem:[#allocation4 + $0xec0] ss:$16 sps:$4 sm:$0xff]  }
 0x108   : > { %v439_v13 = vmax.f32 %v279_v47, 0.0  ;;  %v293_v33 = vld [vmem:[%s7000_s22 + $0x248] sm:$0xff]  ;;  %v438_v47 = vmax.f32 %v278_v56, 0.0  ;;  %v292_v56 = vld [vmem:[%s7000_s22 + $0x240] sm:$0xff] }
 0x109   : > { %4073 = vmatpush2.bf16.msra.mxu0 %v6243_v54  ;;  %v6263_v54 = vld [vmem:[#allocation4 + $0xce4] ss:$16 sps:$4 sm:$0xff]   ;;  %8152 = vst [vmem:[#allocation28_spill] sm:$0xff] %v7231_v48  ;;  %v7236_v44 = vpack.c.bf16 %v437_v3, %v421_v6  ;;  %v309_v36 = vld [vmem:[%s7000_s22 + $0x2c8] sm:$0xff]  ;;  %v6273_v3 = vld [vmem:[#allocation4 + $0xca0] ss:$16 sps:$4 sm:$0xff]  }
 0x10a   : > { %4156 = vmatpush2.bf16.msra.mxu1 %v6246_v55  ;;  %4074 = vmatprep.subr.bf16.mxu0 %v6251_v57  ;;  %v6266_v55 = vld [vmem:[#allocation4 + $0xee4] ss:$16 sps:$4 sm:$0xff]   ;;  %v6261_v57 = vld [vmem:[#allocation4 + $0xce0] ss:$16 sps:$4 sm:$0xff]   ;;  %v7238_v32 = vpack.c.bf16 %v439_v13, %v423_v2  ;;  %v453_v10 = vmax.f32 %v293_v33, 0.0  ;;  %v469_v13 = vmax.f32 %v309_v36, 0.0 }
 0x10b   : > { %4157 = vmatprep.subr.bf16.mxu1 %v6254_v61  ;;  %v6264_v61 = vld [vmem:[#allocation4 + $0xee0] ss:$16 sps:$4 sm:$0xff]   ;;  %8153 = vst [vmem:[#allocation29_spill] sm:$0xff] %v7236_v44  ;;  %v6278_v2 = vld [vmem:[#allocation4 + $0xea4] ss:$16 sps:$4 sm:$0xff]  }
 0x10c   : > { %8154 = vst [vmem:[#allocation30_spill] sm:$0xff] %v7238_v32  ;;  %v6276_v6 = vld [vmem:[#allocation4 + $0xea0] ss:$16 sps:$4 sm:$0xff]   ;;  %v6284_v33 = vld [vmem:[#allocation4 + $0xe84] ss:$16 sps:$4 sm:$0xff]  }
 0x10d   : > { %4075 = vmatpush2.bf16.msra.mxu0 %v6249_v49  ;;  %v276_v49 = vld [vmem:[%s7000_s22 + $0x1c0] sm:$0xff] }
 0x10e   : > { %4158 = vmatpush2.bf16.msra.mxu1 %v6252_v1  ;;  %4076 = vmatprep.subr.bf16.mxu0 %v6257_v27  ;;  %v262_v1 = vld [vmem:[%s7000_s22 + $0x150] sm:$0xff] }
 0x10f   : > { %4159 = vmatprep.subr.bf16.mxu1 %v6260_v29  ;;  %v6269_v27 = vld [vmem:[#allocation4 + $0xcc4] ss:$16 sps:$4 sm:$0xff]   ;;  %v6279_v36 = vld [vmem:[#allocation4 + $0xc80] ss:$16 sps:$4 sm:$0xff]  }
 0x110   : > { %v6272_v29 = vld [vmem:[#allocation4 + $0xec4] ss:$16 sps:$4 sm:$0xff]  }
 0x111   : > { %4077 = vmatpush2.bf16.msra.mxu0 %v6255_v16  ;;  %v436_v16 = vmax.f32 %v276_v49, 0.0 }
 0x112   : > { %4160 = vmatpush2.bf16.msra.mxu1 %v6258_v30  ;;  %4212 = vmatprep.subr.bf16.mxu0 %v6263_v54  ;;  %v422_v30 = vmax.f32 %v262_v1, 0.0  ;;  %v295_v54 = vld [vmem:[%s7000_s22 + $0x258] sm:$0xff] }
 0x113   : > { %4295 = vmatprep.subr.bf16.mxu1 %v6266_v55  ;;  %v311_v55 = vld [vmem:[%s7000_s22 + $0x2d8] sm:$0xff]  ;;  %v455_v49 = vmax.f32 %v295_v54, 0.0  ;;  %v6282_v54 = vld [vmem:[#allocation4 + $0xe80] ss:$16 sps:$4 sm:$0xff]  }
 0x114   : > { %4079 = vmatmul.mubr.bf16.vlgmr.msra.gmra.mxu0 %v7229_v15  ;;  %v471_v1 = vmax.f32 %v311_v55, 0.0  ;;  %v7256_v55 = vpack.c.bf16 %v469_v13, %v453_v10  ;;  %v6287_v15 = vld [vmem:[#allocation4 + $0xc64] ss:$16 sps:$4 sm:$0xff]   ;;  %v6285_v13 = vld [vmem:[#allocation4 + $0xc60] ss:$16 sps:$4 sm:$0xff]  }
 0x115   : > { %4162 = vmatmul.mubr.bf16.vlgmr.msra.gmra.mxu1 %v7231_v48  ;;  %4213 = vmatpush1.bf16.msra.mxu0 %v6261_v57  ;;  %v7249_v57 = vpack.c.bf16 %v436_v16, %v420_v17  ;;  %v294_v48 = vld [vmem:[%s7000_s22 + $0x250] sm:$0xff]  ;;  %v452_v17 = vmax.f32 %v292_v56, 0.0 }
 0x116   : > { %4296 = vmatpush1.bf16.msra.mxu1 %v6264_v61  ;;  %4214 = vmatprep.subr.bf16.mxu0 %v6269_v27  ;;  %v7251_v61 = vpack.c.bf16 %v438_v47, %v422_v30  ;;  %v6281_v27 = vld [vmem:[#allocation4 + $0xc84] ss:$16 sps:$4 sm:$0xff]   ;;  %8157 = vst [vmem:[#allocation33_spill] sm:$0xff] %v7256_v55  ;;  %v7258_v16 = vpack.c.bf16 %v471_v1, %v455_v49  ;;  %v325_v30 = vld [vmem:[%s7000_s22 + $0x348] sm:$0xff]  ;;  %v6288_v56 = vld [vmem:[#allocation4 + $0xe60] ss:$16 sps:$4 sm:$0xff]  }
 0x117   : > { %4297 = vmatprep.subr.bf16.mxu1 %v6272_v29  ;;  %4088 = vmatprep.mubr.bf16.mxu0 %v7236_v44  ;;  %8155 = vst [vmem:[#allocation31_spill] sm:$0xff] %v7249_v57  ;;  %v308_v29 = vld [vmem:[%s7000_s22 + $0x2c0] sm:$0xff]  ;;  %v310_v44 = vld [vmem:[%s7000_s22 + $0x2d0] sm:$0xff]  ;;  %v341_v47 = vld [vmem:[%s7000_s22 + $0x3c8] sm:$0xff] }
 0x118   : > { %4171 = vmatprep.mubr.bf16.mxu1 %v7238_v32  ;;  %8156 = vst [vmem:[#allocation32_spill] sm:$0xff] %v7251_v61  ;;  %8158 = vst [vmem:[#allocation34_spill] sm:$0xff] %v7258_v16  ;;  %v327_v32 = vld [vmem:[%s7000_s22 + $0x358] sm:$0xff]  ;;  %v6290_v10 = vld [vmem:[#allocation4 + $0xe64] ss:$16 sps:$4 sm:$0xff]   ;;  %v501_v49 = vmax.f32 %v341_v47, 0.0 }
 0x119   : > { %4215 = vmatpush1.bf16.msra.mxu0 %v6267_v31  ;;  %v468_v31 = vmax.f32 %v308_v29, 0.0  ;;  %v487_v1 = vmax.f32 %v327_v32, 0.0 }
 0x11a   : > { %4298 = vmatpush1.bf16.msra.mxu1 %v6270_v39  ;;  %4216 = vmatprep.subr.bf16.mxu0 %v6275_v14  ;;  %v454_v39 = vmax.f32 %v294_v48, 0.0  ;;  %v470_v14 = vmax.f32 %v310_v44, 0.0  ;;  %v485_v48 = vmax.f32 %v325_v30, 0.0  ;;  %v324_v44 = vld [vmem:[%s7000_s22 + $0x340] sm:$0xff] }
 0x11b   : > { %4299 = vmatprep.subr.bf16.mxu1 %v6278_v2  ;;  %v343_v2 = vld [vmem:[%s7000_s22 + $0x3d8] sm:$0xff]  ;;  %v6296_v30 = vld [vmem:[#allocation4 + $0xe44] ss:$16 sps:$4 sm:$0xff]   ;;  %v484_v32 = vmax.f32 %v324_v44, 0.0 }
 0x11c   : > { %4089 = vmatmul.mubr.bf16.gmra.mxu0 %v7249_v57  ;;  %v7271_v29 = vpack.c.bf16 %v470_v14, %v454_v39  ;;  %v7276_v47 = vpack.c.bf16 %v501_v49, %v485_v48  ;;  %v373_v14 = vld [vmem:[%s7000_s22 + $0x4c8] sm:$0xff]  ;;  %v6299_v48 = vld [vmem:[#allocation4 + $0xc24] ss:$16 sps:$4 sm:$0xff]  }
 0x11d   : > { %4172 = vmatmul.mubr.bf16.gmra.mxu1 %v7251_v61  ;;  %4217 = vmatpush1.bf16.msra.mxu0 %v6273_v3  ;;  %v503_v3 = vmax.f32 %v343_v2, 0.0  ;;  %v326_v61 = vld [vmem:[%s7000_s22 + $0x350] sm:$0xff] }
 0x11e   : > { %4300 = vmatpush1.bf16.msra.mxu1 %v6276_v6  ;;  %4218 = vmatprep.subr.bf16.mxu0 %v6281_v27  ;;  %v7269_v6 = vpack.c.bf16 %v468_v31, %v452_v17  ;;  %8160 = vst [vmem:[#allocation36_spill] sm:$0xff] %v7271_v29  ;;  %v6293_v27 = vld [vmem:[#allocation4 + $0xc44] ss:$16 sps:$4 sm:$0xff]   ;;  %8161 = vst [vmem:[#allocation37_spill] sm:$0xff] %v7276_v47  ;;  %v357_v17 = vld [vmem:[%s7000_s22 + $0x448] sm:$0xff]  ;;  %v486_v39 = vmax.f32 %v326_v61, 0.0 }
 0x11f   : > { %4301 = vmatprep.subr.bf16.mxu1 %v6284_v33  ;;  %4098 = vmatprep.mubr.bf16.mxu0 %v7256_v55  ;;  %v340_v33 = vld [vmem:[%s7000_s22 + $0x3c0] sm:$0xff]  ;;  %v342_v55 = vld [vmem:[%s7000_s22 + $0x3d0] sm:$0xff]  ;;  %v7278_v2 = vpack.c.bf16 %v503_v3, %v487_v1  ;;  %v517_v44 = vmax.f32 %v357_v17, 0.0  ;;  %v533_v1 = vmax.f32 %v373_v14, 0.0 }
 0x120   : > { %4181 = vmatprep.mubr.bf16.mxu1 %v7258_v16  ;;  %8159 = vst [vmem:[#allocation35_spill] sm:$0xff] %v7269_v6  ;;  %v500_v31 = vmax.f32 %v340_v33, 0.0  ;;  %v375_v16 = vld [vmem:[%s7000_s22 + $0x4d8] sm:$0xff]  ;;  %v6302_v49 = vld [vmem:[#allocation4 + $0xe24] ss:$16 sps:$4 sm:$0xff]  }
 0x121   : > { %4219 = vmatpush1.bf16.msra.mxu0 %v6279_v36  ;;  %8162 = vst [vmem:[#allocation38_spill] sm:$0xff] %v7278_v2  ;;  %v502_v36 = vmax.f32 %v342_v55, 0.0  ;;  %v6297_v61 = vld [vmem:[#allocation4 + $0xc20] ss:$16 sps:$4 sm:$0xff]   ;;  %v6308_v14 = vld [vmem:[#allocation4 + $0xe04] ss:$16 sps:$4 sm:$0xff]  }
 0x122   : > { %4302 = vmatpush1.bf16.msra.mxu1 %v6282_v54  ;;  %4220 = vmatprep.subr.bf16.mxu0 %v6287_v15  ;;  %v359_v54 = vld [vmem:[%s7000_s22 + $0x458] sm:$0xff]  ;;  %v6291_v15 = vld [vmem:[#allocation4 + $0xc40] ss:$16 sps:$4 sm:$0xff]   ;;  %v7289_v33 = vpack.c.bf16 %v500_v31, %v484_v32  ;;  %v233_v31 = vld [vmem:[%s7000_s22 + $0x68] sm:$0xff] }
 0x123   : > { %4303 = vmatprep.subr.bf16.mxu1 %v6290_v10  ;;  %v6294_v10 = vld [vmem:[#allocation4 + $0xe40] ss:$16 sps:$4 sm:$0xff]   ;;  %v6311_v57 = vld [vmem:[#allocation4 + $0xde4] ss:$16 sps:$4 sm:$0xff]  }
 0x124   : > { %4099 = vmatmul.mubr.bf16.gmra.mxu0 %v7269_v6  ;;  %v6300_v55 = vld [vmem:[#allocation4 + $0xe20] ss:$16 sps:$4 sm:$0xff]   ;;  %8163 = vst [vmem:[#allocation39_spill] sm:$0xff] %v7289_v33  ;;  %v251_v6 = vld [vmem:[%s7000_s22 + $0xf8] sm:$0xff] }
 0x125   : > { %4182 = vmatmul.mubr.bf16.gmra.mxu1 %v7271_v29  ;;  %4221 = vmatpush1.bf16.msra.mxu0 %v6285_v13  ;;  %v356_v3 = vld [vmem:[%s7000_s22 + $0x440] sm:$0xff]  ;;  %v519_v13 = vmax.f32 %v359_v54, 0.0  ;;  %v358_v29 = vld [vmem:[%s7000_s22 + $0x450] sm:$0xff]  ;;  %v7296_v54 = vpack.c.bf16 %v533_v1, %v517_v44  ;;  %v393_v1 = vmax.f32 %v233_v31, 0.0 }
 0x126   : > { %4304 = vmatpush1.bf16.msra.mxu1 %v6288_v56  ;;  %4222 = vmatprep.subr.bf16.mxu0 %v6293_v27  ;;  %v535_v56 = vmax.f32 %v375_v16, 0.0  ;;  %v7291_v27 = vpack.c.bf16 %v502_v36, %v486_v39  ;;  %v374_v17 = vld [vmem:[%s7000_s22 + $0x4d0] sm:$0xff]  ;;  %v516_v16 = vmax.f32 %v356_v3, 0.0  ;;  %v518_v36 = vmax.f32 %v358_v29, 0.0 }
 0x127   : > { %4305 = vmatprep.subr.bf16.mxu1 %v6296_v30  ;;  %4108 = vmatprep.mubr.bf16.mxu0 %v7276_v47  ;;  %v372_v30 = vld [vmem:[%s7000_s22 + $0x4c0] sm:$0xff]  ;;  %8165 = vst [vmem:[#allocation41_spill] sm:$0xff] %v7296_v54 }
 0x128   : > { %4191 = vmatprep.mubr.bf16.mxu1 %v7278_v2  ;;  %8164 = vst [vmem:[#allocation40_spill] sm:$0xff] %v7291_v27  ;;  %v6305_v2 = vld [vmem:[#allocation4 + $0xc04] ss:$16 sps:$4 sm:$0xff]   ;;  %v6303_v47 = vld [vmem:[#allocation4 + $0xc00] ss:$16 sps:$4 sm:$0xff]   ;;  %v7298_v32 = vpack.c.bf16 %v535_v56, %v519_v13  ;;  %v532_v39 = vmax.f32 %v372_v30, 0.0 }
 0x129   : > { %4223 = vmatpush1.bf16.msra.mxu0 %v6291_v15  ;;  %v534_v15 = vmax.f32 %v374_v17, 0.0  ;;  %v6314_v44 = vld [vmem:[#allocation4 + $0xfe4] ss:$16 sps:$4 sm:$0xff]   ;;  %v411_v56 = vmax.f32 %v251_v6, 0.0  ;;  %v6309_v30 = vld [vmem:[#allocation4 + $0xde0] ss:$16 sps:$4 sm:$0xff]  }
 0x12a   : > { %4306 = vmatpush1.bf16.msra.mxu1 %v6294_v10  ;;  %4224 = vmatprep.subr.bf16.mxu0 %v6299_v48  ;;  %8166 = vst [vmem:[#allocation42_spill] sm:$0xff] %v7298_v32  ;;  %v249_v10 = vld [vmem:[%s7000_s22 + $0xe8] sm:$0xff]  ;;  %v235_v48 = vld [vmem:[%s7000_s22 + $0x78] sm:$0xff]  ;;  %v7308_v29 = vpack.c.bf16 %v532_v39, %v516_v16  ;;  %v6315_v6 = vld [vmem:[#allocation4 + $0xdc0] ss:$16 sps:$4 sm:$0xff]  }
 0x12b   : > { %4307 = vmatprep.subr.bf16.mxu1 %v6302_v49  ;;  %v6306_v49 = vld [vmem:[#allocation4 + $0xe00] ss:$16 sps:$4 sm:$0xff]   ;;  %v409_v3 = vmax.f32 %v249_v10, 0.0  ;;  %v395_v13 = vmax.f32 %v235_v48, 0.0  ;;  %v7310_v17 = vpack.c.bf16 %v534_v15, %v518_v36  ;;  %v6323_v31 = vld [vmem:[#allocation4 + $0xda4] ss:$16 sps:$4 sm:$0xff]  }
 0x12c   : > { %4109 = vmatmul.mubr.bf16.gmra.mxu0 %v7289_v33  ;;  %8167 = vst [vmem:[#allocation43_spill] sm:$0xff] %v7308_v29  ;;  %v6318_v16 = vld [vmem:[#allocation4 + $0xfc0] ss:$16 sps:$4 sm:$0xff]   ;;  %v6329_v36 = vld [vmem:[#allocation4 + $0xd84] ss:$16 sps:$4 sm:$0xff]  }
 0x12d   : > { %4192 = vmatmul.mubr.bf16.gmra.mxu1 %v7291_v27  ;;  %4225 = vmatpush1.bf16.msra.mxu0 %v6297_v61  ;;  %8168 = vst [vmem:[#allocation44_spill] sm:$0xff] %v7310_v17  ;;  %v6312_v61 = vld [vmem:[#allocation4 + $0xfe0] ss:$16 sps:$4 sm:$0xff]   ;;  %v6332_v15 = vld [vmem:[#allocation4 + $0xf84] ss:$16 sps:$4 sm:$0xff]  }
 0x12e   : > { %4308 = vmatpush1.bf16.msra.mxu1 %v6300_v55  ;;  %4226 = vmatprep.subr.bf16.mxu0 %v6305_v2  ;;  %v6317_v55 = vld [vmem:[#allocation4 + $0xdc4] ss:$16 sps:$4 sm:$0xff]   ;;  %v6324_v39 = vld [vmem:[#allocation4 + $0xfa0] ss:$16 sps:$4 sm:$0xff]  }
 0x12f   : > { %4309 = vmatprep.subr.bf16.mxu1 %v6308_v14  ;;  %4118 = vmatprep.mubr.bf16.mxu0 %v7296_v54  ;;  %v6320_v2 = vld [vmem:[#allocation4 + $0xfc4] ss:$16 sps:$4 sm:$0xff]   ;;  %v7312_v14 = vpack.c.bf16 %v409_v3, %v393_v1  ;;  %v7314_v54 = vpack.c.bf16 %v411_v56, %v395_v13  ;;  %v6327_v10 = vld [vmem:[#allocation4 + $0xd80] ss:$16 sps:$4 sm:$0xff]  }
 0x130   : > { %4201 = vmatprep.mubr.bf16.mxu1 %v7298_v32  ;;  %v6330_v48 = vld [vmem:[#allocation4 + $0xf80] ss:$16 sps:$4 sm:$0xff]   ;;  %v6341_v13 = vld [vmem:[#allocation4 + $0xd44] ss:$16 sps:$4 sm:$0xff]   ;;  %v6357_v32 = vld [vmem:[#allocation4 + $0xe8] ss:$16 sps:$4 sm:$0xff]  }
 0x131   : > { %4227 = vmatpush1.bf16.msra.mxu0 %v6303_v47  ;;  %8169 = vst [vmem:[#allocation45_spill] sm:$0xff] %v7312_v14  ;;  %8170 = vst [vmem:[#allocation46_spill] sm:$0xff] %v7314_v54  ;;  %v6326_v47 = vld [vmem:[#allocation4 + $0xfa4] ss:$16 sps:$4 sm:$0xff]   ;;  %v6333_v1 = vld [vmem:[#allocation4 + $0xd60] ss:$16 sps:$4 sm:$0xff]  }
 0x132   : > { %4310 = vmatpush1.bf16.msra.mxu1 %v6306_v49  ;;  %4228 = vmatprep.subr.bf16.mxu0 %v6311_v57  ;;  %v6321_v57 = vld [vmem:[#allocation4 + $0xda0] ss:$16 sps:$4 sm:$0xff]   ;;  %v6335_v49 = vld [vmem:[#allocation4 + $0xd64] ss:$16 sps:$4 sm:$0xff]  }
 0x133   : > { %4311 = vmatprep.subr.bf16.mxu1 %v6314_v44  ;;  %v6338_v44 = vld [vmem:[#allocation4 + $0xf64] ss:$16 sps:$4 sm:$0xff]   ;;  %v6336_v3 = vld [vmem:[#allocation4 + $0xf60] ss:$16 sps:$4 sm:$0xff]  }
 0x134   : > { %4119 = vmatmul.mubr.bf16.gmra.mxu0 %v7308_v29  ;;  %v6344_v56 = vld [vmem:[#allocation4 + $0xf44] ss:$16 sps:$4 sm:$0xff]  }
 0x135   : > { %4202 = vmatmul.mubr.bf16.gmra.mxu1 %v7310_v17  ;;  %4229 = vmatpush2.bf16.msra.mxu0 %v6309_v30  ;;  %v1134_v30 = vlaneseq  ;;  %v283_v17 = vld [vmem:[%s7000_s22 + $0x1f8] sm:$0xff] }
 0x136   : > { %4312 = vmatpush2.bf16.msra.mxu1 %v6312_v61  ;;  %4230 = vmatprep.subr.bf16.mxu0 %v6317_v55  ;;  %v6339_v61 = vld [vmem:[#allocation4 + $0xd40] ss:$16 sps:$4 sm:$0xff]  }
 0x137   : > { %4313 = vmatprep.subr.bf16.mxu1 %v6320_v2  ;;  %4244 = vmatprep.mubr.bf16.mxu0 %v7312_v14  ;;  %v6342_v55 = vld [vmem:[#allocation4 + $0xf40] ss:$16 sps:$4 sm:$0xff]   ;;  %v6347_v2 = vld [vmem:[#allocation4 + $0xd24] ss:$16 sps:$4 sm:$0xff]  }
 0x138   : > { %4327 = vmatprep.mubr.bf16.mxu1 %v7314_v54 }
 0x139   : > { %4231 = vmatpush2.bf16.msra.mxu0 %v6315_v6  ;;  %v6350_v6 = vld [vmem:[#allocation4 + $0xf24] ss:$16 sps:$4 sm:$0xff]  }
 0x13a   : > { %4314 = vmatpush2.bf16.msra.mxu1 %v6318_v16  ;;  %4232 = vmatprep.subr.bf16.mxu0 %v6323_v31  ;;  %v6345_v16 = vld [vmem:[#allocation4 + $0xd20] ss:$16 sps:$4 sm:$0xff]  }
 0x13b   : > { %4315 = vmatprep.subr.bf16.mxu1 %v6326_v47  ;;  %v6348_v31 = vld [vmem:[#allocation4 + $0xf20] ss:$16 sps:$4 sm:$0xff]   ;;  %v7320_v47 = vshrl.u32 %v1134_v30, 7 }
 0x13d   : > { %4233 = vmatpush2.bf16.msra.mxu0 %v6321_v57  ;;  %8171 = vst [vmem:[#allocation47_spill] sm:$0xff] %v7320_v47  ;;  %v6353_v57 = vld [vmem:[#allocation4 + $0xd04] ss:$16 sps:$4 sm:$0xff]   ;;  %v1140_v29 = vsub.s32 1, %v7320_v47 }
 0x13e   : > { %4316 = vmatpush2.bf16.msra.mxu1 %v6324_v39  ;;  %4234 = vmatprep.subr.bf16.mxu0 %v6329_v36  ;;  %v6356_v39 = vld [vmem:[#allocation4 + $0xf04] ss:$16 sps:$4 sm:$0xff]  }
 0x13f   : > { %4317 = vmatprep.subr.bf16.mxu1 %v6332_v15  ;;  %v232_v36 = vld [vmem:[%s7000_s22 + $0x60] sm:$0xff] }
 0x140   : > { %v248_v15 = vld [vmem:[%s7000_s22 + $0xe0] sm:$0xff] }
 0x141   : > { %4235 = vmatpush2.bf16.msra.mxu0 %v6327_v10  ;;  %v234_v10 = vld [vmem:[%s7000_s22 + $0x70] sm:$0xff]  ;;  %v408_v30 = vmax.f32 %v248_v15, 0.0  ;;  %v6360_v15 = vld [vmem:[#allocation4 + $0x2e8] ss:$16 sps:$4 sm:$0xff]  }
 0x142   : > { %4318 = vmatpush2.bf16.msra.mxu1 %v6330_v48  ;;  %4236 = vmatprep.subr.bf16.mxu0 %v6335_v49  ;;  %v250_v48 = vld [vmem:[%s7000_s22 + $0xf0] sm:$0xff]  ;;  %v265_v49 = vld [vmem:[%s7000_s22 + $0x168] sm:$0xff]  ;;  %v394_v54 = vmax.f32 %v234_v10, 0.0 }
 0x143   : > { %4319 = vmatprep.subr.bf16.mxu1 %v6338_v44  ;;  %v6351_v44 = vld [vmem:[#allocation4 + $0xd00] ss:$16 sps:$4 sm:$0xff]   ;;  %v410_v14 = vmax.f32 %v250_v48, 0.0 }
 0x144   : > { %v264_v48 = vld [vmem:[%s7000_s22 + $0x160] sm:$0xff] }
 0x145   : > { %4237 = vmatpush2.bf16.msra.mxu0 %v6333_v1  ;;  %v1136_v1 = vsub.s32 0, %v7320_v47  ;;  %v7335_v33 = vpack.c.bf16 %v410_v14, %v394_v54  ;;  %v6365_v47 = vld [vmem:[#allocation4 + $0xcc] ss:$16 sps:$4 sm:$0xff]   ;;  %v424_v14 = vmax.f32 %v264_v48, 0.0 }
 0x146   : > { %4320 = vmatpush2.bf16.msra.mxu1 %v6336_v3  ;;  %4238 = vmatprep.subr.bf16.mxu0 %v6341_v13  ;;  %v392_v3 = vmax.f32 %v232_v36, 0.0  ;;  %v281_v13 = vld [vmem:[%s7000_s22 + $0x1e8] sm:$0xff]  ;;  %v425_v36 = vmax.f32 %v265_v49, 0.0 }
 0x147   : > { %4321 = vmatprep.subr.bf16.mxu1 %v6344_v56  ;;  %v267_v56 = vld [vmem:[%s7000_s22 + $0x178] sm:$0xff]  ;;  %v441_v10 = vmax.f32 %v281_v13, 0.0  ;;  %8173 = vst [vmem:[#allocation49_spill] sm:$0xff] %v7335_v33  ;;  %v297_v13 = vld [vmem:[%s7000_s22 + $0x268] sm:$0xff] }
 0x148   : > { %v7333_v27 = vpack.c.bf16 %v408_v30, %v392_v3  ;;  %v6363_v3 = vld [vmem:[#allocation4 + $0xc8] ss:$16 sps:$4 sm:$0xff]  }
 0x149   : > { %4239 = vmatpush2.bf16.msra.mxu0 %v6339_v61  ;;  %v6354_v61 = vld [vmem:[#allocation4 + $0xf00] ss:$16 sps:$4 sm:$0xff]   ;;  %v7346_v54 = vpack.c.bf16 %v441_v10, %v425_v36  ;;  %v6371_v36 = vld [vmem:[#allocation4 + $0xac] ss:$16 sps:$4 sm:$0xff]  }
 0x14a   : > { %4322 = vmatpush2.bf16.msra.mxu1 %v6342_v55  ;;  %4240 = vmatprep.subr.bf16.mxu0 %v6347_v2  ;;  %v1132_v55 = vld [vmem:[#allocation6] sm:$0xf]  ;;  %v6359_v2 = vld [vmem:[#allocation4 + $0xec] ss:$16 sps:$4 sm:$0xff]   ;;  %8172 = vst [vmem:[#allocation48_spill] sm:$0xff] %v7333_v27 }
 0x14b   : > { %4323 = vmatprep.subr.bf16.mxu1 %v6350_v6  ;;  %v6362_v6 = vld [vmem:[#allocation4 + $0x2ec] ss:$16 sps:$4 sm:$0xff]   ;;  %v7338_v49 = vrot.slane %v1132_v55, %v1136_v1  ;;  %8174 = vst [vmem:[#allocation50_spill] sm:$0xff] %v7346_v54 }
 0x14d   : > { %4241 = vmatpush2.bf16.msra.mxu0 %v6345_v16  ;;  %v427_v16 = vmax.f32 %v267_v56, 0.0  ;;  %v313_v56 = vld [vmem:[%s7000_s22 + $0x2e8] sm:$0xff] }
 0x14e   : > { %4324 = vmatpush2.bf16.msra.mxu1 %v6348_v31  ;;  %4242 = vmatprep.subr.bf16.mxu0 %v6353_v57  ;;  %v443_v31 = vmax.f32 %v283_v17, 0.0  ;;  %v6368_v57 = vld [vmem:[#allocation4 + $0x2cc] ss:$16 sps:$4 sm:$0xff]   ;;  %v7344_v17 = vrot.slane %v1132_v55, %v1140_v29  ;;  %v6366_v55 = vld [vmem:[#allocation4 + $0x2c8] ss:$16 sps:$4 sm:$0xff]  }
 0x14f   : > { %4325 = vmatprep.subr.bf16.mxu1 %v6356_v39  ;;  %v280_v39 = vld [vmem:[%s7000_s22 + $0x1e0] sm:$0xff] }
 0x150   : > { %v7348_v30 = vpack.c.bf16 %v443_v31, %v427_v16  ;;  %v440_v1 = vmax.f32 %v280_v39, 0.0  ;;  %v6374_v16 = vld [vmem:[#allocation4 + $0x2ac] ss:$16 sps:$4 sm:$0xff]   ;;  %v457_v31 = vmax.f32 %v297_v13, 0.0  ;;  %v459_v39 = vmax.f32 %v299_v63, 0.0  ;;  %v298_v63 = vld [vmem:[%s7000_s22 + $0x270] sm:$0xff] }
 0x151   : > { %4243 = vmatpush2.bf16.msra.mxu0 %v6351_v44 }
 0x152   : > { %4326 = vmatpush2.bf16.msra.mxu1 %v6354_v61  ;;  %4378 = vmatprep.subr.bf16.mxu0 %v6359_v2  ;;  %8175 = vst [vmem:[#allocation51_spill] sm:$0xff] %v7348_v30  ;;  %v426_v2 = vmax.f32 %v266_v12, 0.0  ;;  %v6369_v12 = vld [vmem:[#allocation4 + $0xa8] ss:$16 sps:$4 sm:$0xff]   ;;  %v7361_v13 = vpack.c.bf16 %v440_v1, %v424_v14 }
 0x153   : > { %4461 = vmatprep.subr.bf16.mxu1 %v6362_v6  ;;  %v442_v6 = vmax.f32 %v282_v0, 0.0  ;;  %v329_v14 = vld [vmem:[%s7000_s22 + $0x368] sm:$0xff] }
 0x154   : > { %v3748_v44 = vpop.f32.mrf.mxu0  ;;  %4245 = vmatmul.mubr.bf16.vlgmr.msra.gmra.mxu0 %v7333_v27  ;;  %v473_v27 = vmax.f32 %v313_v56, 0.0  ;;  %8176 = vst [vmem:[#allocation52_spill] sm:$0xff] %v7361_v13  ;;  %v345_v1 = vld [vmem:[%s7000_s22 + $0x3e8] sm:$0xff] }
 0x155   : > { %v3831_v61 = vpop.f32.mrf.mxu1  ;;  %4328 = vmatmul.mubr.bf16.vlgmr.msra.gmra.mxu1 %v7335_v33  ;;  %v3749_v29 = vadd.f32 %v3748_v44, %v7338_v49  ;;  %4379 = vmatpush1.bf16.msra.mxu0 %v6357_v32  ;;  %v6372_v32 = vld [vmem:[#allocation4 + $0x2a8] ss:$16 sps:$4 sm:$0xff]   ;;  %v7363_v56 = vpack.c.bf16 %v442_v6, %v426_v2 }
 0x156   : > { %4462 = vmatpush1.bf16.msra.mxu1 %v6360_v15  ;;  %v3750_v10 = vpop.f32.mrf.mxu0  ;;  %4380 = vmatprep.subr.bf16.mxu0 %v6365_v47  ;;  %v296_v15 = vld [vmem:[%s7000_s22 + $0x260] sm:$0xff]  ;;  %v475_v47 = vmax.f32 %v315_v28, 0.0  ;;  %v314_v28 = vld [vmem:[%s7000_s22 + $0x2f0] sm:$0xff]  ;;  %v6375_v6 = vld [vmem:[#allocation4 + $0x88] ss:$16 sps:$4 sm:$0xff]  }
 0x157   : > { %v3833_v48 = vpop.f32.mrf.mxu1  ;;  %4463 = vmatprep.subr.bf16.mxu1 %v6368_v57  ;;  %v7355_v33 = vadd.f32 %v3831_v61, %v3749_v29  ;;  %v3751_v0 = vadd.f32 %v3750_v10, %v7344_v17  ;;  %4254 = vmatprep.mubr.bf16.mxu0 %v7346_v54  ;;  %8177 = vst [vmem:[#allocation53_spill] sm:$0xff] %v7363_v56  ;;  %v6377_v61 = vld [vmem:[#allocation4 + $0x8c] ss:$16 sps:$4 sm:$0xff]   ;;  %v312_v10 = vld [vmem:[%s7000_s22 + $0x2e0] sm:$0xff] }
 0x158   : > { %4337 = vmatprep.mubr.bf16.mxu1 %v7348_v30  ;;  %v3752_v57 = vpop.f32.mrf.mxu0  ;;  %v6380_v29 = vld [vmem:[#allocation4 + $0x28c] ss:$16 sps:$4 sm:$0xff]  }
 0x159   : > { %v3835_v44 = vpop.f32.mrf.mxu1  ;;  %v7366_v54 = vadd.f32 %v3833_v48, %v3751_v0  ;;  %v3753_v21 = vadd.f32 %v3752_v57, %v7338_v49  ;;  %4381 = vmatpush1.bf16.msra.mxu0 %v6363_v3  ;;  %v7379_v48 = vpack.c.bf16 %v473_v27, %v457_v31  ;;  %v456_v0 = vmax.f32 %v296_v15, 0.0  ;;  %v331_v3 = vld [vmem:[%s7000_s22 + $0x378] sm:$0xff] }
 0x15a   : > { %4464 = vmatpush1.bf16.msra.mxu1 %v6366_v55  ;;  %v7371_v30 = vpop.f32.mrf.mxu0  ;;  %4382 = vmatprep.subr.bf16.mxu0 %v6371_v36  ;;  %v7381_v57 = vpack.c.bf16 %v475_v47, %v459_v39  ;;  %v472_v55 = vmax.f32 %v312_v10, 0.0  ;;  %v347_v36 = vld [vmem:[%s7000_s22 + $0x3f8] sm:$0xff]  ;;  %v489_v39 = vmax.f32 %v329_v14, 0.0  ;;  %v505_v47 = vmax.f32 %v345_v1, 0.0 }
 0x15b   : > { %8178 = vst [vmem:[#allocation54_spill] sm:$0xff] %v7371_v30  ;;  %v7373_v8 = vpop.f32.mrf.mxu1  ;;  %4465 = vmatprep.subr.bf16.mxu1 %v6374_v16  ;;  %v7377_v2 = vadd.f32 %v3835_v44, %v3753_v21  ;;  %8180 = vst [vmem:[#allocation56_spill] sm:$0xff] %v7379_v48  ;;  %v474_v30 = vmax.f32 %v314_v28, 0.0  ;;  %v6378_v21 = vld [vmem:[#allocation4 + $0x288] ss:$16 sps:$4 sm:$0xff]  }
 0x15c   : > { %8179 = vst [vmem:[#allocation55_spill] sm:$0xff] %v7373_v8  ;;  %8181 = vst [vmem:[#allocation57_spill] sm:$0xff] %v7381_v57  ;;  %4255 = vmatmul.mubr.bf16.gmra.mxu0 %v7361_v13  ;;  %v458_v8 = vmax.f32 %v298_v63, 0.0  ;;  %v3758_v16 = vpop.f32.mrf.mxu0  ;;  %v6383_v27 = vld [vmem:[#allocation4 + $0x6c] ss:$16 sps:$4 sm:$0xff]   ;;  %v7394_v14 = vpack.c.bf16 %v472_v55, %v456_v0  ;;  %v344_v13 = vld [vmem:[%s7000_s22 + $0x3e0] sm:$0xff] }
 0x15d   : > { %4338 = vmatmul.mubr.bf16.gmra.mxu1 %v7363_v56  ;;  %v3841_v7 = vpop.f32.mrf.mxu1  ;;  %4383 = vmatpush1.bf16.msra.mxu0 %v6369_v12  ;;  %v3759_v31 = vadd.f32 %v3758_v16, %v7338_v49  ;;  %v6386_v15 = vld [vmem:[#allocation4 + $0x26c] ss:$16 sps:$4 sm:$0xff]   ;;  %v6381_v63 = vld [vmem:[#allocation4 + $0x68] ss:$16 sps:$4 sm:$0xff]   ;;  %v328_v12 = vld [vmem:[%s7000_s22 + $0x360] sm:$0xff]  ;;  %v507_v56 = vmax.f32 %v347_v36, 0.0 }
 0x15e   : > { %4466 = vmatpush1.bf16.msra.mxu1 %v6372_v32  ;;  %4384 = vmatprep.subr.bf16.mxu0 %v6377_v61  ;;  %v3760_v44 = vpop.f32.mrf.mxu0  ;;  %v6384_v28 = vld [vmem:[#allocation4 + $0x268] ss:$16 sps:$4 sm:$0xff]   ;;  %v491_v32 = vmax.f32 %v331_v3, 0.0  ;;  %8182 = vst [vmem:[#allocation58_spill] sm:$0xff] %v7394_v14  ;;  %v7396_v1 = vpack.c.bf16 %v474_v30, %v458_v8  ;;  %v6389_v16 = vld [vmem:[#allocation4 + $0x4c] ss:$16 sps:$4 sm:$0xff]  }
 0x15f   : > { %4467 = vmatprep.subr.bf16.mxu1 %v6380_v29  ;;  %v3843_v10 = vpop.f32.mrf.mxu1  ;;  %4264 = vmatprep.mubr.bf16.mxu0 %v7379_v48  ;;  %v3761_v61 = vadd.f32 %v3760_v44, %v7344_v17  ;;  %v7392_v29 = vadd.f32 %v3841_v7, %v3759_v31  ;;  %v6392_v48 = vld [vmem:[#allocation4 + $0x24c] ss:$16 sps:$4 sm:$0xff]   ;;  %v330_v3 = vld [vmem:[%s7000_s22 + $0x370] sm:$0xff]  ;;  %v6387_v31 = vld [vmem:[#allocation4 + $0x48] ss:$16 sps:$4 sm:$0xff]  }
 0x160   : > { %4347 = vmatprep.mubr.bf16.mxu1 %v7381_v57  ;;  %8183 = vst [vmem:[#allocation59_spill] sm:$0xff] %v7396_v1  ;;  %v3762_v37 = vpop.f32.mrf.mxu0  ;;  %v346_v36 = vld [vmem:[%s7000_s22 + $0x3f0] sm:$0xff]  ;;  %v361_v0 = vld [vmem:[%s7000_s22 + $0x468] sm:$0xff]  ;;  %v7410_v57 = vpack.c.bf16 %v505_v47, %v489_v39 }
 0x161   : > { %v3845_v35 = vpop.f32.mrf.mxu1  ;;  %4385 = vmatpush1.bf16.msra.mxu0 %v6375_v6  ;;  %v3763_v44 = vadd.f32 %v3762_v37, %v7338_v49  ;;  %v7402_v7 = vadd.f32 %v3843_v10, %v3761_v61  ;;  %v377_v8 = vld [vmem:[%s7000_s22 + $0x4e8] sm:$0xff]  ;;  %v488_v6 = vmax.f32 %v328_v12, 0.0  ;;  %v363_v37 = vld [vmem:[%s7000_s22 + $0x478] sm:$0xff]  ;;  %v506_v10 = vmax.f32 %v346_v36, 0.0 }
 0x162   : > { %4468 = vmatpush1.bf16.msra.mxu1 %v6378_v21  ;;  %4386 = vmatprep.subr.bf16.mxu0 %v6383_v27  ;;  %v7406_v30 = vpop.f32.mrf.mxu0  ;;  %8186 = vst [vmem:[#allocation62_spill] sm:$0xff] %v7410_v57  ;;  %v7412_v21 = vpack.c.bf16 %v507_v56, %v491_v32  ;;  %v504_v27 = vmax.f32 %v344_v13, 0.0  ;;  %v379_v61 = vld [vmem:[%s7000_s22 + $0x4f8] sm:$0xff]  ;;  %v521_v12 = vmax.f32 %v361_v0, 0.0  ;;  %v537_v32 = vmax.f32 %v377_v8, 0.0  ;;  %v376_v8 = vld [vmem:[%s7000_s22 + $0x4e0] sm:$0xff] }
 0x163   : > { %4469 = vmatprep.subr.bf16.mxu1 %v6386_v15  ;;  %8184 = vst [vmem:[#allocation60_spill] sm:$0xff] %v7406_v30  ;;  %v7408_v55 = vpop.f32.mrf.mxu1  ;;  %v7414_v26 = vadd.f32 %v3845_v35, %v3763_v44  ;;  %v490_v15 = vmax.f32 %v330_v3, 0.0  ;;  %v6390_v39 = vld [vmem:[#allocation4 + $0x248] ss:$16 sps:$4 sm:$0xff]   ;;  %v6395_v47 = vld [vmem:[#allocation4 + $0x2c] ss:$16 sps:$4 sm:$0xff]  }
 0x164   : > { %8185 = vst [vmem:[#allocation61_spill] sm:$0xff] %v7408_v55  ;;  %8187 = vst [vmem:[#allocation63_spill] sm:$0xff] %v7412_v21  ;;  %4265 = vmatmul.mubr.bf16.gmra.mxu0 %v7394_v14  ;;  %v3768_v30 = vpop.f32.mrf.mxu0  ;;  %v6398_v35 = vld [vmem:[#allocation4 + $0x22c] ss:$16 sps:$4 sm:$0xff]   ;;  %v6393_v3 = vld [vmem:[#allocation4 + $0x28] ss:$16 sps:$4 sm:$0xff]  }
 0x165   : > { %4348 = vmatmul.mubr.bf16.gmra.mxu1 %v7396_v1  ;;  %v3851_v25 = vpop.f32.mrf.mxu1  ;;  %4387 = vmatpush1.bf16.msra.mxu0 %v6381_v63  ;;  %v3769_v56 = vadd.f32 %v3768_v30, %v7338_v49  ;;  %v6396_v63 = vld [vmem:[#allocation4 + $0x228] ss:$16 sps:$4 sm:$0xff]   ;;  %v523_v36 = vmax.f32 %v363_v37, 0.0  ;;  %v539_v1 = vmax.f32 %v379_v61, 0.0  ;;  %v7427_v30 = vpack.c.bf16 %v504_v27, %v488_v6  ;;  %v362_v55 = vld [vmem:[%s7000_s22 + $0x470] sm:$0xff] }
 0x166   : > { %4470 = vmatpush1.bf16.msra.mxu1 %v6384_v28  ;;  %4388 = vmatprep.subr.bf16.mxu0 %v6389_v16  ;;  %v3770_v44 = vpop.f32.mrf.mxu0  ;;  %v360_v28 = vld [vmem:[%s7000_s22 + $0x460] sm:$0xff]  ;;  %v7429_v0 = vpack.c.bf16 %v506_v10, %v490_v15  ;;  %v6401_v37 = vld [vmem:[#allocation4 + $0xc] ss:$16 sps:$4 sm:$0xff]   ;;  %v7441_v27 = vpack.c.bf16 %v537_v32, %v521_v12  ;;  %v536_v10 = vmax.f32 %v376_v8, 0.0  ;;  %v6408_v8 = vld [vmem:[#allocation4 + $0x3e8] ss:$16 sps:$4 sm:$0xff]  }
 0x167   : > { %4471 = vmatprep.subr.bf16.mxu1 %v6392_v48  ;;  %v3853_v13 = vpop.f32.mrf.mxu1  ;;  %4274 = vmatprep.mubr.bf16.mxu0 %v7410_v57  ;;  %v3771_v16 = vadd.f32 %v3770_v44, %v7344_v17  ;;  %v7425_v48 = vadd.f32 %v3851_v25, %v3769_v56  ;;  %8188 = vst [vmem:[#allocation64_spill] sm:$0xff] %v7427_v30  ;;  %v6404_v25 = vld [vmem:[#allocation4 + $0x20c] ss:$16 sps:$4 sm:$0xff]   ;;  %v6399_v44 = vld [vmem:[#allocation4 + $0x8] ss:$16 sps:$4 sm:$0xff]  }
 0x168   : > { %4357 = vmatprep.mubr.bf16.mxu1 %v7412_v21  ;;  %8189 = vst [vmem:[#allocation65_spill] sm:$0xff] %v7429_v0  ;;  %v3772_v14 = vpop.f32.mrf.mxu0  ;;  %8190 = vst [vmem:[#allocation66_spill] sm:$0xff] %v7441_v27  ;;  %v7443_v15 = vpack.c.bf16 %v539_v1, %v523_v36  ;;  %v6410_v1 = vld [vmem:[#allocation4 + $0x3ec] ss:$16 sps:$4 sm:$0xff]  }
 0x169   : > { %v3855_v57 = vpop.f32.mrf.mxu1  ;;  %4389 = vmatpush1.bf16.msra.mxu0 %v6387_v31  ;;  %v3773_v21 = vadd.f32 %v3772_v14, %v7338_v49  ;;  %v7435_v60 = vadd.f32 %v3853_v13, %v3771_v16  ;;  %v520_v14 = vmax.f32 %v360_v28, 0.0  ;;  %v6402_v13 = vld [vmem:[#allocation4 + $0x208] ss:$16 sps:$4 sm:$0xff]  }
 0x16a   : > { %4472 = vmatpush1.bf16.msra.mxu1 %v6390_v39  ;;  %4390 = vmatprep.subr.bf16.mxu0 %v6395_v47  ;;  %v7437_v61 = vpop.f32.mrf.mxu0  ;;  %8191 = vst [vmem:[#allocation67_spill] sm:$0xff] %v7443_v15  ;;  %v522_v39 = vmax.f32 %v362_v55, 0.0  ;;  %v538_v47 = vmax.f32 %v378_v62, 0.0  ;;  %v6405_v16 = vld [vmem:[#allocation4 + $0x1e8] ss:$16 sps:$4 sm:$0xff]  }
 0x16b   : > { %4473 = vmatprep.subr.bf16.mxu1 %v6398_v35  ;;  %v7439_v6 = vpop.f32.mrf.mxu1  ;;  %v7445_v31 = vadd.f32 %v3855_v57, %v3773_v21  ;;  %v6407_v57 = vld [vmem:[#allocation4 + $0x1ec] ss:$16 sps:$4 sm:$0xff]  }
 0x16c   : > { %4275 = vmatmul.mubr.bf16.gmra.mxu0 %v7427_v30  ;;  %v3778_v56 = vpop.f32.mrf.mxu0  ;;  %v6614_v30 = vld [vmem:[#allocation4 + $0xbac] ss:$16 sps:$4 sm:$0xff]  }
 0x16d   : > { %4358 = vmatmul.mubr.bf16.gmra.mxu1 %v7429_v0  ;;  %v3861_v35 = vpop.f32.mrf.mxu1  ;;  %4391 = vmatpush1.bf16.msra.mxu0 %v6393_v3  ;;  %v3779_v12 = vadd.f32 %v3778_v56, %v7338_v49  ;;  %v7455_v3 = vpack.c.bf16 %v536_v10, %v520_v14  ;;  %v6413_v56 = vld [vmem:[#allocation4 + $0x1cc] ss:$16 sps:$4 sm:$0xff]  }
 0x16e   : > { %4474 = vmatpush1.bf16.msra.mxu1 %v6396_v63  ;;  %4392 = vmatprep.subr.bf16.mxu0 %v6401_v37  ;;  %v3780_v21 = vpop.f32.mrf.mxu0  ;;  %v7457_v63 = vpack.c.bf16 %v538_v47, %v522_v39  ;;  %v6611_v0 = vld [vmem:[#allocation4 + $0x9ac] ss:$16 sps:$4 sm:$0xff]  }
 0x16f   : > { %4475 = vmatprep.subr.bf16.mxu1 %v6404_v25  ;;  %v3863_v32 = vpop.f32.mrf.mxu1  ;;  %4284 = vmatprep.mubr.bf16.mxu0 %v7441_v27  ;;  %v3781_v62 = vadd.f32 %v3780_v21, %v7344_v17  ;;  %v7453_v55 = vadd.f32 %v3861_v35, %v3779_v12  ;;  %8192 = vst [vmem:[#allocation68_spill] sm:$0xff] %v7455_v3  ;;  %v6416_v21 = vld [vmem:[#allocation4 + $0x3cc] ss:$16 sps:$4 sm:$0xff]  }
 0x170   : > { %4367 = vmatprep.mubr.bf16.mxu1 %v7443_v15  ;;  %8193 = vst [vmem:[#allocation69_spill] sm:$0xff] %v7457_v63  ;;  %v3782_v28 = vpop.f32.mrf.mxu0  ;;  %v6605_v15 = vld [vmem:[#allocation4 + $0x9cc] ss:$16 sps:$4 sm:$0xff]  }
 0x171   : > { %v3865_v36 = vpop.f32.mrf.mxu1  ;;  %4393 = vmatpush1.bf16.msra.mxu0 %v6399_v44  ;;  %v3783_v37 = vadd.f32 %v3782_v28, %v7338_v49  ;;  %v7460_v25 = vadd.f32 %v3863_v32, %v3781_v62  ;;  %v6411_v44 = vld [vmem:[#allocation4 + $0x1c8] ss:$16 sps:$4 sm:$0xff]   ;;  %v6608_v27 = vld [vmem:[#allocation4 + $0xbcc] ss:$16 sps:$4 sm:$0xff]  }
 0x172   : > { %4476 = vmatpush1.bf16.msra.mxu1 %v6402_v13  ;;  %4394 = vmatprep.subr.bf16.mxu0 %v6407_v57  ;;  %v7462_v35 = vpop.f32.mrf.mxu0  ;;  %v6414_v13 = vld [vmem:[#allocation4 + $0x3c8] ss:$16 sps:$4 sm:$0xff]   ;;  %v6419_v57 = vld [vmem:[#allocation4 + $0x1ac] ss:$16 sps:$4 sm:$0xff]  }
 0x173   : > { %4477 = vmatprep.subr.bf16.mxu1 %v6410_v1  ;;  %v7464_v14 = vpop.f32.mrf.mxu1  ;;  %v7466_v10 = vadd.f32 %v3865_v36, %v3783_v37  ;;  %v6422_v1 = vld [vmem:[#allocation4 + $0x3ac] ss:$16 sps:$4 sm:$0xff]   ;;  %v6420_v37 = vld [vmem:[#allocation4 + $0x3a8] ss:$16 sps:$4 sm:$0xff]  }
 0x174   : > { %4285 = vmatmul.mubr.bf16.gmra.mxu0 %v7455_v3  ;;  %v3788_v39 = vpop.f32.mrf.mxu0  ;;  %v6602_v3 = vld [vmem:[#allocation4 + $0xbec] ss:$16 sps:$4 sm:$0xff]  }
 0x175   : > { %4368 = vmatmul.mubr.bf16.gmra.mxu1 %v7457_v63  ;;  %v3871_v47 = vpop.f32.mrf.mxu1  ;;  %4395 = vmatpush2.bf16.msra.mxu0 %v6405_v16  ;;  %v3789_v12 = vadd.f32 %v3788_v39, %v7338_v49  ;;  %v6425_v39 = vld [vmem:[#allocation4 + $0x18c] ss:$16 sps:$4 sm:$0xff]  }
 0x176   : > { %4478 = vmatpush2.bf16.msra.mxu1 %v6408_v8  ;;  %4396 = vmatprep.subr.bf16.mxu0 %v6413_v56  ;;  %v3790_v32 = vpop.f32.mrf.mxu0  ;;  %v6417_v8 = vld [vmem:[#allocation4 + $0x1a8] ss:$16 sps:$4 sm:$0xff]   ;;  %v6428_v63 = vld [vmem:[#allocation4 + $0x38c] ss:$16 sps:$4 sm:$0xff]  }
 0x177   : > { %4479 = vmatprep.subr.bf16.mxu1 %v6416_v21  ;;  %v3873_v62 = vpop.f32.mrf.mxu1  ;;  %v3791_v28 = vadd.f32 %v3790_v32, %v7344_v17  ;;  %v7472_v36 = vadd.f32 %v3871_v47, %v3789_v12  ;;  %4410 = vmatprep.mubr.bf16.mxu0 %v7014_v58  ;;  %v6423_v58 = vld [vmem:[#allocation4 + $0x188] ss:$16 sps:$4 sm:$0xff]  }
 0x178   : > { %4493 = vmatprep.mubr.bf16.mxu1 %v7016_v59  ;;  %v3792_v16 = vpop.f32.mrf.mxu0  ;;  %v6426_v59 = vld [vmem:[#allocation4 + $0x388] ss:$16 sps:$4 sm:$0xff]  }
 0x179   : > { %4397 = vmatpush2.bf16.msra.mxu0 %v6411_v44  ;;  %v3793_v56 = vadd.f32 %v3792_v16, %v7338_v49  ;;  %v7477_v21 = vadd.f32 %v3873_v62, %v3791_v28  ;;  %v3875_v32 = vpop.f32.mrf.mxu1  ;;  %v6431_v44 = vld [vmem:[#allocation4 + $0x16c] ss:$16 sps:$4 sm:$0xff]   ;;  %v6429_v49 = vld [vmem:[#allocation4 + $0x168] ss:$16 sps:$4 sm:$0xff]  }
 0x17a   : > { %4480 = vmatpush2.bf16.msra.mxu1 %v6414_v13  ;;  %4398 = vmatprep.subr.bf16.mxu0 %v6419_v57  ;;  %v6434_v13 = vld [vmem:[#allocation4 + $0x36c] ss:$16 sps:$4 sm:$0xff]   ;;  %v6432_v12 = vld [vmem:[#allocation4 + $0x368] ss:$16 sps:$4 sm:$0xff]  }
 0x17b   : > { %4481 = vmatprep.subr.bf16.mxu1 %v6422_v1  ;;  %v7479_v47 = vadd.f32 %v3875_v32, %v3793_v56  ;;  %v6437_v57 = vld [vmem:[#allocation4 + $0x14c] ss:$16 sps:$4 sm:$0xff]   ;;  %v6435_v62 = vld [vmem:[#allocation4 + $0x148] ss:$16 sps:$4 sm:$0xff]  }
 0x17c   : > { %v6440_v1 = vld [vmem:[#allocation4 + $0x34c] ss:$16 sps:$4 sm:$0xff]   ;;  %v6438_v28 = vld [vmem:[#allocation4 + $0x348] ss:$16 sps:$4 sm:$0xff]  }
 0x17d   : > { %4399 = vmatpush2.bf16.msra.mxu0 %v6417_v8  ;;  %v6443_v16 = vld [vmem:[#allocation4 + $0x12c] ss:$16 sps:$4 sm:$0xff]   ;;  %v6447_v32 = vld [vmem:[#allocation4 + $0x108] ss:$16 sps:$4 sm:$0xff]  }
 0x17e   : > { %4482 = vmatpush2.bf16.msra.mxu1 %v6420_v37  ;;  %4400 = vmatprep.subr.bf16.mxu0 %v6425_v39  ;;  %v6446_v8 = vld [vmem:[#allocation4 + $0x32c] ss:$16 sps:$4 sm:$0xff]   ;;  %v6444_v37 = vld [vmem:[#allocation4 + $0x328] ss:$16 sps:$4 sm:$0xff]  }
 0x17f   : > { %4483 = vmatprep.subr.bf16.mxu1 %v6428_v63  ;;  %v6441_v63 = vld [vmem:[#allocation4 + $0x128] ss:$16 sps:$4 sm:$0xff]   ;;  %v6449_v56 = vld [vmem:[#allocation4 + $0x10c] ss:$16 sps:$4 sm:$0xff]  }
 0x180   : > { %v6452_v39 = vld [vmem:[#allocation4 + $0x30c] ss:$16 sps:$4 sm:$0xff]  }
 0x181   : > { %4401 = vmatpush2.bf16.msra.mxu0 %v6423_v58  ;;  %v6450_v58 = vld [vmem:[#allocation4 + $0x308] ss:$16 sps:$4 sm:$0xff]  }
 0x182   : > { %4484 = vmatpush2.bf16.msra.mxu1 %v6426_v59  ;;  %4402 = vmatprep.subr.bf16.mxu0 %v6431_v44  ;;  %v6455_v59 = vld [vmem:[#allocation4 + $0x4ec] ss:$16 sps:$4 sm:$0xff]  }
 0x183   : > { %4485 = vmatprep.subr.bf16.mxu1 %v6434_v13  ;;  %v6458_v44 = vld [vmem:[#allocation4 + $0x6ec] ss:$16 sps:$4 sm:$0xff]   ;;  %v6453_v13 = vld [vmem:[#allocation4 + $0x4e8] ss:$16 sps:$4 sm:$0xff]  }
 0x185   : > { %4403 = vmatpush2.bf16.msra.mxu0 %v6429_v49  ;;  %v6456_v49 = vld [vmem:[#allocation4 + $0x6e8] ss:$16 sps:$4 sm:$0xff]  }
 0x186   : > { %4486 = vmatpush2.bf16.msra.mxu1 %v6432_v12  ;;  %4404 = vmatprep.subr.bf16.mxu0 %v6437_v57  ;;  %v7481_v12 = vpop.f32.mrf.mxu0  ;;  %v7483_v57 = vpop.f32.mrf.mxu1 }
 0x187   : > { %4487 = vmatprep.subr.bf16.mxu1 %v6440_v1  ;;  %v6461_v1 = vld [vmem:[#allocation4 + $0x4cc] ss:$16 sps:$4 sm:$0xff]  }
 0x189   : > { %4405 = vmatpush2.bf16.msra.mxu0 %v6435_v62  ;;  %v6464_v62 = vld [vmem:[#allocation4 + $0x6cc] ss:$16 sps:$4 sm:$0xff]  }
 0x18a   : > { %4488 = vmatpush2.bf16.msra.mxu1 %v6438_v28  ;;  %4406 = vmatprep.subr.bf16.mxu0 %v6443_v16 }
 0x18b   : > { %4489 = vmatprep.subr.bf16.mxu1 %v6446_v8 }
 0x18d   : > { %4407 = vmatpush2.bf16.msra.mxu0 %v6441_v63  ;;  %v6459_v63 = vld [vmem:[#allocation4 + $0x4c8] ss:$16 sps:$4 sm:$0xff]  }
 0x18e   : > { %4490 = vmatpush2.bf16.msra.mxu1 %v6444_v37  ;;  %4408 = vmatprep.subr.bf16.mxu0 %v6449_v56  ;;  %v6462_v37 = vld [vmem:[#allocation4 + $0x6c8] ss:$16 sps:$4 sm:$0xff]  }
 0x18f   : > { %4491 = vmatprep.subr.bf16.mxu1 %v6452_v39 }
 0x191   : > { %4409 = vmatpush2.bf16.msra.mxu0 %v6447_v32  ;;  %v6467_v32 = vld [vmem:[#allocation4 + $0x4ac] ss:$16 sps:$4 sm:$0xff]  }
 0x192   : > { %4492 = vmatpush2.bf16.msra.mxu1 %v6450_v58  ;;  %4544 = vmatprep.subr.bf16.mxu0 %v6455_v59  ;;  %v6470_v58 = vld [vmem:[#allocation4 + $0x6ac] ss:$16 sps:$4 sm:$0xff]  }
 0x193   : > { %4627 = vmatprep.subr.bf16.mxu1 %v6458_v44 }
 0x194   : > { %v3914_v28 = vpop.f32.mrf.mxu0  ;;  %4411 = vmatmul.mubr.bf16.vlgmr.msra.gmra.mxu0 %v7024_v22 }
 0x195   : > { %v3997_v16 = vpop.f32.mrf.mxu1  ;;  %4494 = vmatmul.mubr.bf16.vlgmr.msra.gmra.mxu1 %v7026_v23  ;;  %v3915_v8 = vadd.f32 %v3914_v28, %v7355_v33  ;;  %4545 = vmatpush1.bf16.msra.mxu0 %v6453_v13 }
 0x196   : > { %4628 = vmatpush1.bf16.msra.mxu1 %v6456_v49  ;;  %v3916_v56 = vpop.f32.mrf.mxu0  ;;  %4546 = vmatprep.subr.bf16.mxu0 %v6461_v1  ;;  %v6465_v49 = vld [vmem:[#allocation4 + $0x4a8] ss:$16 sps:$4 sm:$0xff]  }
 0x197   : > { %v3999_v39 = vpop.f32.mrf.mxu1  ;;  %4629 = vmatprep.subr.bf16.mxu1 %v6464_v62  ;;  %v7488_v59 = vadd.f32 %v3997_v16, %v3915_v8  ;;  %v3917_v44 = vadd.f32 %v3916_v56, %v7366_v54  ;;  %4420 = vmatprep.mubr.bf16.mxu0 %v7036_v38  ;;  %v6468_v1 = vld [vmem:[#allocation4 + $0x6a8] ss:$16 sps:$4 sm:$0xff]   ;;  %v6473_v54 = vld [vmem:[#allocation4 + $0x48c] ss:$16 sps:$4 sm:$0xff]  }
 0x198   : > { %4503 = vmatprep.mubr.bf16.mxu1 %v7038_v43  ;;  %v3918_v22 = vpop.f32.mrf.mxu0  ;;  %v6476_v38 = vld [vmem:[#allocation4 + $0x68c] ss:$16 sps:$4 sm:$0xff]  }
 0x199   : > { %v4001_v23 = vpop.f32.mrf.mxu1  ;;  %v7493_v33 = vadd.f32 %v3999_v39, %v3917_v44  ;;  %v3919_v13 = vadd.f32 %v3918_v22, %v7377_v2  ;;  %4547 = vmatpush1.bf16.msra.mxu0 %v6459_v63  ;;  %v6471_v63 = vld [vmem:[#allocation4 + $0x488] ss:$16 sps:$4 sm:$0xff]  }
 0x19a   : > { %4630 = vmatpush1.bf16.msra.mxu1 %v6462_v37  ;;  %v7496_v62 = vpop.f32.mrf.mxu0  ;;  %4548 = vmatprep.subr.bf16.mxu0 %v6467_v32  ;;  %v6474_v37 = vld [vmem:[#allocation4 + $0x688] ss:$16 sps:$4 sm:$0xff]   ;;  %v6479_v32 = vld [vmem:[#allocation4 + $0x46c] ss:$16 sps:$4 sm:$0xff]  }
 0x19b   : > { %v7498_v28 = vpop.f32.mrf.mxu1  ;;  %4631 = vmatprep.subr.bf16.mxu1 %v6470_v58  ;;  %v7500_v16 = vadd.f32 %v4001_v23, %v3919_v13  ;;  %v6482_v58 = vld [vmem:[#allocation4 + $0x66c] ss:$16 sps:$4 sm:$0xff]   ;;  %v6477_v13 = vld [vmem:[#allocation4 + $0x468] ss:$16 sps:$4 sm:$0xff]  }
 0x19c   : > { %v3924_v43 = vpop.f32.mrf.mxu0  ;;  %4421 = vmatmul.mubr.bf16.gmra.mxu0 %v7044_v52 }
 0x19d   : > { %v4007_v8 = vpop.f32.mrf.mxu1  ;;  %4504 = vmatmul.mubr.bf16.gmra.mxu1 %v7046_v53  ;;  %v3925_v2 = vadd.f32 %v3924_v43, %v7392_v29  ;;  %4549 = vmatpush1.bf16.msra.mxu0 %v6465_v49  ;;  %v6480_v49 = vld [vmem:[#allocation4 + $0x668] ss:$16 sps:$4 sm:$0xff]  }
 0x19e   : > { %4632 = vmatpush1.bf16.msra.mxu1 %v6468_v1  ;;  %v3926_v56 = vpop.f32.mrf.mxu0  ;;  %4550 = vmatprep.subr.bf16.mxu0 %v6473_v54 }
 0x19f   : > { %v4009_v39 = vpop.f32.mrf.mxu1  ;;  %4633 = vmatprep.subr.bf16.mxu1 %v6476_v38  ;;  %v3927_v44 = vadd.f32 %v3926_v56, %v7402_v7  ;;  %v7506_v22 = vadd.f32 %v4007_v8, %v3925_v2  ;;  %4430 = vmatprep.mubr.bf16.mxu0 %v7056_v4  ;;  %v6485_v7 = vld [vmem:[#allocation4 + $0x44c] ss:$16 sps:$4 sm:$0xff]   ;;  %v6483_v8 = vld [vmem:[#allocation4 + $0x448] ss:$16 sps:$4 sm:$0xff]  }
 0x1a0   : > { %4513 = vmatprep.mubr.bf16.mxu1 %v7058_v9  ;;  %v3928_v52 = vpop.f32.mrf.mxu0  ;;  %v6488_v4 = vld [vmem:[#allocation4 + $0x64c] ss:$16 sps:$4 sm:$0xff]   ;;  %v6486_v2 = vld [vmem:[#allocation4 + $0x648] ss:$16 sps:$4 sm:$0xff]  }
 0x1a1   : > { %v4011_v53 = vpop.f32.mrf.mxu1  ;;  %v3929_v29 = vadd.f32 %v3928_v52, %v7414_v26  ;;  %v7511_v23 = vadd.f32 %v4009_v39, %v3927_v44  ;;  %4551 = vmatpush1.bf16.msra.mxu0 %v6471_v63  ;;  %v6491_v56 = vld [vmem:[#allocation4 + $0x42c] ss:$16 sps:$4 sm:$0xff]   ;;  %v6489_v52 = vld [vmem:[#allocation4 + $0x428] ss:$16 sps:$4 sm:$0xff]  }
 0x1a2   : > { %4634 = vmatpush1.bf16.msra.mxu1 %v6474_v37  ;;  %v7513_v1 = vpop.f32.mrf.mxu0  ;;  %4552 = vmatprep.subr.bf16.mxu0 %v6479_v32  ;;  %v6494_v39 = vld [vmem:[#allocation4 + $0x62c] ss:$16 sps:$4 sm:$0xff]  }
 0x1a3   : > { %v7515_v54 = vpop.f32.mrf.mxu1  ;;  %4635 = vmatprep.subr.bf16.mxu1 %v6482_v58  ;;  %v7517_v38 = vadd.f32 %v4011_v53, %v3929_v29  ;;  %v6492_v53 = vld [vmem:[#allocation4 + $0x628] ss:$16 sps:$4 sm:$0xff]  }
 0x1a4   : > { %v3934_v9 = vpop.f32.mrf.mxu0  ;;  %4431 = vmatmul.mubr.bf16.gmra.mxu0 %v7064_v18 }
 0x1a5   : > { %v4017_v43 = vpop.f32.mrf.mxu1  ;;  %4514 = vmatmul.mubr.bf16.gmra.mxu1 %v7066_v19  ;;  %v3935_v26 = vadd.f32 %v3934_v9, %v7425_v48  ;;  %4553 = vmatpush1.bf16.msra.mxu0 %v6477_v13  ;;  %v6498_v9 = vld [vmem:[#allocation4 + $0x608] ss:$16 sps:$4 sm:$0xff]  }
 0x1a6   : > { %4636 = vmatpush1.bf16.msra.mxu1 %v6480_v49  ;;  %v3936_v63 = vpop.f32.mrf.mxu0  ;;  %4554 = vmatprep.subr.bf16.mxu0 %v6485_v7 }
 0x1a7   : > { %v4019_v37 = vpop.f32.mrf.mxu1  ;;  %4637 = vmatprep.subr.bf16.mxu1 %v6488_v4  ;;  %v3937_v32 = vadd.f32 %v3936_v63, %v7435_v60  ;;  %v7523_v58 = vadd.f32 %v4017_v43, %v3935_v26  ;;  %4440 = vmatprep.mubr.bf16.mxu0 %v7076_v34  ;;  %v6497_v60 = vld [vmem:[#allocation4 + $0x40c] ss:$16 sps:$4 sm:$0xff]   ;;  %v6495_v4 = vld [vmem:[#allocation4 + $0x408] ss:$16 sps:$4 sm:$0xff]  }
 0x1a8   : > { %4523 = vmatprep.mubr.bf16.mxu1 %v7078_v40  ;;  %v3938_v18 = vpop.f32.mrf.mxu0  ;;  %v6500_v34 = vld [vmem:[#allocation4 + $0x60c] ss:$16 sps:$4 sm:$0xff]  }
 0x1a9   : > { %v4021_v19 = vpop.f32.mrf.mxu1  ;;  %v3939_v48 = vadd.f32 %v3938_v18, %v7445_v31  ;;  %v7528_v44 = vadd.f32 %v4019_v37, %v3937_v32  ;;  %4555 = vmatpush1.bf16.msra.mxu0 %v6483_v8  ;;  %v6503_v8 = vld [vmem:[#allocation4 + $0x5ec] ss:$16 sps:$4 sm:$0xff]   ;;  %v6504_v32 = vld [vmem:[#allocation4 + $0x7e8] ss:$16 sps:$4 sm:$0xff]  }
 0x1aa   : > { %4638 = vmatpush1.bf16.msra.mxu1 %v6486_v2  ;;  %v7530_v29 = vpop.f32.mrf.mxu0  ;;  %4556 = vmatprep.subr.bf16.mxu0 %v6491_v56  ;;  %v6506_v2 = vld [vmem:[#allocation4 + $0x7ec] ss:$16 sps:$4 sm:$0xff]  }
 0x1ab   : > { %v7532_v13 = vpop.f32.mrf.mxu1  ;;  %4639 = vmatprep.subr.bf16.mxu1 %v6494_v39  ;;  %v7534_v49 = vadd.f32 %v4021_v19, %v3939_v48  ;;  %v6501_v39 = vld [vmem:[#allocation4 + $0x5e8] ss:$16 sps:$4 sm:$0xff]  }
 0x1ac   : > { %v3944_v40 = vpop.f32.mrf.mxu0  ;;  %4441 = vmatmul.mubr.bf16.gmra.mxu0 %v7084_v50 }
 0x1ad   : > { %v4027_v7 = vpop.f32.mrf.mxu1  ;;  %4524 = vmatmul.mubr.bf16.gmra.mxu1 %v7086_v51  ;;  %v3945_v31 = vadd.f32 %v3944_v40, %v7453_v55  ;;  %4557 = vmatpush1.bf16.msra.mxu0 %v6489_v52 }
 0x1ae   : > { %4640 = vmatpush1.bf16.msra.mxu1 %v6492_v53  ;;  %v3946_v43 = vpop.f32.mrf.mxu0  ;;  %4558 = vmatprep.subr.bf16.mxu0 %v6497_v60  ;;  %v6507_v53 = vld [vmem:[#allocation4 + $0x5c8] ss:$16 sps:$4 sm:$0xff]  }
 0x1af   : > { %v4029_v26 = vpop.f32.mrf.mxu1  ;;  %4641 = vmatprep.subr.bf16.mxu1 %v6500_v34  ;;  %v3947_v63 = vadd.f32 %v3946_v43, %v7460_v25  ;;  %v7540_v37 = vadd.f32 %v4027_v7, %v3945_v31  ;;  %4450 = vmatprep.mubr.bf16.mxu0 %v7096_v5  ;;  %v6509_v25 = vld [vmem:[#allocation4 + $0x5cc] ss:$16 sps:$4 sm:$0xff]   ;;  %v6510_v60 = vld [vmem:[#allocation4 + $0x7c8] ss:$16 sps:$4 sm:$0xff]  }
 0x1b0   : > { %4533 = vmatprep.mubr.bf16.mxu1 %v7098_v11  ;;  %v3948_v50 = vpop.f32.mrf.mxu0  ;;  %v6512_v5 = vld [vmem:[#allocation4 + $0x7cc] ss:$16 sps:$4 sm:$0xff]  }
 0x1b1   : > { %v4031_v51 = vpop.f32.mrf.mxu1  ;;  %v3949_v55 = vadd.f32 %v3948_v50, %v7466_v10  ;;  %v7545_v56 = vadd.f32 %v4029_v26, %v3947_v63  ;;  %4559 = vmatpush1.bf16.msra.mxu0 %v6495_v4  ;;  %v6515_v7 = vld [vmem:[#allocation4 + $0x5ac] ss:$16 sps:$4 sm:$0xff]   ;;  %v6513_v26 = vld [vmem:[#allocation4 + $0x5a8] ss:$16 sps:$4 sm:$0xff]  }
 0x1b2   : > { %4642 = vmatpush1.bf16.msra.mxu1 %v6498_v9  ;;  %v7547_v18 = vpop.f32.mrf.mxu0  ;;  %4560 = vmatprep.subr.bf16.mxu0 %v6503_v8  ;;  %v6518_v31 = vld [vmem:[#allocation4 + $0x7ac] ss:$16 sps:$4 sm:$0xff]   ;;  %v6516_v8 = vld [vmem:[#allocation4 + $0x7a8] ss:$16 sps:$4 sm:$0xff]  }
 0x1b3   : > { %v7549_v19 = vpop.f32.mrf.mxu1  ;;  %4643 = vmatprep.subr.bf16.mxu1 %v6506_v2  ;;  %v7551_v48 = vadd.f32 %v4031_v51, %v3949_v55  ;;  %v6521_v2 = vld [vmem:[#allocation4 + $0x58c] ss:$16 sps:$4 sm:$0xff]   ;;  %v6525_v51 = vld [vmem:[#allocation4 + $0x568] ss:$16 sps:$4 sm:$0xff]  }
 0x1b4   : > { %v3954_v11 = vpop.f32.mrf.mxu0  ;;  %4451 = vmatmul.mubr.bf16.gmra.mxu0 %v7104_v20  ;;  %v6527_v50 = vld [vmem:[#allocation4 + $0x56c] ss:$16 sps:$4 sm:$0xff]   ;;  %v6528_v55 = vld [vmem:[#allocation4 + $0x768] ss:$16 sps:$4 sm:$0xff]  }
 0x1b5   : > { %8194 = vst [vmem:[#allocation70_spill] sm:$0xff] %v7551_v48  ;;  %v4037_v52 = vpop.f32.mrf.mxu1  ;;  %4534 = vmatmul.mubr.bf16.gmra.mxu1 %v7106_v24  ;;  %v3955_v10 = vadd.f32 %v3954_v11, %v7472_v36  ;;  %4561 = vmatpush2.bf16.msra.mxu0 %v6501_v39  ;;  %v6533_v39 = vld [vmem:[#allocation4 + $0x54c] ss:$16 sps:$4 sm:$0xff]  }
 0x1b6   : > { %4644 = vmatpush2.bf16.msra.mxu1 %v6504_v32  ;;  %v3956_v34 = vpop.f32.mrf.mxu0  ;;  %4562 = vmatprep.subr.bf16.mxu0 %v6509_v25  ;;  %v6536_v32 = vld [vmem:[#allocation4 + $0x74c] ss:$16 sps:$4 sm:$0xff]   ;;  %v6531_v25 = vld [vmem:[#allocation4 + $0x548] ss:$16 sps:$4 sm:$0xff]  }
 0x1b7   : > { %v4039_v40 = vpop.f32.mrf.mxu1  ;;  %4645 = vmatprep.subr.bf16.mxu1 %v6512_v5  ;;  %v3957_v4 = vadd.f32 %v3956_v34, %v7477_v21  ;;  %v7557_v9 = vadd.f32 %v4037_v52, %v3955_v10  ;;  %4576 = vmatprep.mubr.bf16.mxu0 %v7114_v41  ;;  %v6524_v21 = vld [vmem:[#allocation4 + $0x78c] ss:$16 sps:$4 sm:$0xff]   ;;  %v6519_v41 = vld [vmem:[#allocation4 + $0x588] ss:$16 sps:$4 sm:$0xff]  }
 0x1b8   : > { %4659 = vmatprep.mubr.bf16.mxu1 %v7116_v42  ;;  %v3958_v20 = vpop.f32.mrf.mxu0  ;;  %v6522_v42 = vld [vmem:[#allocation4 + $0x788] ss:$16 sps:$4 sm:$0xff]   ;;  %v6539_v11 = vld [vmem:[#allocation4 + $0x52c] ss:$16 sps:$4 sm:$0xff]  }
 0x1b9   : > { %8195 = vst [vmem:[#allocation71_spill] sm:$0xff] %v7557_v9  ;;  %v4041_v24 = vpop.f32.mrf.mxu1  ;;  %v3959_v36 = vadd.f32 %v3958_v20, %v7479_v47  ;;  %v7562_v43 = vadd.f32 %v4039_v40, %v3957_v4  ;;  %4563 = vmatpush2.bf16.msra.mxu0 %v6507_v53  ;;  %v6530_v47 = vld [vmem:[#allocation4 + $0x76c] ss:$16 sps:$4 sm:$0xff]   ;;  %v6534_v5 = vld [vmem:[#allocation4 + $0x748] ss:$16 sps:$4 sm:$0xff]  }
 0x1ba   : > { %4646 = vmatpush2.bf16.msra.mxu1 %v6510_v60  ;;  %4564 = vmatprep.subr.bf16.mxu0 %v6515_v7  ;;  %v6542_v52 = vld [vmem:[#allocation4 + $0x72c] ss:$16 sps:$4 sm:$0xff]   ;;  %v6537_v10 = vld [vmem:[#allocation4 + $0x528] ss:$16 sps:$4 sm:$0xff]  }
 0x1bb   : > { %8196 = vst [vmem:[#allocation72_spill] sm:$0xff] %v7562_v43  ;;  %4647 = vmatprep.subr.bf16.mxu1 %v6518_v31  ;;  %v7564_v63 = vadd.f32 %v4041_v24, %v3959_v36  ;;  %v6540_v53 = vld [vmem:[#allocation4 + $0x728] ss:$16 sps:$4 sm:$0xff]   ;;  %v6545_v60 = vld [vmem:[#allocation4 + $0x50c] ss:$16 sps:$4 sm:$0xff]   ;;  %v7566_v36 = vpop.f32.mrf.mxu0 }
 0x1bc   : > { %v6548_v34 = vld [vmem:[#allocation4 + $0x70c] ss:$16 sps:$4 sm:$0xff]   ;;  %v6543_v40 = vld [vmem:[#allocation4 + $0x508] ss:$16 sps:$4 sm:$0xff]  }
 0x1bd   : > { %8197 = vst [vmem:[#allocation73_spill] sm:$0xff] %v7564_v63  ;;  %4565 = vmatpush2.bf16.msra.mxu0 %v6513_v26  ;;  %v6546_v7 = vld [vmem:[#allocation4 + $0x708] ss:$16 sps:$4 sm:$0xff]   ;;  %v6551_v31 = vld [vmem:[#allocation4 + $0x8ec] ss:$16 sps:$4 sm:$0xff]   ;;  %v7568_v26 = vpop.f32.mrf.mxu1 }
 0x1be   : > { %4648 = vmatpush2.bf16.msra.mxu1 %v6516_v8  ;;  %4566 = vmatprep.subr.bf16.mxu0 %v6521_v2  ;;  %v6554_v4 = vld [vmem:[#allocation4 + $0xaec] ss:$16 sps:$4 sm:$0xff]   ;;  %v6549_v20 = vld [vmem:[#allocation4 + $0x8e8] ss:$16 sps:$4 sm:$0xff]  }
 0x1bf   : > { %4649 = vmatprep.subr.bf16.mxu1 %v6524_v21  ;;  %v6552_v24 = vld [vmem:[#allocation4 + $0xae8] ss:$16 sps:$4 sm:$0xff]   ;;  %v6557_v8 = vld [vmem:[#allocation4 + $0x8cc] ss:$16 sps:$4 sm:$0xff]  }
 0x1c0   : > { %v6560_v2 = vld [vmem:[#allocation4 + $0xacc] ss:$16 sps:$4 sm:$0xff]  }
 0x1c1   : > { %4567 = vmatpush2.bf16.msra.mxu0 %v6519_v41  ;;  %v6617_v63 = vld [vmem:[#allocation4 + $0x98c] ss:$16 sps:$4 sm:$0xff]  }
 0x1c2   : > { %4650 = vmatpush2.bf16.msra.mxu1 %v6522_v42  ;;  %4568 = vmatprep.subr.bf16.mxu0 %v6527_v50  ;;  %v6555_v50 = vld [vmem:[#allocation4 + $0x8c8] ss:$16 sps:$4 sm:$0xff]   ;;  %v6620_v43 = vld [vmem:[#allocation4 + $0xb8c] ss:$16 sps:$4 sm:$0xff]  }
 0x1c3   : > { %4651 = vmatprep.subr.bf16.mxu1 %v6530_v47  ;;  %v6558_v47 = vld [vmem:[#allocation4 + $0xac8] ss:$16 sps:$4 sm:$0xff]  }
 0x1c5   : > { %4569 = vmatpush2.bf16.msra.mxu0 %v6525_v51 }
 0x1c6   : > { %4652 = vmatpush2.bf16.msra.mxu1 %v6528_v55  ;;  %4570 = vmatprep.subr.bf16.mxu0 %v6533_v39  ;;  %v6563_v39 = vld [vmem:[#allocation4 + $0x8ac] ss:$16 sps:$4 sm:$0xff]  }
 0x1c7   : > { %4653 = vmatprep.subr.bf16.mxu1 %v6536_v32  ;;  %v6566_v32 = vld [vmem:[#allocation4 + $0xaac] ss:$16 sps:$4 sm:$0xff]  }
 0x1c9   : > { %4571 = vmatpush2.bf16.msra.mxu0 %v6531_v25 }
 0x1ca   : > { %4654 = vmatpush2.bf16.msra.mxu1 %v6534_v5  ;;  %4572 = vmatprep.subr.bf16.mxu0 %v6539_v11  ;;  %v8198_v11 = vld [vmem:[#allocation9_spill] sm:$0xff] }
 0x1cb   : > { %4655 = vmatprep.subr.bf16.mxu1 %v6542_v52 }
 0x1cd   : > { %4573 = vmatpush2.bf16.msra.mxu0 %v6537_v10 }
 0x1ce   : > { %4656 = vmatpush2.bf16.msra.mxu1 %v6540_v53  ;;  %4574 = vmatprep.subr.bf16.mxu0 %v6545_v60  ;;  %v6561_v53 = vld [vmem:[#allocation4 + $0x8a8] ss:$16 sps:$4 sm:$0xff]  }
 0x1cf   : > { %4657 = vmatprep.subr.bf16.mxu1 %v6548_v34  ;;  %v6564_v60 = vld [vmem:[#allocation4 + $0xaa8] ss:$16 sps:$4 sm:$0xff]  }
 0x1d1   : > { %4575 = vmatpush2.bf16.msra.mxu0 %v6543_v40 }
 0x1d2   : > { %4658 = vmatpush2.bf16.msra.mxu1 %v6546_v7  ;;  %4710 = vmatprep.subr.bf16.mxu0 %v6551_v31  ;;  %v6572_v7 = vld [vmem:[#allocation4 + $0xa8c] ss:$16 sps:$4 sm:$0xff]  }
 0x1d3   : > { %4793 = vmatprep.subr.bf16.mxu1 %v6554_v4 }
 0x1d4   : > { %v4080_v21 = vpop.f32.mrf.mxu0  ;;  %4577 = vmatmul.mubr.bf16.vlgmr.msra.gmra.mxu0 %v7129_v45  ;;  %v8199_v45 = vld [vmem:[#allocation10_spill] sm:$0xff] }
 0x1d5   : > { %v4163_v41 = vpop.f32.mrf.mxu1  ;;  %4660 = vmatmul.mubr.bf16.vlgmr.msra.gmra.mxu1 %v7131_v46  ;;  %v4081_v42 = vadd.f32 %v4080_v21, %v7488_v59  ;;  %4711 = vmatpush1.bf16.msra.mxu0 %v6549_v20  ;;  %v8200_v20 = vld [vmem:[#allocation11_spill] sm:$0xff] }
 0x1d6   : > { %4794 = vmatpush1.bf16.msra.mxu1 %v6552_v24  ;;  %v4082_v51 = vpop.f32.mrf.mxu0  ;;  %4712 = vmatprep.subr.bf16.mxu0 %v6557_v8  ;;  %v6567_v8 = vld [vmem:[#allocation4 + $0x888] ss:$16 sps:$4 sm:$0xff]  }
 0x1d7   : > { %v4165_v55 = vpop.f32.mrf.mxu1  ;;  %4795 = vmatprep.subr.bf16.mxu1 %v6560_v2  ;;  %v7573_v25 = vadd.f32 %v4163_v41, %v4081_v42  ;;  %v4083_v5 = vadd.f32 %v4082_v51, %v7493_v33  ;;  %4586 = vmatprep.mubr.bf16.mxu0 %v8198_v11  ;;  %v6569_v33 = vld [vmem:[#allocation4 + $0x88c] ss:$16 sps:$4 sm:$0xff]   ;;  %v6570_v2 = vld [vmem:[#allocation4 + $0xa88] ss:$16 sps:$4 sm:$0xff]  }
 0x1d8   : > { %4669 = vmatprep.mubr.bf16.mxu1 %v8199_v45  ;;  %v4084_v46 = vpop.f32.mrf.mxu0  ;;  %v6575_v42 = vld [vmem:[#allocation4 + $0x86c] ss:$16 sps:$4 sm:$0xff]  }
 0x1d9   : > { %v4167_v59 = vpop.f32.mrf.mxu1  ;;  %v7578_v52 = vadd.f32 %v4165_v55, %v4083_v5  ;;  %v4085_v10 = vadd.f32 %v4084_v46, %v7500_v16  ;;  %4713 = vmatpush1.bf16.msra.mxu0 %v6555_v50  ;;  %v8201_v16 = vld [vmem:[#allocation12_spill] sm:$0xff]  ;;  %v8203_v51 = vld [vmem:[#allocation14_spill] sm:$0xff]  ;;  %v6576_v5 = vld [vmem:[#allocation4 + $0xa68] ss:$16 sps:$4 sm:$0xff]  }
 0x1da   : > { %4796 = vmatpush1.bf16.msra.mxu1 %v6558_v47  ;;  %v7581_v34 = vpop.f32.mrf.mxu0  ;;  %4714 = vmatprep.subr.bf16.mxu0 %v6563_v39  ;;  %v6578_v50 = vld [vmem:[#allocation4 + $0xa6c] ss:$16 sps:$4 sm:$0xff]   ;;  %v8202_v47 = vld [vmem:[#allocation13_spill] sm:$0xff] }
 0x1db   : > { %v7583_v40 = vpop.f32.mrf.mxu1  ;;  %4797 = vmatprep.subr.bf16.mxu1 %v6566_v32  ;;  %v7585_v31 = vadd.f32 %v4167_v59, %v4085_v10  ;;  %v6573_v32 = vld [vmem:[#allocation4 + $0x868] ss:$16 sps:$4 sm:$0xff]   ;;  %v6581_v46 = vld [vmem:[#allocation4 + $0x84c] ss:$16 sps:$4 sm:$0xff]  }
 0x1dc   : > { %v7587_v4 = vpop.f32.mrf.mxu0  ;;  %4587 = vmatmul.mubr.bf16.gmra.mxu0 %v8200_v20  ;;  %v6584_v59 = vld [vmem:[#allocation4 + $0xa4c] ss:$16 sps:$4 sm:$0xff]   ;;  %v8204_v10 = vld [vmem:[#allocation15_spill] sm:$0xff] }
 0x1dd   : > { %v7590_v24 = vpop.f32.mrf.mxu1  ;;  %4670 = vmatmul.mubr.bf16.gmra.mxu1 %v8201_v16  ;;  %4715 = vmatpush1.bf16.msra.mxu0 %v6561_v53  ;;  %v8205_v53 = vld [vmem:[#allocation16_spill] sm:$0xff] }
 0x1de   : > { %4798 = vmatpush1.bf16.msra.mxu1 %v6564_v60  ;;  %v7593_v21 = vpop.f32.mrf.mxu0  ;;  %4716 = vmatprep.subr.bf16.mxu0 %v6569_v33  ;;  %v6579_v60 = vld [vmem:[#allocation4 + $0x848] ss:$16 sps:$4 sm:$0xff]   ;;  %v6587_v16 = vld [vmem:[#allocation4 + $0x82c] ss:$16 sps:$4 sm:$0xff]  }
 0x1df   : > { %v7595_v41 = vpop.f32.mrf.mxu1  ;;  %4799 = vmatprep.subr.bf16.mxu1 %v6572_v7  ;;  %4596 = vmatprep.mubr.bf16.mxu0 %v8202_v47  ;;  %v6582_v33 = vld [vmem:[#allocation4 + $0xa48] ss:$16 sps:$4 sm:$0xff]  }
 0x1e0   : > { %4679 = vmatprep.mubr.bf16.mxu1 %v8203_v51  ;;  %v7599_v55 = vpop.f32.mrf.mxu0  ;;  %v6588_v47 = vld [vmem:[#allocation4 + $0xa28] ss:$16 sps:$4 sm:$0xff]  }
 0x1e1   : > { %v7601_v39 = vpop.f32.mrf.mxu1  ;;  %4717 = vmatpush1.bf16.msra.mxu0 %v6567_v8  ;;  %v6590_v8 = vld [vmem:[#allocation4 + $0xa2c] ss:$16 sps:$4 sm:$0xff]  }
 0x1e2   : > { %4800 = vmatpush1.bf16.msra.mxu1 %v6570_v2  ;;  %v7603_v11 = vpop.f32.mrf.mxu0  ;;  %4718 = vmatprep.subr.bf16.mxu0 %v6575_v42  ;;  %v8206_v2 = vld [vmem:[#allocation17_spill] sm:$0xff]  ;;  %v8207_v42 = vld [vmem:[#allocation18_spill] sm:$0xff] }
 0x1e3   : > { %v7605_v45 = vpop.f32.mrf.mxu1  ;;  %4801 = vmatprep.subr.bf16.mxu1 %v6578_v50  ;;  %v6585_v50 = vld [vmem:[#allocation4 + $0x828] ss:$16 sps:$4 sm:$0xff]  }
 0x1e4   : > { %4597 = vmatmul.mubr.bf16.gmra.mxu0 %v8204_v10  ;;  %v7609_v7 = vpop.f32.mrf.mxu0  ;;  %v6596_v10 = vld [vmem:[#allocation4 + $0xa0c] ss:$16 sps:$4 sm:$0xff]  }
 0x1e5   : > { %4680 = vmatmul.mubr.bf16.gmra.mxu1 %v8205_v53  ;;  %4719 = vmatpush1.bf16.msra.mxu0 %v6573_v32  ;;  %v7611_v20 = vpop.f32.mrf.mxu1  ;;  %v6591_v53 = vld [vmem:[#allocation4 + $0x808] ss:$16 sps:$4 sm:$0xff]  }
 0x1e6   : > { %4802 = vmatpush1.bf16.msra.mxu1 %v6576_v5  ;;  %4720 = vmatprep.subr.bf16.mxu0 %v6581_v46  ;;  %v7615_v51 = vpop.f32.mrf.mxu0  ;;  %v6593_v5 = vld [vmem:[#allocation4 + $0x80c] ss:$16 sps:$4 sm:$0xff]   ;;  %v8208_v46 = vld [vmem:[#allocation19_spill] sm:$0xff] }
 0x1e7   : > { %4803 = vmatprep.subr.bf16.mxu1 %v6584_v59  ;;  %4606 = vmatprep.mubr.bf16.mxu0 %v8206_v2  ;;  %v7617_v32 = vpop.f32.mrf.mxu1  ;;  %v8209_v59 = vld [vmem:[#allocation20_spill] sm:$0xff]  ;;  %v6594_v2 = vld [vmem:[#allocation4 + $0xa08] ss:$16 sps:$4 sm:$0xff]  }
 0x1e8   : > { %4689 = vmatprep.mubr.bf16.mxu1 %v8207_v42  ;;  %v6599_v42 = vld [vmem:[#allocation4 + $0x9ec] ss:$16 sps:$4 sm:$0xff]  }
 0x1e9   : > { %4721 = vmatpush1.bf16.msra.mxu0 %v6579_v60  ;;  %v7621_v60 = vpop.f32.mrf.mxu0 }
 0x1ea   : > { %4804 = vmatpush1.bf16.msra.mxu1 %v6582_v33  ;;  %4722 = vmatprep.subr.bf16.mxu0 %v6587_v16  ;;  %v7623_v33 = vpop.f32.mrf.mxu1  ;;  %v8210_v16 = vld [vmem:[#allocation21_spill] sm:$0xff] }
 0x1eb   : > { %4805 = vmatprep.subr.bf16.mxu1 %v6590_v8  ;;  %v8211_v8 = vld [vmem:[#allocation22_spill] sm:$0xff] }
 0x1ec   : > { %4607 = vmatmul.mubr.bf16.gmra.mxu0 %v8208_v46  ;;  %v6597_v46 = vld [vmem:[#allocation4 + $0x9e8] ss:$16 sps:$4 sm:$0xff]  }
 0x1ed   : > { %4690 = vmatmul.mubr.bf16.gmra.mxu1 %v8209_v59  ;;  %4723 = vmatpush1.bf16.msra.mxu0 %v6585_v50  ;;  %v6600_v59 = vld [vmem:[#allocation4 + $0xbe8] ss:$16 sps:$4 sm:$0xff]   ;;  %v7627_v50 = vpop.f32.mrf.mxu0 }
 0x1ee   : > { %4806 = vmatpush1.bf16.msra.mxu1 %v6588_v47  ;;  %4724 = vmatprep.subr.bf16.mxu0 %v6593_v5  ;;  %v7629_v47 = vpop.f32.mrf.mxu1  ;;  %v8212_v5 = vld [vmem:[#allocation23_spill] sm:$0xff] }
 0x1ef   : > { %4807 = vmatprep.subr.bf16.mxu1 %v6596_v10  ;;  %4616 = vmatprep.mubr.bf16.mxu0 %v8210_v16  ;;  %v8213_v10 = vld [vmem:[#allocation24_spill] sm:$0xff]  ;;  %v6603_v16 = vld [vmem:[#allocation4 + $0x9c8] ss:$16 sps:$4 sm:$0xff]  }
 0x1f0   : > { %4699 = vmatprep.mubr.bf16.mxu1 %v8211_v8  ;;  %v6606_v8 = vld [vmem:[#allocation4 + $0xbc8] ss:$16 sps:$4 sm:$0xff]  }
 0x1f1   : > { %4725 = vmatpush1.bf16.msra.mxu0 %v6591_v53  ;;  %v7633_v53 = vpop.f32.mrf.mxu0 }
 0x1f2   : > { %4808 = vmatpush1.bf16.msra.mxu1 %v6594_v2  ;;  %4726 = vmatprep.subr.bf16.mxu0 %v6599_v42  ;;  %v7635_v2 = vpop.f32.mrf.mxu1  ;;  %v8215_v42 = vld [vmem:[#allocation25_spill] sm:$0xff] }
 0x1f3   : > { %4809 = vmatprep.subr.bf16.mxu1 %v6602_v3  ;;  %8214 = vst [vmem:[#allocation9_spill] sm:$0xff] %v7635_v2  ;;  %v8216_v3 = vld [vmem:[#allocation26_spill] sm:$0xff]  ;;  %v6642_v2 = vld [vmem:[#allocation4 + $0xb08] ss:$16 sps:$4 sm:$0xff]  }
 0x1f4   : > { %4617 = vmatmul.mubr.bf16.gmra.mxu0 %v8212_v5  ;;  %v6609_v5 = vld [vmem:[#allocation4 + $0x9a8] ss:$16 sps:$4 sm:$0xff]  }
 0x1f5   : > { %4700 = vmatmul.mubr.bf16.gmra.mxu1 %v8213_v10  ;;  %4727 = vmatpush2.bf16.msra.mxu0 %v6597_v46  ;;  %v6612_v10 = vld [vmem:[#allocation4 + $0xba8] ss:$16 sps:$4 sm:$0xff]   ;;  %v7639_v46 = vpop.f32.mrf.mxu0 }
 0x1f6   : > { %4810 = vmatpush2.bf16.msra.mxu1 %v6600_v59  ;;  %4728 = vmatprep.subr.bf16.mxu0 %v6605_v15  ;;  %8217 = vst [vmem:[#allocation10_spill] sm:$0xff] %v7639_v46  ;;  %v7641_v59 = vpop.f32.mrf.mxu1  ;;  %v6618_v15 = vld [vmem:[#allocation4 + $0xb88] ss:$16 sps:$4 sm:$0xff]  }
 0x1f7   : > { %4811 = vmatprep.subr.bf16.mxu1 %v6608_v27  ;;  %4742 = vmatprep.mubr.bf16.mxu0 %v8215_v42  ;;  %8218 = vst [vmem:[#allocation11_spill] sm:$0xff] %v7641_v59  ;;  %v6615_v27 = vld [vmem:[#allocation4 + $0x988] ss:$16 sps:$4 sm:$0xff]   ;;  %v7643_v9 = vpop.f32.mrf.mxu0 }
 0x1f8   : > { %4825 = vmatprep.mubr.bf16.mxu1 %v8216_v3  ;;  %8219 = vst [vmem:[#allocation12_spill] sm:$0xff] %v7643_v9  ;;  %v7645_v42 = vpop.f32.mrf.mxu1  ;;  %v6621_v3 = vld [vmem:[#allocation4 + $0x968] ss:$16 sps:$4 sm:$0xff]  }
 0x1f9   : > { %4729 = vmatpush2.bf16.msra.mxu0 %v6603_v16  ;;  %8220 = vst [vmem:[#allocation13_spill] sm:$0xff] %v7645_v42  ;;  %v6623_v16 = vld [vmem:[#allocation4 + $0x96c] ss:$16 sps:$4 sm:$0xff]   ;;  %v6624_v59 = vld [vmem:[#allocation4 + $0xb68] ss:$16 sps:$4 sm:$0xff]  }
 0x1fa   : > { %4812 = vmatpush2.bf16.msra.mxu1 %v6606_v8  ;;  %4730 = vmatprep.subr.bf16.mxu0 %v6611_v0  ;;  %v6626_v8 = vld [vmem:[#allocation4 + $0xb6c] ss:$16 sps:$4 sm:$0xff]   ;;  %v7647_v0 = vpop.f32.mrf.mxu0  ;;  %v6627_v9 = vld [vmem:[#allocation4 + $0x948] ss:$16 sps:$4 sm:$0xff]  }
 0x1fb   : > { %4813 = vmatprep.subr.bf16.mxu1 %v6614_v30  ;;  %8221 = vst [vmem:[#allocation14_spill] sm:$0xff] %v7647_v0  ;;  %v7649_v30 = vpop.f32.mrf.mxu1  ;;  %v6630_v42 = vld [vmem:[#allocation4 + $0xb48] ss:$16 sps:$4 sm:$0xff]   ;;  %v8225_v0 = vld [vmem:[#allocation54_spill] sm:$0xff] }
 0x1fc   : > { %8222 = vst [vmem:[#allocation15_spill] sm:$0xff] %v7649_v30  ;;  %v3755_v48 = vadd.f32 %v8225_v0, %v7344_v17  ;;  %v8229_v0 = vld [vmem:[#allocation60_spill] sm:$0xff] }
 0x1fd   : > { %4731 = vmatpush2.bf16.msra.mxu0 %v6609_v5  ;;  %v6629_v5 = vld [vmem:[#allocation4 + $0x94c] ss:$16 sps:$4 sm:$0xff]  }
 0x1fe   : > { %4814 = vmatpush2.bf16.msra.mxu1 %v6612_v10  ;;  %4732 = vmatprep.subr.bf16.mxu0 %v6617_v63  ;;  %v6632_v10 = vld [vmem:[#allocation4 + $0xb4c] ss:$16 sps:$4 sm:$0xff]   ;;  %v7651_v63 = vpop.f32.mrf.mxu0 }
 0x1ff   : > { %4815 = vmatprep.subr.bf16.mxu1 %v6620_v43  ;;  %8223 = vst [vmem:[#allocation16_spill] sm:$0xff] %v7651_v63  ;;  %v7653_v43 = vpop.f32.mrf.mxu1  ;;  %v6644_v63 = vld [vmem:[#allocation4 + $0xb0c] ss:$16 sps:$4 sm:$0xff]  }
 0x200   : > { %8224 = vst [vmem:[#allocation17_spill] sm:$0xff] %v7653_v43  ;;  %v7657_v30 = vpop.f32.mrf.mxu0  ;;  %v8228_v43 = vld [vmem:[#allocation55_spill] sm:$0xff] }
 0x201   : > { %4733 = vmatpush2.bf16.msra.mxu0 %v6615_v27  ;;  %v6635_v27 = vld [vmem:[#allocation4 + $0x92c] ss:$16 sps:$4 sm:$0xff]   ;;  %8226 = vst [vmem:[#allocation18_spill] sm:$0xff] %v7657_v30  ;;  %v3785_v30 = vadd.f32 %v7462_v35, %v7344_v17 }
 0x202   : > { %4816 = vmatpush2.bf16.msra.mxu1 %v6618_v15  ;;  %4734 = vmatprep.subr.bf16.mxu0 %v6623_v16  ;;  %v6638_v15 = vld [vmem:[#allocation4 + $0xb2c] ss:$16 sps:$4 sm:$0xff]   ;;  %v6633_v16 = vld [vmem:[#allocation4 + $0x928] ss:$16 sps:$4 sm:$0xff]  }
 0x203   : > { %4817 = vmatprep.subr.bf16.mxu1 %v6626_v8  ;;  %v6636_v8 = vld [vmem:[#allocation4 + $0xb28] ss:$16 sps:$4 sm:$0xff]  }
 0x205   : > { %4735 = vmatpush2.bf16.msra.mxu0 %v6621_v3  ;;  %v6641_v3 = vld [vmem:[#allocation4 + $0x90c] ss:$16 sps:$4 sm:$0xff]  }
 0x206   : > { %4818 = vmatpush2.bf16.msra.mxu1 %v6624_v59  ;;  %4736 = vmatprep.subr.bf16.mxu0 %v6629_v5  ;;  %v7659_v59 = vpop.f32.mrf.mxu1  ;;  %v3838_v5 = vadd.f32 %v8228_v43, %v3755_v48  ;;  %v6647_v48 = vld [vmem:[#allocation4 + $0xcec] ss:$16 sps:$4 sm:$0xff]  }
 0x207   : > { %4819 = vmatprep.subr.bf16.mxu1 %v6632_v10  ;;  %8227 = vst [vmem:[#allocation19_spill] sm:$0xff] %v7659_v59  ;;  %v6639_v10 = vld [vmem:[#allocation4 + $0x908] ss:$16 sps:$4 sm:$0xff]   ;;  %v7668_v59 = vpop.f32.mrf.mxu0  ;;  %v6650_v43 = vld [vmem:[#allocation4 + $0xeec] ss:$16 sps:$4 sm:$0xff]  }
 0x208   : > { %8230 = vst [vmem:[#allocation20_spill] sm:$0xff] %v7668_v59  ;;  %v3868_v59 = vadd.f32 %v7464_v14, %v3785_v30  ;;  %v8233_v30 = vld [vmem:[#allocation27_spill] sm:$0xff] }
 0x209   : > { %4737 = vmatpush2.bf16.msra.mxu0 %v6627_v9  ;;  %v3765_v9 = vadd.f32 %v8229_v0, %v7344_v17  ;;  %v8232_v0 = vld [vmem:[#allocation61_spill] sm:$0xff] }
 0x20a   : > { %4820 = vmatpush2.bf16.msra.mxu1 %v6630_v42  ;;  %4738 = vmatprep.subr.bf16.mxu0 %v6635_v27  ;;  %v3775_v42 = vadd.f32 %v7437_v61, %v7344_v17  ;;  %v7670_v27 = vpop.f32.mrf.mxu1  ;;  %v6648_v61 = vld [vmem:[#allocation4 + $0xee8] ss:$16 sps:$4 sm:$0xff]  }
 0x20b   : > { %4821 = vmatprep.subr.bf16.mxu1 %v6638_v15  ;;  %8231 = vst [vmem:[#allocation21_spill] sm:$0xff] %v7670_v27  ;;  %v3795_v15 = vadd.f32 %v7481_v12, %v7344_v17  ;;  %v3848_v46 = vadd.f32 %v8232_v0, %v3765_v9  ;;  %v7678_v27 = vpop.f32.mrf.mxu0  ;;  %v6656_v17 = vld [vmem:[#allocation4 + $0xecc] ss:$16 sps:$4 sm:$0xff]  }
 0x20c   : > { %v3858_v35 = vadd.f32 %v7439_v6, %v3775_v42  ;;  %v3951_v6 = vadd.f32 %v7547_v18, %v3868_v59  ;;  %v8234_v9 = vld [vmem:[#allocation28_spill] sm:$0xff] }
 0x20d   : > { %4739 = vmatpush2.bf16.msra.mxu0 %v6633_v16  ;;  %v3921_v16 = vadd.f32 %v7496_v62, %v3838_v5  ;;  %v3878_v12 = vadd.f32 %v7483_v57, %v3795_v15  ;;  %v6651_v57 = vld [vmem:[#allocation4 + $0xcc8] ss:$16 sps:$4 sm:$0xff]   ;;  %v6659_v59 = vld [vmem:[#allocation4 + $0xcac] ss:$16 sps:$4 sm:$0xff]  }
 0x20e   : > { %4822 = vmatpush2.bf16.msra.mxu1 %v6636_v8  ;;  %4740 = vmatprep.subr.bf16.mxu0 %v6641_v3  ;;  %v6645_v8 = vld [vmem:[#allocation4 + $0xce8] ss:$16 sps:$4 sm:$0xff]   ;;  %v6653_v3 = vld [vmem:[#allocation4 + $0xccc] ss:$16 sps:$4 sm:$0xff]   ;;  %v3941_v5 = vadd.f32 %v7530_v29, %v3858_v35  ;;  %v4091_v29 = vadd.f32 %v7587_v4, %v7506_v22  ;;  %v4093_v22 = vadd.f32 %v7593_v21, %v7511_v23 }
 0x20f   : > { %4823 = vmatprep.subr.bf16.mxu1 %v6644_v63  ;;  %v7680_v63 = vpop.f32.mrf.mxu1  ;;  %v4004_v62 = vadd.f32 %v7498_v28, %v3921_v16  ;;  %v6654_v28 = vld [vmem:[#allocation4 + $0xec8] ss:$16 sps:$4 sm:$0xff]  }
 0x211   : > { %4741 = vmatpush2.bf16.msra.mxu0 %v6639_v10  ;;  %v4087_v42 = vadd.f32 %v7581_v34, %v4004_v62  ;;  %v8235_v34 = vld [vmem:[#allocation29_spill] sm:$0xff] }
 0x212   : > { %4824 = vmatpush2.bf16.msra.mxu1 %v6642_v2  ;;  %4876 = vmatprep.subr.bf16.mxu0 %v6647_v48  ;;  %v3931_v2 = vadd.f32 %v7513_v1, %v3848_v46  ;;  %v3961_v1 = vadd.f32 %v7566_v36, %v3878_v12  ;;  %v7700_v36 = vadd.f32 %v7549_v19, %v3951_v6  ;;  %v6668_v12 = vld [vmem:[#allocation4 + $0xe8c] ss:$16 sps:$4 sm:$0xff]  }
 0x213   : > { %4959 = vmatprep.subr.bf16.mxu1 %v6650_v43  ;;  %v6662_v43 = vld [vmem:[#allocation4 + $0xeac] ss:$16 sps:$4 sm:$0xff]   ;;  %v4170_v0 = vadd.f32 %v7583_v40, %v4087_v42  ;;  %v4095_v19 = vadd.f32 %v7599_v55, %v7517_v38  ;;  %v4176_v6 = vadd.f32 %v7595_v41, %v4093_v22  ;;  %v8237_v55 = vld [vmem:[#allocation31_spill] sm:$0xff] }
 0x214   : > { %v4246_v10 = vpop.f32.mrf.mxu0  ;;  %4743 = vmatmul.mubr.bf16.vlgmr.msra.gmra.mxu0 %v8233_v30  ;;  %v4014_v16 = vadd.f32 %v7515_v54, %v3931_v2  ;;  %v7707_v54 = vadd.f32 %v7568_v26, %v3961_v1  ;;  %v6665_v40 = vld [vmem:[#allocation4 + $0xc8c] ss:$16 sps:$4 sm:$0xff]   ;;  %v4101_v26 = vadd.f32 %v7609_v7, %v7523_v58  ;;  %v6666_v41 = vld [vmem:[#allocation4 + $0xe88] ss:$16 sps:$4 sm:$0xff]   ;;  %v4105_v58 = vadd.f32 %v7621_v60, %v7534_v49 }
 0x215   : > { %v4329_v14 = vpop.f32.mrf.mxu1  ;;  %4826 = vmatmul.mubr.bf16.vlgmr.msra.gmra.mxu1 %v8234_v9  ;;  %v4247_v48 = vadd.f32 %v4246_v10, %v7573_v25  ;;  %4877 = vmatpush1.bf16.msra.mxu0 %v6645_v8  ;;  %v8236_v25 = vld [vmem:[#allocation30_spill] sm:$0xff]  ;;  %v4024_v8 = vadd.f32 %v7532_v13, %v3941_v5  ;;  %v4174_v13 = vadd.f32 %v7590_v24, %v4091_v29 }
 0x216   : > { %4960 = vmatpush1.bf16.msra.mxu1 %v6648_v61  ;;  %v4248_v18 = vpop.f32.mrf.mxu0  ;;  %4878 = vmatprep.subr.bf16.mxu0 %v6653_v3  ;;  %v6657_v3 = vld [vmem:[#allocation4 + $0xca8] ss:$16 sps:$4 sm:$0xff]   ;;  %v4103_v24 = vadd.f32 %v7615_v51, %v7528_v44  ;;  %v6674_v1 = vld [vmem:[#allocation4 + $0xe6c] ss:$16 sps:$4 sm:$0xff]   ;;  %v4111_v49 = vadd.f32 %v7633_v53, %v7540_v37 }
 0x217   : > { %v4331_v46 = vpop.f32.mrf.mxu1  ;;  %4961 = vmatprep.subr.bf16.mxu1 %v6656_v17  ;;  %v4249_v15 = vadd.f32 %v4248_v18, %v7578_v52  ;;  %4752 = vmatprep.mubr.bf16.mxu0 %v8235_v34  ;;  %v4330_v35 = vadd.f32 %v4329_v14, %v4247_v48  ;;  %v6660_v17 = vld [vmem:[#allocation4 + $0xea8] ss:$16 sps:$4 sm:$0xff]   ;;  %v8238_v14 = vld [vmem:[#allocation32_spill] sm:$0xff]  ;;  %v4107_v44 = vadd.f32 %v7627_v50, %v4024_v8  ;;  %v8241_v37 = vld [vmem:[#allocation10_spill] sm:$0xff] }
 0x218   : > { %4835 = vmatprep.mubr.bf16.mxu1 %v8236_v25  ;;  %v4250_v4 = vpop.f32.mrf.mxu0  ;;  %v6663_v48 = vld [vmem:[#allocation4 + $0xc88] ss:$16 sps:$4 sm:$0xff]   ;;  %v4113_v53 = vadd.f32 %v8241_v37, %v7545_v56 }
 0x219   : > { %v4333_v61 = vpop.f32.mrf.mxu1  ;;  %v4251_v52 = vadd.f32 %v4250_v4, %v7585_v31  ;;  %4879 = vmatpush1.bf16.msra.mxu0 %v6651_v57  ;;  %v4097_v31 = vadd.f32 %v7603_v11, %v4014_v16  ;;  %v4332_v62 = vadd.f32 %v4331_v46, %v4249_v15  ;;  %v5042_v30 = vmax.f32 %v4330_v35, 0.0  ;;  %v8240_v15 = vld [vmem:[#allocation34_spill] sm:$0xff]  ;;  %v6669_v4 = vld [vmem:[#allocation4 + $0xc68] ss:$16 sps:$4 sm:$0xff]  }
 0x21a   : > { %4962 = vmatpush1.bf16.msra.mxu1 %v6654_v28  ;;  %v4252_v23 = vpop.f32.mrf.mxu0  ;;  %4880 = vmatprep.subr.bf16.mxu0 %v6659_v59  ;;  %v4178_v57 = vadd.f32 %v7601_v39, %v4095_v19  ;;  %v6671_v28 = vld [vmem:[#allocation4 + $0xc6c] ss:$16 sps:$4 sm:$0xff]   ;;  %v4184_v39 = vadd.f32 %v7611_v20, %v4101_v26  ;;  %v4186_v16 = vadd.f32 %v7617_v32, %v4103_v24  ;;  %v8245_v56 = vld [vmem:[#allocation35_spill] sm:$0xff] }
 0x21b   : > { %v4335_v21 = vpop.f32.mrf.mxu1  ;;  %4963 = vmatprep.subr.bf16.mxu1 %v6662_v43  ;;  %v4334_v2 = vadd.f32 %v4333_v61, %v4251_v52  ;;  %v4253_v5 = vadd.f32 %v4252_v23, %v4170_v0  ;;  %v4180_v29 = vadd.f32 %v7605_v45, %v4097_v31  ;;  %v5043_v18 = vmax.f32 %v4332_v62, 0.0  ;;  %v8239_v43 = vld [vmem:[#allocation33_spill] sm:$0xff]  ;;  %v6677_v32 = vld [vmem:[#allocation4 + $0xc4c] ss:$16 sps:$4 sm:$0xff]   ;;  %v8256_v37 = vld [vmem:[#allocation15_spill] sm:$0xff] }
 0x21c   : > { %v4256_v38 = vpop.f32.mrf.mxu0  ;;  %4753 = vmatmul.mubr.bf16.gmra.mxu0 %v8237_v55  ;;  %v6672_v61 = vld [vmem:[#allocation4 + $0xe68] ss:$16 sps:$4 sm:$0xff]   ;;  %v4188_v0 = vadd.f32 %v7623_v33, %v4105_v58  ;;  %v7733_v20 = vadd.f32 %v7629_v47, %v4107_v44  ;;  %v8243_v33 = vld [vmem:[#allocation70_spill] sm:$0xff] }
 0x21d   : > { %v4339_v10 = vpop.f32.mrf.mxu1  ;;  %4836 = vmatmul.mubr.bf16.gmra.mxu1 %v8238_v14  ;;  %v5046_v9 = vmax.f32 %v4334_v2, 0.0  ;;  %v4336_v11 = vadd.f32 %v4335_v21, %v4253_v5  ;;  %v4257_v42 = vadd.f32 %v4256_v38, %v4174_v13  ;;  %4881 = vmatpush1.bf16.msra.mxu0 %v6657_v3  ;;  %v6680_v3 = vld [vmem:[#allocation4 + $0xe4c] ss:$16 sps:$4 sm:$0xff]   ;;  %v8242_v21 = vld [vmem:[#allocation9_spill] sm:$0xff] }
 0x21e   : > { %4964 = vmatpush1.bf16.msra.mxu1 %v6660_v17  ;;  %v4258_v7 = vpop.f32.mrf.mxu0  ;;  %4882 = vmatprep.subr.bf16.mxu0 %v6665_v40  ;;  %v7738_v40 = vadd.f32 %v8242_v21, %v4111_v49  ;;  %v6678_v14 = vld [vmem:[#allocation4 + $0xe48] ss:$16 sps:$4 sm:$0xff]   ;;  %v6683_v44 = vld [vmem:[#allocation4 + $0xc2c] ss:$16 sps:$4 sm:$0xff]  }
 0x21f   : > { %v4341_v51 = vpop.f32.mrf.mxu1  ;;  %4965 = vmatprep.subr.bf16.mxu1 %v6668_v12  ;;  %v5082_v46 = vadd.f32 %v5046_v9, %v5042_v30  ;;  %v5047_v59 = vmax.f32 %v4336_v11, 0.0  ;;  %4762 = vmatprep.mubr.bf16.mxu0 %v8239_v43  ;;  %v4259_v60 = vadd.f32 %v4258_v7, %v4176_v6  ;;  %v4340_v50 = vadd.f32 %v4339_v10, %v4257_v42  ;;  %v8244_v12 = vld [vmem:[#allocation12_spill] sm:$0xff]  ;;  %v6675_v10 = vld [vmem:[#allocation4 + $0xc48] ss:$16 sps:$4 sm:$0xff]   ;;  %v8247_v30 = vld [vmem:[#allocation14_spill] sm:$0xff] }
 0x220   : > { %4845 = vmatprep.mubr.bf16.mxu1 %v8240_v15  ;;  %v4260_v34 = vpop.f32.mrf.mxu0  ;;  %v4115_v47 = vadd.f32 %v8244_v12, %v8243_v33  ;;  %v8246_v6 = vld [vmem:[#allocation36_spill] sm:$0xff]  ;;  %v4117_v9 = vadd.f32 %v8247_v30, %v7700_v36  ;;  %v8248_v11 = vld [vmem:[#allocation71_spill] sm:$0xff]  ;;  %v8254_v15 = vld [vmem:[#allocation18_spill] sm:$0xff] }
 0x221   : > { %v4343_v25 = vpop.f32.mrf.mxu1  ;;  %v5083_v8 = vrot.slane %v5082_v46, 4  ;;  %v5089_v45 = vadd.f32 %v5047_v59, %v5043_v18  ;;  %v4261_v22 = vadd.f32 %v4260_v34, %v4178_v57  ;;  %4883 = vmatpush1.bf16.msra.mxu0 %v6663_v48  ;;  %v5050_v31 = vmax.f32 %v4340_v50, 0.0  ;;  %v8249_v42 = vld [vmem:[#allocation16_spill] sm:$0xff]  ;;  %v8250_v18 = vld [vmem:[#allocation37_spill] sm:$0xff]  ;;  %v8252_v59 = vld [vmem:[#allocation11_spill] sm:$0xff] }
 0x222   : > { %4966 = vmatpush1.bf16.msra.mxu1 %v6666_v41  ;;  %v4262_v35 = vpop.f32.mrf.mxu0  ;;  %4884 = vmatprep.subr.bf16.mxu0 %v6671_v28  ;;  %v4342_v62 = vadd.f32 %v4341_v51, %v4259_v60  ;;  %v4121_v48 = vadd.f32 %v8249_v42, %v8248_v11  ;;  %v6686_v7 = vld [vmem:[#allocation4 + $0xe2c] ss:$16 sps:$4 sm:$0xff]   ;;  %v4196_v36 = vadd.f32 %v8252_v59, %v4113_v53  ;;  %v8257_v53 = vld [vmem:[#allocation17_spill] sm:$0xff] }
 0x223   : > { %v4345_v52 = vpop.f32.mrf.mxu1  ;;  %4967 = vmatprep.subr.bf16.mxu1 %v6674_v1  ;;  %v5084_v17 = vadd.f32 %v5083_v8, %v5082_v46  ;;  %v5090_v13 = vrot.slane %v5089_v45, 4  ;;  %v4263_v19 = vadd.f32 %v4262_v35, %v4180_v29  ;;  %v4344_v23 = vadd.f32 %v4343_v25, %v4261_v22  ;;  %v8251_v46 = vld [vmem:[#allocation38_spill] sm:$0xff]  ;;  %v8253_v43 = vld [vmem:[#allocation72_spill] sm:$0xff]  ;;  %v8255_v25 = vld [vmem:[#allocation13_spill] sm:$0xff] }
 0x224   : > { %v4266_v2 = vpop.f32.mrf.mxu0  ;;  %4763 = vmatmul.mubr.bf16.gmra.mxu0 %v8245_v56  ;;  %v5051_v49 = vmax.f32 %v4342_v62, 0.0  ;;  %v7754_v8 = vadd.f32 %v8255_v25, %v4115_v47  ;;  %v7757_v35 = vadd.f32 %v8256_v37, %v4117_v9  ;;  %v8258_v47 = vld [vmem:[#allocation73_spill] sm:$0xff] }
 0x225   : > { %v4349_v5 = vpop.f32.mrf.mxu1  ;;  %4846 = vmatmul.mubr.bf16.gmra.mxu1 %v8246_v6  ;;  %v5085_v26 = vrot.slane %v5084_v17, 2  ;;  %v5091_v24 = vadd.f32 %v5090_v13, %v5089_v45  ;;  %v5054_v38 = vmax.f32 %v4344_v23, 0.0  ;;  %v4267_v55 = vadd.f32 %v4266_v2, %v4184_v39  ;;  %4885 = vmatpush1.bf16.msra.mxu0 %v6669_v4  ;;  %v6692_v23 = vld [vmem:[#allocation4 + $0xe0c] ss:$16 sps:$4 sm:$0xff]   ;;  %v8260_v2 = vld [vmem:[#allocation19_spill] sm:$0xff] }
 0x226   : > { %4968 = vmatpush1.bf16.msra.mxu1 %v6672_v61  ;;  %v4346_v41 = vadd.f32 %v4345_v52, %v4263_v19  ;;  %v4268_v57 = vpop.f32.mrf.mxu0  ;;  %4886 = vmatprep.subr.bf16.mxu0 %v6677_v32  ;;  %v4123_v39 = vadd.f32 %v8254_v15, %v8253_v43  ;;  %v6684_v61 = vld [vmem:[#allocation4 + $0xe28] ss:$16 sps:$4 sm:$0xff]   ;;  %v7760_v52 = vadd.f32 %v8257_v53, %v4121_v48  ;;  %v6689_v19 = vld [vmem:[#allocation4 + $0xc0c] ss:$16 sps:$4 sm:$0xff]  }
 0x227   : > { %v4351_v58 = vpop.f32.mrf.mxu1  ;;  %4969 = vmatprep.subr.bf16.mxu1 %v6680_v3  ;;  %v5086_v51 = vadd.f32 %v5085_v26, %v5084_v17  ;;  %v5092_v28 = vrot.slane %v5091_v24, 2  ;;  %v5110_v1 = vadd.f32 %v5054_v38, %v5050_v31  ;;  %v4269_v29 = vadd.f32 %v4268_v57, %v4186_v16  ;;  %4772 = vmatprep.mubr.bf16.mxu0 %v8250_v18  ;;  %v6681_v16 = vld [vmem:[#allocation4 + $0xc28] ss:$16 sps:$4 sm:$0xff]   ;;  %v8259_v31 = vld [vmem:[#allocation20_spill] sm:$0xff] }
 0x228   : > { %4855 = vmatprep.mubr.bf16.mxu1 %v8251_v46  ;;  %v5055_v60 = vmax.f32 %v4346_v41, 0.0  ;;  %v4270_v50 = vpop.f32.mrf.mxu0  ;;  %v4350_v22 = vadd.f32 %v4349_v5, %v4267_v55  ;;  %v4125_v62 = vadd.f32 %v8259_v31, %v8258_v47  ;;  %v7766_v56 = vadd.f32 %v8260_v2, %v4123_v39  ;;  %v8261_v38 = vld [vmem:[#allocation39_spill] sm:$0xff]  ;;  %v8263_v18 = vld [vmem:[#allocation41_spill] sm:$0xff]  ;;  %v8267_v2 = vld [vmem:[#allocation44_spill] sm:$0xff] }
 0x229   : > { %v4353_v34 = vpop.f32.mrf.mxu1  ;;  %v5111_v45 = vrot.slane %v5110_v1, 4  ;;  %v4271_v4 = vadd.f32 %v4270_v50, %v4188_v0  ;;  %4887 = vmatpush1.bf16.msra.mxu0 %v6675_v10  ;;  %v5087_v32 = vrot.slane %v5086_v51, 1  ;;  %v5093_v21 = vadd.f32 %v5092_v28, %v5091_v24  ;;  %v8262_v10 = vld [vmem:[#allocation40_spill] sm:$0xff]  ;;  %v6687_v9 = vld [vmem:[#allocation4 + $0xc08] ss:$16 sps:$4 sm:$0xff]  }
 0x22a   : > { %4970 = vmatpush1.bf16.msra.mxu1 %v6678_v14  ;;  %v5117_v3 = vadd.f32 %v5055_v60, %v5051_v49  ;;  %v4272_v17 = vpop.f32.mrf.mxu0  ;;  %4888 = vmatprep.subr.bf16.mxu0 %v6683_v44  ;;  %v4352_v33 = vadd.f32 %v4351_v58, %v4269_v29  ;;  %v7772_v24 = vadd.f32 %v7678_v27, %v7707_v54  ;;  %v5058_v14 = vmax.f32 %v4350_v22, 0.0  ;;  %v6690_v11 = vld [vmem:[#allocation4 + $0xe08] ss:$16 sps:$4 sm:$0xff]   ;;  %v6698_v28 = vld [vmem:[#allocation4 + $0xfec] ss:$16 sps:$4 sm:$0xff]  }
 0x22b   : > { %v4355_v13 = vpop.f32.mrf.mxu1  ;;  %4971 = vmatprep.subr.bf16.mxu1 %v6686_v7  ;;  %v5112_v0 = vadd.f32 %v5111_v45, %v5110_v1  ;;  %v4273_v12 = vadd.f32 %v4272_v17, %v7733_v20  ;;  %v4354_v6 = vadd.f32 %v4353_v34, %v4271_v4  ;;  %v5088_v42 = vadd.f32 %v5087_v32, %v5086_v51  ;;  %v6695_v7 = vld [vmem:[#allocation4 + $0xdec] ss:$16 sps:$4 sm:$0xff]   ;;  %v8265_v49 = vld [vmem:[#allocation21_spill] sm:$0xff]  ;;  %v8266_v31 = vld [vmem:[#allocation43_spill] sm:$0xff] }
 0x22c   : > { %v5118_v5 = vrot.slane %v5117_v3, 4  ;;  %v4276_v26 = vpop.f32.mrf.mxu0  ;;  %4773 = vmatmul.mubr.bf16.gmra.mxu0 %v8261_v38  ;;  %v5094_v27 = vrot.slane %v5093_v21, 1  ;;  %v5059_v1 = vmax.f32 %v4352_v33, 0.0  ;;  %v7778_v60 = vadd.f32 %v8265_v49, %v4125_v62  ;;  %v6696_v45 = vld [vmem:[#allocation4 + $0xfe8] ss:$16 sps:$4 sm:$0xff]  }
 0x22d   : > { %v4359_v55 = vpop.f32.mrf.mxu1  ;;  %4856 = vmatmul.mubr.bf16.gmra.mxu1 %v8262_v10  ;;  %v5113_v20 = vrot.slane %v5112_v0, 2  ;;  %v4277_v30 = vadd.f32 %v4276_v26, %v7738_v40  ;;  %4889 = vmatpush1.bf16.msra.mxu0 %v6681_v16  ;;  %v5062_v41 = vmax.f32 %v4354_v6, 0.0  ;;  %v4356_v57 = vadd.f32 %v4355_v13, %v4273_v12  ;;  %v8264_v40 = vld [vmem:[#allocation42_spill] sm:$0xff] }
 0x22e   : > { %4972 = vmatpush1.bf16.msra.mxu1 %v6684_v61  ;;  %v5119_v48 = vadd.f32 %v5118_v5, %v5117_v3  ;;  %v4278_v58 = vpop.f32.mrf.mxu0  ;;  %4890 = vmatprep.subr.bf16.mxu0 %v6689_v19  ;;  %v5223_v22 = vmul.f32 0.0625, %v5088_v42  ;;  %v6701_v32 = vld [vmem:[#allocation4 + $0xdcc] ss:$16 sps:$4 sm:$0xff]   ;;  %v5095_v17 = vadd.f32 %v5094_v27, %v5093_v21  ;;  %v6699_v5 = vld [vmem:[#allocation4 + $0xdc8] ss:$16 sps:$4 sm:$0xff]  }
 0x22f   : > { %v4361_v44 = vpop.f32.mrf.mxu1  ;;  %4973 = vmatprep.subr.bf16.mxu1 %v6692_v23  ;;  %v5114_v54 = vadd.f32 %v5113_v20, %v5112_v0  ;;  %v4279_v29 = vadd.f32 %v4278_v58, %v4196_v36  ;;  %4782 = vmatprep.mubr.bf16.mxu0 %v8263_v18  ;;  %v5138_v59 = vadd.f32 %v5062_v41, %v5058_v14  ;;  %v5063_v51 = vmax.f32 %v4356_v57, 0.0  ;;  %v6693_v36 = vld [vmem:[#allocation4 + $0xde8] ss:$16 sps:$4 sm:$0xff]   ;;  %v6704_v3 = vld [vmem:[#allocation4 + $0xfcc] ss:$16 sps:$4 sm:$0xff]  }
 0x230   : > { %4865 = vmatprep.mubr.bf16.mxu1 %v8264_v40  ;;  %v5120_v46 = vrot.slane %v5119_v48, 2  ;;  %v4360_v43 = vadd.f32 %v4359_v55, %v4277_v30  ;;  %v4280_v15 = vpop.f32.mrf.mxu0  ;;  %v6702_v21 = vld [vmem:[#allocation4 + $0xfc8] ss:$16 sps:$4 sm:$0xff]   ;;  %v6710_v42 = vld [vmem:[#allocation4 + $0xfac] ss:$16 sps:$4 sm:$0xff]   ;;  %v4210_v18 = vadd.f32 %v7680_v63, %v7772_v24 }
 0x231   : > { %v4363_v39 = vpop.f32.mrf.mxu1  ;;  %v5115_v50 = vrot.slane %v5114_v54, 1  ;;  %v4281_v34 = vadd.f32 %v4280_v15, %v7754_v8  ;;  %v4362_v25 = vadd.f32 %v4361_v44, %v4279_v29  ;;  %4891 = vmatpush1.bf16.msra.mxu0 %v6687_v9  ;;  %v5139_v16 = vrot.slane %v5138_v59, 4  ;;  %v8268_v44 = vld [vmem:[#allocation45_spill] sm:$0xff] }
 0x232   : > { %4974 = vmatpush1.bf16.msra.mxu1 %v6690_v11  ;;  %v5121_v4 = vadd.f32 %v5120_v46, %v5119_v48  ;;  %v5145_v61 = vadd.f32 %v5063_v51, %v5059_v1  ;;  %v4282_v37 = vpop.f32.mrf.mxu0  ;;  %4892 = vmatprep.subr.bf16.mxu0 %v6695_v7  ;;  %v5066_v12 = vmax.f32 %v4360_v43, 0.0  ;;  %v6707_v11 = vld [vmem:[#allocation4 + $0xdac] ss:$16 sps:$4 sm:$0xff]   ;;  %v6708_v51 = vld [vmem:[#allocation4 + $0xfa8] ss:$16 sps:$4 sm:$0xff]  }
 0x233   : > { %v4365_v53 = vpop.f32.mrf.mxu1  ;;  %4975 = vmatprep.subr.bf16.mxu1 %v6698_v28  ;;  %v5116_v13 = vadd.f32 %v5115_v50, %v5114_v54  ;;  %v4283_v19 = vadd.f32 %v4282_v37, %v7757_v35  ;;  %v4364_v8 = vadd.f32 %v4363_v39, %v4281_v34  ;;  %v5140_v0 = vadd.f32 %v5139_v16, %v5138_v59  ;;  %v8269_v7 = vld [vmem:[#allocation46_spill] sm:$0xff] }
 0x234   : > { %v5122_v23 = vrot.slane %v5121_v4, 1  ;;  %v5146_v33 = vrot.slane %v5145_v61, 4  ;;  %v4286_v47 = vpop.f32.mrf.mxu0  ;;  %4783 = vmatmul.mubr.bf16.gmra.mxu0 %v8266_v31  ;;  %v5067_v26 = vmax.f32 %v4362_v25, 0.0  ;;  %v5224_v28 = vmul.f32 0.0625, %v5095_v17  ;;  %v6713_v25 = vld [vmem:[#allocation4 + $0xd8c] ss:$16 sps:$4 sm:$0xff]  }
 0x235   : > { %v4369_v62 = vpop.f32.mrf.mxu1  ;;  %4866 = vmatmul.mubr.bf16.gmra.mxu1 %v8267_v2  ;;  %v5227_v6 = vmul.f32 0.0625, %v5116_v13  ;;  %v5070_v38 = vmax.f32 %v4364_v8, 0.0  ;;  %v4366_v55 = vadd.f32 %v4365_v53, %v4283_v19  ;;  %4893 = vmatpush2.bf16.msra.mxu0 %v6693_v36  ;;  %v5141_v10 = vrot.slane %v5140_v0, 2  ;;  %v6716_v36 = vld [vmem:[#allocation4 + $0xf8c] ss:$16 sps:$4 sm:$0xff]  }
 0x236   : > { %4976 = vmatpush2.bf16.msra.mxu1 %v6696_v45  ;;  %v5123_v35 = vadd.f32 %v5122_v23, %v5121_v4  ;;  %v5147_v20 = vadd.f32 %v5146_v33, %v5145_v61  ;;  %v4287_v14 = vadd.f32 %v4286_v47, %v7760_v52  ;;  %v4288_v30 = vpop.f32.mrf.mxu0  ;;  %4894 = vmatprep.subr.bf16.mxu0 %v6701_v32  ;;  %v6711_v61 = vld [vmem:[#allocation4 + $0xd88] ss:$16 sps:$4 sm:$0xff]   ;;  %v6719_v17 = vld [vmem:[#allocation4 + $0xd6c] ss:$16 sps:$4 sm:$0xff]  }
 0x237   : > { %v4371_v9 = vpop.f32.mrf.mxu1  ;;  %4977 = vmatprep.subr.bf16.mxu1 %v6704_v3  ;;  %v5264_v48 = vsel %vm5263_vm0, %v5227_v6, %v5223_v22  ;;  %v5166_v41 = vadd.f32 %v5070_v38, %v5066_v12  ;;  %v5071_v57 = vmax.f32 %v4366_v55, 0.0  ;;  %v4289_v58 = vadd.f32 %v4288_v30, %v7766_v56  ;;  %4908 = vmatprep.mubr.bf16.mxu0 %v8268_v44  ;;  %v6705_v56 = vld [vmem:[#allocation4 + $0xda8] ss:$16 sps:$4 sm:$0xff]  }
 0x238   : > { %4991 = vmatprep.mubr.bf16.mxu1 %v8269_v7  ;;  %v5228_v27 = vmul.f32 0.0625, %v5123_v35  ;;  %v5142_v54 = vadd.f32 %v5141_v10, %v5140_v0  ;;  %v5148_v52 = vrot.slane %v5147_v20, 2  ;;  %v4290_v1 = vpop.f32.mrf.mxu0  ;;  %v4370_v49 = vadd.f32 %v4369_v62, %v4287_v14  ;;  %v6714_v3 = vld [vmem:[#allocation4 + $0xf88] ss:$16 sps:$4 sm:$0xff]   ;;  %v6722_v0 = vld [vmem:[#allocation4 + $0xf6c] ss:$16 sps:$4 sm:$0xff]  }
 0x239   : > { %v4373_v29 = vpop.f32.mrf.mxu1  ;;  %v5167_v40 = vrot.slane %v5166_v41, 4  ;;  %v5173_v46 = vadd.f32 %v5071_v57, %v5067_v26  ;;  %v4291_v59 = vadd.f32 %v4290_v1, %v7778_v60  ;;  %4895 = vmatpush2.bf16.msra.mxu0 %v6699_v5  ;;  %v4372_v45 = vadd.f32 %v4371_v9, %v4289_v58  ;;  %v6717_v55 = vld [vmem:[#allocation4 + $0xd68] ss:$16 sps:$4 sm:$0xff]   ;;  %v6728_v14 = vld [vmem:[#allocation4 + $0xf4c] ss:$16 sps:$4 sm:$0xff]  }
 0x23a   : > { %4978 = vmatpush2.bf16.msra.mxu1 %v6702_v21  ;;  %v5271_v43 = vsel %vm5263_vm0, %v5228_v27, %v5224_v28  ;;  %v5143_v15 = vrot.slane %v5142_v54, 1  ;;  %v5149_v39 = vadd.f32 %v5148_v52, %v5147_v20  ;;  %v4292_v50 = vpop.f32.mrf.mxu0  ;;  %4896 = vmatprep.subr.bf16.mxu0 %v6707_v11  ;;  %v5074_v8 = vmax.f32 %v4370_v49, 0.0  ;;  %v6720_v21 = vld [vmem:[#allocation4 + $0xf68] ss:$16 sps:$4 sm:$0xff]   ;;  %v6725_v20 = vld [vmem:[#allocation4 + $0xd4c] ss:$16 sps:$4 sm:$0xff]  }
 0x23b   : > { %v4375_v34 = vpop.f32.mrf.mxu1  ;;  %4979 = vmatprep.subr.bf16.mxu1 %v6710_v42  ;;  %v5168_v63 = vadd.f32 %v5167_v40, %v5166_v41  ;;  %v5174_v24 = vrot.slane %v5173_v46, 4  ;;  %v4293_v22 = vadd.f32 %v4292_v50, %v4210_v18  ;;  %v4374_v16 = vadd.f32 %v4373_v29, %v4291_v59  ;;  %v6723_v58 = vld [vmem:[#allocation4 + $0xd48] ss:$16 sps:$4 sm:$0xff]   ;;  %v6731_v28 = vld [vmem:[#allocation4 + $0xd2c] ss:$16 sps:$4 sm:$0xff]  }
 0x23c   : > { %v5144_v60 = vadd.f32 %v5143_v15, %v5142_v54  ;;  %v5150_v4 = vrot.slane %v5149_v39, 1  ;;  %v5075_v47 = vmax.f32 %v4372_v45, 0.0  ;;  %v6726_v44 = vld [vmem:[#allocation4 + $0xf48] ss:$16 sps:$4 sm:$0xff]   ;;  %v6734_v27 = vld [vmem:[#allocation4 + $0xf2c] ss:$16 sps:$4 sm:$0xff]  }
 0x23d   : > { %v5169_v37 = vrot.slane %v5168_v63, 2  ;;  %v5175_v53 = vadd.f32 %v5174_v24, %v5173_v46  ;;  %v4376_v32 = vadd.f32 %v4375_v34, %v4293_v22  ;;  %4897 = vmatpush2.bf16.msra.mxu0 %v6705_v56  ;;  %v5078_v23 = vmax.f32 %v4374_v16, 0.0  ;;  %v6729_v46 = vld [vmem:[#allocation4 + $0xd28] ss:$16 sps:$4 sm:$0xff]  }
 0x23e   : > { %4980 = vmatpush2.bf16.msra.mxu1 %v6708_v51  ;;  %v5231_v13 = vmul.f32 0.0625, %v5144_v60  ;;  %v5151_v19 = vadd.f32 %v5150_v4, %v5149_v39  ;;  %4898 = vmatprep.subr.bf16.mxu0 %v6713_v25  ;;  %v6732_v59 = vld [vmem:[#allocation4 + $0xf28] ss:$16 sps:$4 sm:$0xff]   ;;  %v6737_v51 = vld [vmem:[#allocation4 + $0xd0c] ss:$16 sps:$4 sm:$0xff]  }
 0x23f   : > { %4981 = vmatprep.subr.bf16.mxu1 %v6716_v36  ;;  %v5170_v33 = vadd.f32 %v5169_v37, %v5168_v63  ;;  %v5176_v12 = vrot.slane %v5175_v53, 2  ;;  %v5079_v31 = vmax.f32 %v4376_v32, 0.0  ;;  %v5194_v5 = vadd.f32 %v5078_v23, %v5074_v8  ;;  %v6735_v50 = vld [vmem:[#allocation4 + $0xd08] ss:$16 sps:$4 sm:$0xff]   ;;  %v6741_v4 = vld [vmem:[#allocation6] sm:$0xf] }
 0x240   : > { %v5266_v62 = vsel %vm5265_vm1, %v5231_v13, %v5264_v48  ;;  %v5232_v2 = vmul.f32 0.0625, %v5151_v19  ;;  %v6738_v34 = vld [vmem:[#allocation4 + $0xf08] ss:$16 sps:$4 sm:$0xff]   ;;  %v8271_v32 = vld [vmem:[#allocation48_spill] sm:$0xff]  ;;  %v8273_v13 = vld [vmem:[#allocation50_spill] sm:$0xff] }
 0x241   : > { %v5171_v6 = vrot.slane %v5170_v33, 1  ;;  %v5177_v26 = vadd.f32 %v5176_v12, %v5175_v53  ;;  %v5201_v38 = vadd.f32 %v5079_v31, %v5075_v47  ;;  %4899 = vmatpush2.bf16.msra.mxu0 %v6711_v61  ;;  %v5195_v10 = vrot.slane %v5194_v5, 4  ;;  %v8270_v25 = vld [vmem:[#allocation47_spill] sm:$0xff] }
 0x242   : > { %4982 = vmatpush2.bf16.msra.mxu1 %v6714_v3  ;;  %v5272_v35 = vsel %vm5265_vm1, %v5232_v2, %v5271_v43  ;;  %4900 = vmatprep.subr.bf16.mxu0 %v6719_v17  ;;  %v6740_v43 = vld [vmem:[#allocation4 + $0xf0c] ss:$16 sps:$4 sm:$0xff]   ;;  %v1144_v36 = vsub.s32 2, %v8270_v25  ;;  %v1148_v45 = vsub.s32 3, %v8270_v25  ;;  %v8272_v3 = vld [vmem:[#allocation49_spill] sm:$0xff]  ;;  %v8274_v19 = vld [vmem:[#allocation51_spill] sm:$0xff] }
 0x243   : > { %4983 = vmatprep.subr.bf16.mxu1 %v6722_v0  ;;  %v5172_v30 = vadd.f32 %v5171_v6, %v5170_v33  ;;  %v5178_v9 = vrot.slane %v5177_v26, 1  ;;  %v5202_v11 = vrot.slane %v5201_v38, 4  ;;  %v5196_v42 = vadd.f32 %v5195_v10, %v5194_v5 }
 0x244   : > { %v7811_v16 = vrot.slane %v6741_v4, %v1144_v36  ;;  %v7814_v61 = vrot.slane %v6741_v4, %v1148_v45 }
 0x245   : > { %v5235_v48 = vmul.f32 0.0625, %v5172_v30  ;;  %v5179_v41 = vadd.f32 %v5178_v9, %v5177_v26  ;;  %v5203_v57 = vadd.f32 %v5202_v11, %v5201_v38  ;;  %4901 = vmatpush2.bf16.msra.mxu0 %v6717_v55  ;;  %v5197_v7 = vrot.slane %v5196_v42, 2  ;;  %v8275_v38 = vld [vmem:[#allocation52_spill] sm:$0xff]  ;;  %v8276_v55 = vld [vmem:[#allocation53_spill] sm:$0xff] }
 0x246   : > { %4984 = vmatpush2.bf16.msra.mxu1 %v6720_v21  ;;  %4902 = vmatprep.subr.bf16.mxu0 %v6725_v20  ;;  %v8277_v20 = vld [vmem:[#allocation56_spill] sm:$0xff] }
 0x247   : > { %4985 = vmatprep.subr.bf16.mxu1 %v6728_v14  ;;  %v5268_v54 = vsel %vm5267_vm2, %v5235_v48, %v5266_v62  ;;  %v5236_v52 = vmul.f32 0.0625, %v5179_v41  ;;  %v5204_v1 = vrot.slane %v5203_v57, 2  ;;  %v5198_v29 = vadd.f32 %v5197_v7, %v5196_v42  ;;  %v8278_v14 = vld [vmem:[#allocation57_spill] sm:$0xff] }
 0x249   : > { %v5273_v18 = vsel %vm5267_vm2, %v5236_v52, %v5272_v35  ;;  %v5205_v40 = vadd.f32 %v5204_v1, %v5203_v57  ;;  %4903 = vmatpush2.bf16.msra.mxu0 %v6723_v58  ;;  %v5199_v56 = vrot.slane %v5198_v29, 1  ;;  %v8279_v52 = vld [vmem:[#allocation58_spill] sm:$0xff]  ;;  %v8280_v1 = vld [vmem:[#allocation59_spill] sm:$0xff] }
 0x24a   : > { %4986 = vmatpush2.bf16.msra.mxu1 %v6726_v44  ;;  %4904 = vmatprep.subr.bf16.mxu0 %v6731_v28 }
 0x24b   : > { %4987 = vmatprep.subr.bf16.mxu1 %v6734_v27  ;;  %v5206_v15 = vrot.slane %v5205_v40, 1  ;;  %v5200_v39 = vadd.f32 %v5199_v56, %v5198_v29 }
 0x24d   : > { %v5207_v49 = vadd.f32 %v5206_v15, %v5205_v40  ;;  %4905 = vmatpush2.bf16.msra.mxu0 %v6729_v46  ;;  %v5239_v63 = vmul.f32 0.0625, %v5200_v39  ;;  %v8281_v40 = vld [vmem:[#allocation62_spill] sm:$0xff]  ;;  %v8282_v46 = vld [vmem:[#allocation63_spill] sm:$0xff] }
 0x24e   : > { %4988 = vmatpush2.bf16.msra.mxu1 %v6732_v59  ;;  %4906 = vmatprep.subr.bf16.mxu0 %v6737_v51 }
 0x24f   : > { %4989 = vmatprep.subr.bf16.mxu1 %v6740_v43  ;;  %v5240_v24 = vmul.f32 0.0625, %v5207_v49  ;;  %v5270_v22 = vsel %vm5269_vm3, %v5239_v63, %v5268_v54 }
 0x250   : > { %5287 = vst [vmem:[%s7805_s21] sm:$0x1f] %v5270_v22  ;;  %v8283_v22 = vld [vmem:[#allocation64_spill] sm:$0xff] }
 0x251   : > { %v5274_v60 = vsel %vm5269_vm3, %v5240_v24, %v5273_v18  ;;  %4907 = vmatpush2.bf16.msra.mxu0 %v6735_v50 }
 0x252   : > { %4990 = vmatpush2.bf16.msra.mxu1 %v6738_v34  ;;  %5288 = vst [vmem:[%s7805_s21 + $0x8] sm:$0x1f] %v5274_v60  ;;  %v8284_v60 = vld [vmem:[#allocation65_spill] sm:$0xff] }
 0x254   : > { %v4412_v37 = vpop.f32.mrf.mxu0  ;;  %4909 = vmatmul.mubr.bf16.vlgmr.msra.gmra.mxu0 %v8271_v32  ;;  %v8286_v32 = vld [vmem:[#allocation67_spill] sm:$0xff] }
 0x255   : > { %v4495_v53 = vpop.f32.mrf.mxu1  ;;  %4992 = vmatmul.mubr.bf16.vlgmr.msra.gmra.mxu1 %v8272_v3  ;;  %v4413_v17 = vadd.f32 %v4412_v37, %v7811_v16  ;;  %4918 = vmatprep.mubr.bf16.mxu0 %v8273_v13 }
 0x256   : > { %5001 = vmatprep.mubr.bf16.mxu1 %v8274_v19  ;;  %v4414_v8 = vpop.f32.mrf.mxu0 }
 0x257   : > { %v4497_v23 = vpop.f32.mrf.mxu1  ;;  %v7821_v0 = vadd.f32 %v4495_v53, %v4413_v17  ;;  %v4415_v33 = vadd.f32 %v4414_v8, %v7814_v61  ;;  %v8285_v53 = vld [vmem:[#allocation66_spill] sm:$0xff] }
 0x258   : > { %v4416_v12 = vpop.f32.mrf.mxu0 }
 0x259   : > { %v4499_v47 = vpop.f32.mrf.mxu1  ;;  %v7824_v31 = vadd.f32 %v4497_v23, %v4415_v33  ;;  %v4417_v62 = vadd.f32 %v4416_v12, %v7811_v16 }
 0x25a   : > { %v4418_v2 = vpop.f32.mrf.mxu0 }
 0x25b   : > { %v4501_v5 = vpop.f32.mrf.mxu1  ;;  %v7827_v6 = vadd.f32 %v4499_v47, %v4417_v62  ;;  %v4419_v26 = vadd.f32 %v4418_v2, %v7814_v61 }
 0x25c   : > { %4919 = vmatmul.mubr.bf16.gmra.mxu0 %v8275_v38  ;;  %v4422_v21 = vpop.f32.mrf.mxu0 }
 0x25d   : > { %5002 = vmatmul.mubr.bf16.gmra.mxu1 %v8276_v55  ;;  %v4505_v35 = vpop.f32.mrf.mxu1  ;;  %v7832_v10 = vadd.f32 %v4501_v5, %v4419_v26  ;;  %4928 = vmatprep.mubr.bf16.mxu0 %v8277_v20  ;;  %v4423_v30 = vadd.f32 %v4422_v21, %v7811_v16  ;;  %v8287_v55 = vld [vmem:[#allocation68_spill] sm:$0xff]  ;;  %v8288_v21 = vld [vmem:[#allocation69_spill] sm:$0xff] }
 0x25e   : > { %5011 = vmatprep.mubr.bf16.mxu1 %v8278_v14  ;;  %v4424_v9 = vpop.f32.mrf.mxu0 }
 0x25f   : > { %v4507_v11 = vpop.f32.mrf.mxu1  ;;  %v4425_v42 = vadd.f32 %v4424_v9, %v7814_v61  ;;  %v7838_v48 = vadd.f32 %v4505_v35, %v4423_v30 }
 0x260   : > { %v4426_v41 = vpop.f32.mrf.mxu0 }
 0x261   : > { %v4509_v57 = vpop.f32.mrf.mxu1  ;;  %v4427_v58 = vadd.f32 %v4426_v41, %v7811_v16  ;;  %v7841_v44 = vadd.f32 %v4507_v11, %v4425_v42 }
 0x262   : > { %v4428_v7 = vpop.f32.mrf.mxu0 }
 0x263   : > { %v4511_v28 = vpop.f32.mrf.mxu1  ;;  %v4429_v27 = vadd.f32 %v4428_v7, %v7814_v61  ;;  %v7844_v54 = vadd.f32 %v4509_v57, %v4427_v58 }
 0x264   : > { %4929 = vmatmul.mubr.bf16.gmra.mxu0 %v8279_v52  ;;  %v4432_v29 = vpop.f32.mrf.mxu0 }
 0x265   : > { %5012 = vmatmul.mubr.bf16.gmra.mxu1 %v8280_v1  ;;  %v4515_v18 = vpop.f32.mrf.mxu1  ;;  %4938 = vmatprep.mubr.bf16.mxu0 %v8281_v40  ;;  %v4433_v59 = vadd.f32 %v4432_v29, %v7811_v16  ;;  %v7851_v56 = vadd.f32 %v4511_v28, %v4429_v27 }
 0x266   : > { %5021 = vmatprep.mubr.bf16.mxu1 %v8282_v46  ;;  %v4434_v51 = vpop.f32.mrf.mxu0 }
 0x267   : > { %v4517_v43 = vpop.f32.mrf.mxu1  ;;  %v4435_v15 = vadd.f32 %v4434_v51, %v7814_v61  ;;  %v7854_v39 = vadd.f32 %v4515_v18, %v4433_v59 }
 0x268   : > { %v4436_v49 = vpop.f32.mrf.mxu0 }
 0x269   : > { %v4519_v50 = vpop.f32.mrf.mxu1  ;;  %v4437_v34 = vadd.f32 %v4436_v49, %v7811_v16  ;;  %v7857_v25 = vadd.f32 %v4517_v43, %v4435_v15 }
 0x26a   : > { %v4438_v36 = vpop.f32.mrf.mxu0 }
 0x26b   : > { %v4521_v63 = vpop.f32.mrf.mxu1  ;;  %v4439_v24 = vadd.f32 %v4438_v36, %v7814_v61  ;;  %v7860_v45 = vadd.f32 %v4519_v50, %v4437_v34 }
 0x26c   : > { %4939 = vmatmul.mubr.bf16.gmra.mxu0 %v8283_v22  ;;  %v4442_v4 = vpop.f32.mrf.mxu0 }
 0x26d   : > { %5022 = vmatmul.mubr.bf16.gmra.mxu1 %v8284_v60  ;;  %v4525_v37 = vpop.f32.mrf.mxu1  ;;  %4948 = vmatprep.mubr.bf16.mxu0 %v8285_v53  ;;  %v4443_v3 = vadd.f32 %v4442_v4, %v7811_v16  ;;  %v7867_v17 = vadd.f32 %v4521_v63, %v4439_v24 }
 0x26e   : > { %5031 = vmatprep.mubr.bf16.mxu1 %v8286_v32  ;;  %v4444_v13 = vpop.f32.mrf.mxu0 }
 0x26f   : > { %v4527_v19 = vpop.f32.mrf.mxu1  ;;  %v4445_v8 = vadd.f32 %v4444_v13, %v7814_v61  ;;  %v7870_v23 = vadd.f32 %v4525_v37, %v4443_v3 }
 0x270   : > { %v4446_v33 = vpop.f32.mrf.mxu0 }
 0x271   : > { %v4529_v12 = vpop.f32.mrf.mxu1  ;;  %v4447_v47 = vadd.f32 %v4446_v33, %v7811_v16  ;;  %v7873_v62 = vadd.f32 %v4527_v19, %v4445_v8 }
 0x272   : > { %v4448_v2 = vpop.f32.mrf.mxu0 }
 0x273   : > { %v4531_v5 = vpop.f32.mrf.mxu1  ;;  %v4449_v26 = vadd.f32 %v4448_v2, %v7814_v61  ;;  %v7876_v38 = vadd.f32 %v4529_v12, %v4447_v47 }
 0x274   : > { %4949 = vmatmul.mubr.bf16.gmra.mxu0 %v8287_v55  ;;  %v4452_v35 = vpop.f32.mrf.mxu0 }
 0x275   : > { %5032 = vmatmul.mubr.bf16.gmra.mxu1 %v8288_v21  ;;  %v4535_v20 = vpop.f32.mrf.mxu1  ;;  %v4453_v14 = vadd.f32 %v4452_v35, %v7811_v16  ;;  %v7881_v30 = vadd.f32 %v4531_v5, %v4449_v26 }
 0x276   : > { %v4454_v9 = vpop.f32.mrf.mxu0 }
 0x277   : > { %v4537_v11 = vpop.f32.mrf.mxu1  ;;  %v4455_v42 = vadd.f32 %v4454_v9, %v7814_v61  ;;  %v7884_v41 = vadd.f32 %v4535_v20, %v4453_v14 }
 0x278   : > { %v4456_v57 = vpop.f32.mrf.mxu0 }
 0x279   : > { %v4539_v58 = vpop.f32.mrf.mxu1  ;;  %v4457_v7 = vadd.f32 %v4456_v57, %v7811_v16  ;;  %v7887_v28 = vadd.f32 %v4537_v11, %v4455_v42 }
 0x27a   : > { %v4458_v27 = vpop.f32.mrf.mxu0 }
 0x27b   : > { %v4541_v52 = vpop.f32.mrf.mxu1  ;;  %v4459_v1 = vadd.f32 %v4458_v27, %v7814_v61  ;;  %v7890_v29 = vadd.f32 %v4539_v58, %v4457_v7 }
 0x27d   : > { %v7892_v18 = vadd.f32 %v4541_v52, %v4459_v1 }
 0x294   : > { %v4578_v40 = vpop.f32.mrf.mxu0 }
 0x295   : > { %v4661_v46 = vpop.f32.mrf.mxu1  ;;  %v4579_v59 = vadd.f32 %v4578_v40, %v7821_v0 }
 0x296   : > { %v4580_v51 = vpop.f32.mrf.mxu0 }
 0x297   : > { %v4663_v43 = vpop.f32.mrf.mxu1  ;;  %v7895_v15 = vadd.f32 %v4661_v46, %v4579_v59  ;;  %v4581_v16 = vadd.f32 %v4580_v51, %v7824_v31 }
 0x298   : > { %v4582_v49 = vpop.f32.mrf.mxu0 }
 0x299   : > { %v4665_v50 = vpop.f32.mrf.mxu1  ;;  %v7898_v34 = vadd.f32 %v4663_v43, %v4581_v16  ;;  %v4583_v61 = vadd.f32 %v4582_v49, %v7827_v6 }
 0x29a   : > { %v4584_v36 = vpop.f32.mrf.mxu0 }
 0x29b   : > { %v4667_v63 = vpop.f32.mrf.mxu1  ;;  %v7901_v24 = vadd.f32 %v4665_v50, %v4583_v61  ;;  %v4585_v22 = vadd.f32 %v4584_v36, %v7832_v10 }
 0x29c   : > { %v4588_v60 = vpop.f32.mrf.mxu0 }
 0x29d   : > { %v4671_v0 = vpop.f32.mrf.mxu1  ;;  %v7904_v4 = vadd.f32 %v4667_v63, %v4585_v22  ;;  %v4589_v37 = vadd.f32 %v4588_v60, %v7838_v48 }
 0x29e   : > { %v4590_v53 = vpop.f32.mrf.mxu0 }
 0x29f   : > { %v4673_v31 = vpop.f32.mrf.mxu1  ;;  %v4591_v32 = vadd.f32 %v4590_v53, %v7841_v44  ;;  %v7908_v3 = vadd.f32 %v4671_v0, %v4589_v37 }
 0x2a0   : > { %v4592_v13 = vpop.f32.mrf.mxu0 }
 0x2a1   : > { %v4675_v6 = vpop.f32.mrf.mxu1  ;;  %v4593_v19 = vadd.f32 %v4592_v13, %v7844_v54  ;;  %v7911_v8 = vadd.f32 %v4673_v31, %v4591_v32 }
 0x2a2   : > { %v4594_v33 = vpop.f32.mrf.mxu0 }
 0x2a3   : > { %v4677_v10 = vpop.f32.mrf.mxu1  ;;  %v4595_v12 = vadd.f32 %v4594_v33, %v7851_v56  ;;  %v7914_v47 = vadd.f32 %v4675_v6, %v4593_v19 }
 0x2a4   : > { %v4598_v2 = vpop.f32.mrf.mxu0 }
 0x2a5   : > { %v4681_v48 = vpop.f32.mrf.mxu1  ;;  %v4599_v5 = vadd.f32 %v4598_v2, %v7854_v39  ;;  %v7917_v26 = vadd.f32 %v4677_v10, %v4595_v12 }
 0x2a6   : > { %v4600_v44 = vpop.f32.mrf.mxu0 }
 0x2a7   : > { %v4683_v55 = vpop.f32.mrf.mxu1  ;;  %v4601_v21 = vadd.f32 %v4600_v44, %v7857_v25  ;;  %v7920_v35 = vadd.f32 %v4681_v48, %v4599_v5 }
 0x2a8   : > { %v4602_v54 = vpop.f32.mrf.mxu0 }
 0x2a9   : > { %v4685_v20 = vpop.f32.mrf.mxu1  ;;  %v4603_v14 = vadd.f32 %v4602_v54, %v7860_v45  ;;  %v7923_v9 = vadd.f32 %v4683_v55, %v4601_v21 }
 0x2aa   : > { %v4604_v56 = vpop.f32.mrf.mxu0 }
 0x2ab   : > { %v4687_v11 = vpop.f32.mrf.mxu1  ;;  %v4605_v42 = vadd.f32 %v4604_v56, %v7867_v17  ;;  %v7926_v57 = vadd.f32 %v4685_v20, %v4603_v14 }
 0x2ac   : > { %v4608_v39 = vpop.f32.mrf.mxu0 }
 0x2ad   : > { %v4691_v58 = vpop.f32.mrf.mxu1  ;;  %v4609_v7 = vadd.f32 %v4608_v39, %v7870_v23  ;;  %v7929_v27 = vadd.f32 %v4687_v11, %v4605_v42 }
 0x2ae   : > { %v4610_v25 = vpop.f32.mrf.mxu0 }
 0x2af   : > { %v4693_v52 = vpop.f32.mrf.mxu1  ;;  %v4611_v1 = vadd.f32 %v4610_v25, %v7873_v62  ;;  %v7932_v40 = vadd.f32 %v4691_v58, %v4609_v7 }
 0x2b0   : > { %v4612_v45 = vpop.f32.mrf.mxu0 }
 0x2b1   : > { %v4695_v46 = vpop.f32.mrf.mxu1  ;;  %v4613_v59 = vadd.f32 %v4612_v45, %v7876_v38  ;;  %v7935_v51 = vadd.f32 %v4693_v52, %v4611_v1 }
 0x2b2   : > { %v4614_v17 = vpop.f32.mrf.mxu0 }
 0x2b3   : > { %v4697_v43 = vpop.f32.mrf.mxu1  ;;  %v4615_v16 = vadd.f32 %v4614_v17, %v7881_v30  ;;  %v7938_v49 = vadd.f32 %v4695_v46, %v4613_v59 }
 0x2b4   : > { %v4618_v23 = vpop.f32.mrf.mxu0 }
 0x2b5   : > { %v4701_v50 = vpop.f32.mrf.mxu1  ;;  %v4619_v61 = vadd.f32 %v4618_v23, %v7884_v41  ;;  %v7941_v36 = vadd.f32 %v4697_v43, %v4615_v16 }
 0x2b6   : > { %v4620_v62 = vpop.f32.mrf.mxu0 }
 0x2b7   : > { %v4703_v63 = vpop.f32.mrf.mxu1  ;;  %v4621_v22 = vadd.f32 %v4620_v62, %v7887_v28  ;;  %v7944_v60 = vadd.f32 %v4701_v50, %v4619_v61 }
 0x2b8   : > { %v4622_v38 = vpop.f32.mrf.mxu0 }
 0x2b9   : > { %v4705_v0 = vpop.f32.mrf.mxu1  ;;  %v4623_v37 = vadd.f32 %v4622_v38, %v7890_v29  ;;  %v7947_v53 = vadd.f32 %v4703_v63, %v4621_v22 }
 0x2ba   : > { %v4624_v30 = vpop.f32.mrf.mxu0 }
 0x2bb   : > { %v4707_v31 = vpop.f32.mrf.mxu1  ;;  %v4625_v32 = vadd.f32 %v4624_v30, %v7892_v18  ;;  %v7950_v13 = vadd.f32 %v4705_v0, %v4623_v37 }
 0x2bd   : > { %8289 = vst [vmem:[#allocation22_spill] sm:$0xff] %v7950_v13  ;;  %v7952_v41 = vadd.f32 %v4707_v31, %v4625_v32 }
 0x2bf   : > { %8290 = vst [vmem:[#allocation23_spill] sm:$0xff] %v7952_v41 }
 0x2d4   : > { %v4744_v6 = vpop.f32.mrf.mxu0 }
 0x2d5   : > { %v4827_v19 = vpop.f32.mrf.mxu1  ;;  %v4745_v28 = vadd.f32 %v4744_v6, %v7895_v15 }
 0x2d6   : > { %v4746_v33 = vpop.f32.mrf.mxu0 }
 0x2d7   : > { %v4829_v10 = vpop.f32.mrf.mxu1  ;;  %v4828_v12 = vadd.f32 %v4827_v19, %v4745_v28  ;;  %v4747_v2 = vadd.f32 %v4746_v33, %v7898_v34 }
 0x2d8   : > { %v4748_v29 = vpop.f32.mrf.mxu0 }
 0x2d9   : > { %v4831_v48 = vpop.f32.mrf.mxu1  ;;  %v4830_v5 = vadd.f32 %v4829_v10, %v4747_v2  ;;  %v4749_v44 = vadd.f32 %v4748_v29, %v7901_v24 }
 0x2da   : > { %v4750_v55 = vpop.f32.mrf.mxu0 }
 0x2db   : > { %v4833_v18 = vpop.f32.mrf.mxu1  ;;  %v4832_v21 = vadd.f32 %v4831_v48, %v4749_v44  ;;  %v4751_v54 = vadd.f32 %v4750_v55, %v7904_v4 }
 0x2dc   : > { %v4754_v20 = vpop.f32.mrf.mxu0 }
 0x2dd   : > { %v4837_v14 = vpop.f32.mrf.mxu1  ;;  %v4834_v56 = vadd.f32 %v4833_v18, %v4751_v54  ;;  %v4755_v2 = vadd.f32 %v4754_v20, %v7908_v3 }
 0x2de   : > { %v4756_v11 = vpop.f32.mrf.mxu0 }
 0x2df   : > { %v4839_v15 = vpop.f32.mrf.mxu1  ;;  %v4757_v48 = vadd.f32 %v4756_v11, %v7911_v8 }
 0x2e0   : > { %v4758_v42 = vpop.f32.mrf.mxu0 }
 0x2e1   : > { %v7958_v39 = vpop.f32.mrf.mxu1  ;;  %v4759_v13 = vadd.f32 %v4758_v42, %v7914_v47 }
 0x2e2   : > { %v4760_v58 = vpop.f32.mrf.mxu0 }
 0x2e3   : > { %v7960_v34 = vpop.f32.mrf.mxu1 }
 0x2e4   : > { %v4764_v7 = vpop.f32.mrf.mxu0 }
 0x2e5   : > { %v7962_v25 = vpop.f32.mrf.mxu1  ;;  %v4765_v3 = vadd.f32 %v4764_v7, %v7920_v35  ;;  %v4842_v35 = vadd.f32 %v7958_v39, %v4759_v13 }
 0x2e6   : > { %v4766_v24 = vpop.f32.mrf.mxu0 }
 0x2e7   : > { %v7964_v52 = vpop.f32.mrf.mxu1  ;;  %v4767_v8 = vadd.f32 %v4766_v24, %v7923_v9 }
 0x2e8   : > { %v4768_v1 = vpop.f32.mrf.mxu0 }
 0x2e9   : > { %v7966_v45 = vpop.f32.mrf.mxu1 }
 0x2ea   : > { %v4770_v4 = vpop.f32.mrf.mxu0 }
 0x2eb   : > { %v7968_v46 = vpop.f32.mrf.mxu1 }
 0x2ec   : > { %v4774_v59 = vpop.f32.mrf.mxu0 }
 0x2ed   : > { %v7970_v17 = vpop.f32.mrf.mxu1  ;;  %v4775_v9 = vadd.f32 %v4774_v59, %v7932_v40 }
 0x2ee   : > { %v7972_v43 = vpop.f32.mrf.mxu0 }
 0x2ef   : > { %v7974_v16 = vpop.f32.mrf.mxu1  ;;  %v4777_v59 = vadd.f32 %v7972_v43, %v7935_v51 }
 0x2f0   : > { %v7976_v23 = vpop.f32.mrf.mxu0 }
 0x2f1   : > { %v7978_v50 = vpop.f32.mrf.mxu1 }
 0x2f2   : > { %v7980_v61 = vpop.f32.mrf.mxu0 }
 0x2f3   : > { %v7982_v62 = vpop.f32.mrf.mxu1 }
 0x2f4   : > { %v7984_v63 = vpop.f32.mrf.mxu0 }
 0x2f5   : > { %v7986_v22 = vpop.f32.mrf.mxu1 }
 0x2f6   : > { %v7988_v38 = vpop.f32.mrf.mxu0 }
 0x2f7   : > { %v7990_v0 = vpop.f32.mrf.mxu1 }
 0x2f8   : > { %8291 = vst [vmem:[#allocation24_spill] sm:$0xff] %v7990_v0  ;;  %v7992_v37 = vpop.f32.mrf.mxu0  ;;  %v4838_v0 = vadd.f32 %v4837_v14, %v4755_v2  ;;  %v4771_v14 = vadd.f32 %v4770_v4, %v7929_v27 }
 0x2f9   : > { %8292 = vst [vmem:[#allocation25_spill] sm:$0xff] %v7992_v37  ;;  %v7994_v30 = vpop.f32.mrf.mxu1 }
 0x2fa   : > { %8293 = vst [vmem:[#allocation26_spill] sm:$0xff] %v7994_v30  ;;  %v7996_v31 = vpop.f32.mrf.mxu0 }
 0x2fb   : > { %8294 = vst [vmem:[#allocation54_spill] sm:$0xff] %v7996_v31  ;;  %v7998_v32 = vpop.f32.mrf.mxu1 }
 0x2fc   : > { %8295 = vst [vmem:[#allocation55_spill] sm:$0xff] %v7998_v32 }
 0x314   : > { %v4910_v6 = vpop.f32.mrf.mxu0 }
 0x315   : > { %v4993_v19 = vpop.f32.mrf.mxu1  ;;  %v4911_v28 = vadd.f32 %v4910_v6, %v4828_v12  ;;  %v4840_v12 = vadd.f32 %v4839_v15, %v4757_v48  ;;  %v4761_v6 = vadd.f32 %v4760_v58, %v7917_v26 }
 0x316   : > { %v4912_v33 = vpop.f32.mrf.mxu0 }
 0x317   : > { %v4995_v10 = vpop.f32.mrf.mxu1  ;;  %v4913_v29 = vadd.f32 %v4912_v33, %v4830_v5  ;;  %v4994_v18 = vadd.f32 %v4993_v19, %v4911_v28  ;;  %v4769_v28 = vadd.f32 %v4768_v1, %v7926_v57  ;;  %v4844_v58 = vadd.f32 %v7960_v34, %v4761_v6 }
 0x318   : > { %v4914_v44 = vpop.f32.mrf.mxu0  ;;  %v4850_v57 = vadd.f32 %v7964_v52, %v4767_v8  ;;  %v4779_v52 = vadd.f32 %v7976_v23, %v7938_v49 }
 0x319   : > { %v4997_v55 = vpop.f32.mrf.mxu1  ;;  %v4915_v54 = vadd.f32 %v4914_v44, %v4832_v21  ;;  %v4996_v31 = vadd.f32 %v4995_v10, %v4913_v29  ;;  %v5044_v11 = vmax.f32 %v4994_v18, 0.0  ;;  %v4852_v4 = vadd.f32 %v7966_v45, %v4769_v28 }
 0x31a   : > { %v4916_v41 = vpop.f32.mrf.mxu0  ;;  %v4781_v18 = vadd.f32 %v7980_v61, %v7941_v36  ;;  %v4787_v36 = vadd.f32 %v7988_v38, %v7947_v53 }
 0x31b   : > { %v4999_v30 = vpop.f32.mrf.mxu1  ;;  %v4998_v37 = vadd.f32 %v4997_v55, %v4915_v54  ;;  %v4917_v32 = vadd.f32 %v4916_v41, %v4834_v56  ;;  %v5045_v47 = vmax.f32 %v4996_v31, 0.0  ;;  %v4785_v54 = vadd.f32 %v7984_v63, %v7944_v60 }
 0x31c   : > { %v4920_v5 = vpop.f32.mrf.mxu0  ;;  %v4864_v28 = vadd.f32 %v7982_v62, %v4781_v18 }
 0x31d   : > { %v5003_v20 = vpop.f32.mrf.mxu1  ;;  %v5048_v19 = vmax.f32 %v4998_v37, 0.0  ;;  %v5000_v21 = vadd.f32 %v4999_v30, %v4917_v32  ;;  %v4921_v33 = vadd.f32 %v4920_v5, %v4838_v0  ;;  %v4848_v37 = vadd.f32 %v7962_v25, %v4765_v3 }
 0x31e   : > { %v4922_v41 = vpop.f32.mrf.mxu0  ;;  %v4854_v0 = vadd.f32 %v7968_v46, %v4771_v14  ;;  %v4858_v25 = vadd.f32 %v7970_v17, %v4775_v9  ;;  %v4860_v5 = vadd.f32 %v7974_v16, %v4777_v59  ;;  %v4868_v16 = vadd.f32 %v7986_v22, %v4785_v54  ;;  %v8300_v59 = vld [vmem:[#allocation54_spill] sm:$0xff] }
 0x31f   : > { %v5005_v56 = vpop.f32.mrf.mxu1  ;;  %v5096_v15 = vadd.f32 %v5048_v19, %v5044_v11  ;;  %v5049_v42 = vmax.f32 %v5000_v21, 0.0  ;;  %v4923_v26 = vadd.f32 %v4922_v41, %v4840_v12  ;;  %v5004_v30 = vadd.f32 %v5003_v20, %v4921_v33 }
 0x320   : > { %v4924_v7 = vpop.f32.mrf.mxu0  ;;  %v4862_v20 = vadd.f32 %v7978_v50, %v4779_v52 }
 0x321   : > { %v5007_v24 = vpop.f32.mrf.mxu1  ;;  %v5097_v27 = vrot.slane %v5096_v15, 4  ;;  %v5103_v1 = vadd.f32 %v5049_v42, %v5045_v47  ;;  %v4925_v31 = vadd.f32 %v4924_v7, %v4842_v35  ;;  %v5006_v10 = vadd.f32 %v5005_v56, %v4923_v26  ;;  %v8296_v26 = vld [vmem:[#allocation22_spill] sm:$0xff]  ;;  %v8297_v35 = vld [vmem:[#allocation25_spill] sm:$0xff] }
 0x322   : > { %v4926_v32 = vpop.f32.mrf.mxu0  ;;  %v5052_v12 = vmax.f32 %v5004_v30, 0.0 }
 0x323   : > { %v5009_v13 = vpop.f32.mrf.mxu1  ;;  %v5098_v39 = vadd.f32 %v5097_v27, %v5096_v15  ;;  %v5104_v34 = vrot.slane %v5103_v1, 4  ;;  %v4927_v40 = vadd.f32 %v4926_v32, %v4844_v58  ;;  %v5008_v2 = vadd.f32 %v5007_v24, %v4925_v31 }
 0x324   : > { %v4930_v45 = vpop.f32.mrf.mxu0  ;;  %v5053_v49 = vmax.f32 %v5006_v10, 0.0  ;;  %v4789_v58 = vadd.f32 %v8297_v35, %v8296_v26 }
 0x325   : > { %v5013_v29 = vpop.f32.mrf.mxu1  ;;  %v5099_v46 = vrot.slane %v5098_v39, 2  ;;  %v5105_v48 = vadd.f32 %v5104_v34, %v5103_v1  ;;  %v5010_v44 = vadd.f32 %v5009_v13, %v4927_v40  ;;  %v4931_v55 = vadd.f32 %v4930_v45, %v4848_v37  ;;  %v8298_v37 = vld [vmem:[#allocation24_spill] sm:$0xff]  ;;  %v8299_v40 = vld [vmem:[#allocation23_spill] sm:$0xff] }
 0x326   : > { %v5056_v51 = vmax.f32 %v5008_v2, 0.0  ;;  %v4932_v43 = vpop.f32.mrf.mxu0  ;;  %v4870_v62 = vadd.f32 %v8298_v37, %v4787_v36  ;;  %v4791_v52 = vadd.f32 %v8300_v59, %v8299_v40 }
 0x327   : > { %v5015_v17 = vpop.f32.mrf.mxu1  ;;  %v5100_v6 = vadd.f32 %v5099_v46, %v5098_v39  ;;  %v5106_v3 = vrot.slane %v5105_v48, 2  ;;  %v5057_v23 = vmax.f32 %v5010_v44, 0.0  ;;  %v4933_v11 = vadd.f32 %v4932_v43, %v4850_v57 }
 0x328   : > { %v5124_v8 = vadd.f32 %v5056_v51, %v5052_v12  ;;  %v4934_v19 = vpop.f32.mrf.mxu0  ;;  %v5014_v63 = vadd.f32 %v5013_v29, %v4931_v55  ;;  %v8301_v12 = vld [vmem:[#allocation26_spill] sm:$0xff] }
 0x329   : > { %v5017_v21 = vpop.f32.mrf.mxu1  ;;  %v5107_v60 = vadd.f32 %v5106_v3, %v5105_v48  ;;  %v5131_v61 = vadd.f32 %v5057_v23, %v5053_v49  ;;  %v5101_v14 = vrot.slane %v5100_v6, 1  ;;  %v4935_v41 = vadd.f32 %v4934_v19, %v4852_v4 }
 0x32a   : > { %v5125_v33 = vrot.slane %v5124_v8, 4  ;;  %v4936_v56 = vpop.f32.mrf.mxu0  ;;  %v5016_v15 = vadd.f32 %v5015_v17, %v4933_v11  ;;  %v5060_v27 = vmax.f32 %v5014_v63, 0.0 }
 0x32b   : > { %v5019_v47 = vpop.f32.mrf.mxu1  ;;  %v5132_v50 = vrot.slane %v5131_v61, 4  ;;  %v4937_v42 = vadd.f32 %v4936_v56, %v4854_v0  ;;  %v5108_v9 = vrot.slane %v5107_v60, 1  ;;  %v5018_v38 = vadd.f32 %v5017_v21, %v4935_v41 }
 0x32c   : > { %v5126_v53 = vadd.f32 %v5125_v33, %v5124_v8  ;;  %v4940_v7 = vpop.f32.mrf.mxu0  ;;  %v5102_v4 = vadd.f32 %v5101_v14, %v5100_v6  ;;  %v5061_v39 = vmax.f32 %v5016_v15, 0.0 }
 0x32d   : > { %v5023_v24 = vpop.f32.mrf.mxu1  ;;  %v5133_v57 = vadd.f32 %v5132_v50, %v5131_v61  ;;  %v5020_v1 = vadd.f32 %v5019_v47, %v4937_v42  ;;  %v5064_v31 = vmax.f32 %v5018_v38, 0.0  ;;  %v4941_v22 = vadd.f32 %v4940_v7, %v4858_v25 }
 0x32e   : > { %v5127_v30 = vrot.slane %v5126_v53, 2  ;;  %v4942_v32 = vpop.f32.mrf.mxu0  ;;  %v5109_v2 = vadd.f32 %v5108_v9, %v5107_v60  ;;  %v4872_v25 = vadd.f32 %v8301_v12, %v4789_v58  ;;  %v5225_v51 = vmul.f32 0.0625, %v5102_v4 }
 0x32f   : > { %v5025_v13 = vpop.f32.mrf.mxu1  ;;  %v5134_v0 = vrot.slane %v5133_v57, 2  ;;  %v5065_v34 = vmax.f32 %v5020_v1, 0.0  ;;  %v4943_v10 = vadd.f32 %v4942_v32, %v4860_v5  ;;  %v5152_v29 = vadd.f32 %v5064_v31, %v5060_v27 }
 0x330   : > { %v5128_v45 = vadd.f32 %v5127_v30, %v5126_v53  ;;  %v4944_v46 = vpop.f32.mrf.mxu0  ;;  %v5024_v18 = vadd.f32 %v5023_v24, %v4941_v22  ;;  %v5226_v11 = vmul.f32 0.0625, %v5109_v2 }
 0x331   : > { %v5027_v48 = vpop.f32.mrf.mxu1  ;;  %v5135_v44 = vadd.f32 %v5134_v0, %v5133_v57  ;;  %v5159_v55 = vadd.f32 %v5065_v34, %v5061_v39  ;;  %v4945_v54 = vadd.f32 %v4944_v46, %v4862_v20  ;;  %v5153_v17 = vrot.slane %v5152_v29, 4  ;;  %v8302_v57 = vld [vmem:[#allocation55_spill] sm:$0xff] }
 0x332   : > { %v5129_v43 = vrot.slane %v5128_v45, 1  ;;  %v4946_v6 = vpop.f32.mrf.mxu0  ;;  %v5026_v5 = vadd.f32 %v5025_v13, %v4943_v10  ;;  %v5068_v20 = vmax.f32 %v5024_v18, 0.0  ;;  %v4874_v27 = vadd.f32 %v8302_v57, %v4791_v52 }
 0x333   : > { %v5029_v3 = vpop.f32.mrf.mxu1  ;;  %v5136_v49 = vrot.slane %v5135_v44, 1  ;;  %v5160_v23 = vrot.slane %v5159_v55, 4  ;;  %v5028_v8 = vadd.f32 %v5027_v48, %v4945_v54  ;;  %v5154_v21 = vadd.f32 %v5153_v17, %v5152_v29 }
 0x334   : > { %v5130_v19 = vadd.f32 %v5129_v43, %v5128_v45  ;;  %v4947_v36 = vadd.f32 %v4946_v6, %v4864_v28  ;;  %v4950_v60 = vpop.f32.mrf.mxu0  ;;  %v5069_v58 = vmax.f32 %v5026_v5, 0.0 }
 0x335   : > { %v5033_v61 = vpop.f32.mrf.mxu1  ;;  %v5137_v63 = vadd.f32 %v5136_v49, %v5135_v44  ;;  %v5161_v14 = vadd.f32 %v5160_v23, %v5159_v55  ;;  %v5072_v33 = vmax.f32 %v5028_v8, 0.0  ;;  %v5155_v56 = vrot.slane %v5154_v21, 2 }
 0x336   : > { %v5229_v41 = vmul.f32 0.0625, %v5130_v19  ;;  %v5030_v47 = vadd.f32 %v5029_v3, %v4947_v36  ;;  %v4951_v50 = vadd.f32 %v4950_v60, %v4868_v16  ;;  %v4952_v15 = vpop.f32.mrf.mxu0 }
 0x337   : > { %v5035_v42 = vpop.f32.mrf.mxu1  ;;  %v5230_v26 = vmul.f32 0.0625, %v5137_v63  ;;  %v5162_v35 = vrot.slane %v5161_v14, 2  ;;  %v5180_v9 = vadd.f32 %v5072_v33, %v5068_v20  ;;  %v5156_v38 = vadd.f32 %v5155_v56, %v5154_v21 }
 0x338   : > { %v5275_v53 = vsel %vm5263_vm0, %v5229_v41, %v5225_v51  ;;  %v5073_v28 = vmax.f32 %v5030_v47, 0.0  ;;  %v4953_v7 = vadd.f32 %v4952_v15, %v4870_v62  ;;  %v4954_v24 = vpop.f32.mrf.mxu0  ;;  %v5034_v22 = vadd.f32 %v5033_v61, %v4951_v50 }
 0x339   : > { %v5037_v37 = vpop.f32.mrf.mxu1  ;;  %v5279_v1 = vsel %vm5263_vm0, %v5230_v26, %v5226_v11  ;;  %v5163_v4 = vadd.f32 %v5162_v35, %v5161_v14  ;;  %v5181_v30 = vrot.slane %v5180_v9, 4  ;;  %v5157_v16 = vrot.slane %v5156_v38, 1 }
 0x33a   : > { %v5187_v31 = vadd.f32 %v5073_v28, %v5069_v58  ;;  %v4955_v32 = vadd.f32 %v4954_v24, %v4872_v25  ;;  %v4956_v13 = vpop.f32.mrf.mxu0  ;;  %v5036_v34 = vadd.f32 %v5035_v42, %v4953_v7  ;;  %v5076_v44 = vmax.f32 %v5034_v22, 0.0 }
 0x33b   : > { %v5164_v0 = vrot.slane %v5163_v4, 1  ;;  %v5182_v39 = vadd.f32 %v5181_v30, %v5180_v9  ;;  %v4957_v10 = vadd.f32 %v4956_v13, %v4874_v27  ;;  %v5158_v40 = vadd.f32 %v5157_v16, %v5156_v38  ;;  %v5039_v2 = vpop.f32.mrf.mxu1 }
 0x33c   : > { %v5188_v59 = vrot.slane %v5187_v31, 4  ;;  %v5038_v62 = vadd.f32 %v5037_v37, %v4955_v32  ;;  %v5077_v12 = vmax.f32 %v5036_v34, 0.0 }
 0x33d   : > { %v5165_v45 = vadd.f32 %v5164_v0, %v5163_v4  ;;  %v5183_v29 = vrot.slane %v5182_v39, 2  ;;  %v5040_v52 = vadd.f32 %v5039_v2, %v4957_v10  ;;  %v5233_v46 = vmul.f32 0.0625, %v5158_v40 }
 0x33e   : > { %v5189_v48 = vadd.f32 %v5188_v59, %v5187_v31  ;;  %v5080_v55 = vmax.f32 %v5038_v62, 0.0 }
 0x33f   : > { %v5234_v18 = vmul.f32 0.0625, %v5165_v45  ;;  %v5184_v54 = vadd.f32 %v5183_v29, %v5182_v39  ;;  %v5081_v25 = vmax.f32 %v5040_v52, 0.0  ;;  %v5276_v51 = vsel %vm5265_vm1, %v5233_v46, %v5275_v53 }
 0x340   : > { %v5190_v43 = vrot.slane %v5189_v48, 2  ;;  %v5208_v17 = vadd.f32 %v5080_v55, %v5076_v44 }
 0x341   : > { %v5280_v6 = vsel %vm5265_vm1, %v5234_v18, %v5279_v1  ;;  %v5185_v3 = vrot.slane %v5184_v54, 1  ;;  %v5215_v49 = vadd.f32 %v5081_v25, %v5077_v12 }
 0x342   : > { %v5191_v23 = vadd.f32 %v5190_v43, %v5189_v48  ;;  %v5209_v5 = vrot.slane %v5208_v17, 4 }
 0x343   : > { %v5186_v8 = vadd.f32 %v5185_v3, %v5184_v54  ;;  %v5216_v11 = vrot.slane %v5215_v49, 4 }
 0x344   : > { %v5192_v19 = vrot.slane %v5191_v23, 1  ;;  %v5210_v21 = vadd.f32 %v5209_v5, %v5208_v17 }
 0x345   : > { %v5237_v36 = vmul.f32 0.0625, %v5186_v8  ;;  %v5217_v60 = vadd.f32 %v5216_v11, %v5215_v49 }
 0x346   : > { %v5193_v61 = vadd.f32 %v5192_v19, %v5191_v23  ;;  %v5211_v63 = vrot.slane %v5210_v21, 2 }
 0x347   : > { %v5277_v14 = vsel %vm5267_vm2, %v5237_v36, %v5276_v51  ;;  %v5218_v20 = vrot.slane %v5217_v60, 2 }
 0x348   : > { %v5238_v33 = vmul.f32 0.0625, %v5193_v61  ;;  %v5212_v41 = vadd.f32 %v5211_v63, %v5210_v21 }
 0x349   : > { %v5219_v56 = vadd.f32 %v5218_v20, %v5217_v60 }
 0x34a   : > { %v5281_v47 = vsel %vm5267_vm2, %v5238_v33, %v5280_v6  ;;  %v5213_v50 = vrot.slane %v5212_v41, 1 }
 0x34b   : > { %v5220_v15 = vrot.slane %v5219_v56, 1 }
 0x34c   : > { %v5214_v42 = vadd.f32 %v5213_v50, %v5212_v41 }
 0x34d   : > { %v5221_v26 = vadd.f32 %v5220_v15, %v5219_v56 }
 0x34e   : > { %v5241_v35 = vmul.f32 0.0625, %v5214_v42 }
 0x34f   : > { %v5242_v58 = vmul.f32 0.0625, %v5221_v26 }
 0x350   : > { %v5278_v9 = vsel %vm5269_vm3, %v5241_v35, %v5277_v14 }
 0x351   : > { %5289 = vst [vmem:[%s7805_s21 + $0x10] sm:$0x1f] %v5278_v9  ;;  %v5282_v53 = vsel %vm5269_vm3, %v5242_v58, %v5281_v47 }
 0x352   : > { %5290 = vst [vmem:[%s7805_s21 + $0x18] sm:$0x1f] %v5282_v53 }
 0x353 PF: > { %p14_p12 = scmp.ge.s32.totalorder %s6951_s5, 4   ;;  %s8303_s12 = smov %s6852_s13 }
 0x354   : > { %s8304_s13 = smov %s6856_s14  ;;  %s8305_s14 = smov %s6962_s9 }
 0x355   : > { %s8306_s15 = smov %s6951_s5  ;;  %16 = sbr.rel (!%p14_p12) target bundleno = 4 (0x4), region = 80 }
 0x35a   :  { %5312 = vsyncpa [#allocation3], 1 }
 0x35b   :  { %5314 = vsyncpa [#allocation3 + $0x1], 1 }
 0x35c   :  { %5315 = vsyncpa [#allocation5], 1 }

</bundles_post_ra>
